<compile_context>
chip_gen: v7x
topology: tpu7x:2x2x1
jax: 0.10.0
libtpu: 0.0.40
codegen_flags: <defaults>
</compile_context>

<pallas_src>
import jax
import jax.numpy as jnp
from jax.experimental import pallas as pl
from jax.experimental.pallas import tpu as pltpu


def _relu(x):
    return jnp.maximum(x, 0.0)


# ------------------------------- kernel -------------------------------------

def _make_hg_kernel(c1, cm, c2, n, k, lightconv, add, H, W, L):
    """Kernel for one lane block of L = (#images)*H*W flattened pixels."""
    c2h = c2 // 2
    p = k // 2
    kk = k * k
    # Static tap table over the flattened (batch-folded) lane axis:
    # taps[t] = (roll shift, mask row, needs_mask)
    taps = []
    for di in range(k):
        for dj in range(k):
            off = (di - p) * W + (dj - p)
            taps.append(((-off) % L, di * k + dj, not (di == p and dj == p)))

    def kernel(x_ref, masks_ref, *refs):
        o_ref = refs[-1]
        prm = list(refs[:-1])

        # ---- unpack packed parameter slabs (static Python bookkeeping) ----
        idx = 0
        if lightconv:
            w1_first = prm[idx]; idx += 1
            w1_rest = None
            if n > 1:
                w1_rest = prm[idx]; idx += 1
            wdw_ref = prm[idx]; idx += 1
            bdw_ref = prm[idx]; idx += 1
        else:
            wblk_first = prm[idx]; idx += 1
            wblk_rest = None
            if n > 1:
                wblk_rest = prm[idx]; idx += 1
        wsc_last_ref = prm[idx]; idx += 1
        wec_ref = prm[idx]

        masks = masks_ref[...]                       # (k*k, L) 0/1 float32
        x = x_ref[...]                               # (c1, L)  float32
        ones_row = jnp.ones((1, L), jnp.float32)

        def rolled(z, shift):
            return z if shift == 0 else pltpu.roll(z, shift, axis=1)

        # Hoisted mask broadcasts: built ONCE, reused for all n blocks.
        def big_mask(cin):
            # stacked im2col validity mask (kk*cin + 1, L); the center tap row
            # of `masks` is all-ones, and the trailing ones-row covers the bias.
            rows = [jnp.broadcast_to(masks[t:t + 1, :], (cin, L)) for t in range(kk)]
            rows.append(ones_row)
            return jnp.concatenate(rows, axis=0)

        def im2col(z, mb):
            # Stack the kk shifted copies (+ ones row for the folded bias)
            # along sublanes, mask once, feed bf16 to the MXU.
            pieces = [rolled(z, s) for (s, _, _) in taps]
            pieces.append(ones_row)
            return (jnp.concatenate(pieces, axis=0) * mb).astype(jnp.bfloat16)

        acc_sc = None

        if not lightconv:
            mb_first = big_mask(c1)
            mb_rest = mb_first if (cm == c1 or n == 1) else big_mask(cm)
            z = x
            for i in range(n):
                mb = mb_first if i == 0 else mb_rest
                w = wblk_first[...] if i == 0 else wblk_rest[i - 1]
                # One matmul per block: rows [0:cm] = conv pre-act (+ bias),
                # rows [cm:] = this chunk's sc contribution.
                out = jnp.dot(w, im2col(z, mb), preferred_element_type=jnp.float32)
                z = _relu(out[:cm])
                acc_sc = out[cm:] if acc_sc is None else acc_sc + out[cm:]
        else:
            # Depthwise tap masks broadcast to (cm, L) once (not per block).
            tap_mask_cm = [
                jnp.broadcast_to(masks[t[1]:t[1] + 1, :], (cm, L)) if t[2] else None
                for t in taps]
            z = x
            for i in range(n):
                w1 = w1_first[...] if i == 0 else w1_rest[i - 1]
                zin = jnp.concatenate([z, ones_row], axis=0).astype(jnp.bfloat16)
                out = jnp.dot(w1, zin, preferred_element_type=jnp.float32)
                t1 = out[:cm]                        # 1x1 conv + bias (act=False)
                acc_sc = out[cm:] if acc_sc is None else acc_sc + out[cm:]
                # depthwise kxk + bias + ReLU (f32 VPU; only one tap live at a time)
                wdw = wdw_ref[i]                     # (cm, k*k)
                dw = None
                for ti, (shift, _, nm) in enumerate(taps):
                    c = rolled(t1, shift) * wdw[:, ti:ti + 1]
                    if nm:
                        c = c * tap_mask_cm[ti]
                    dw = c if dw is None else dw + c
                z = _relu(dw + bdw_ref[i])

        # Last concat chunk (z_n feeds no further block); sc bias via ones row.
        zin = jnp.concatenate([z, ones_row], axis=0).astype(jnp.bfloat16)
        acc_sc = acc_sc + jnp.dot(wsc_last_ref[...], zin,
                                  preferred_element_type=jnp.float32)
        sc = _relu(acc_sc)
        ec_in = jnp.concatenate([sc, ones_row], axis=0).astype(jnp.bfloat16)
        outv = _relu(jnp.dot(wec_ref[...], ec_in,
                             preferred_element_type=jnp.float32))
        if add:
            outv = outv + x
        o_ref[...] = outv.astype(o_ref.dtype)

    return kernel


# ------------------------------- wrapper ------------------------------------

def hgblock_forward(x_cf, params, masks, *, c1, cm, c2, n, k, lightconv, add,
                    H, W, lane_splits=1):
    """x_cf: (c1, B*H*W) float32 — channels-first, batch folded into lanes."""
    C1, Ltot = x_cf.shape
    assert C1 == c1 and Ltot % lane_splits == 0
    LB = Ltot // lane_splits
    assert LB % (H * W) == 0, "each lane block must hold whole images"

    kernel = _make_hg_kernel(c1, cm, c2, n, k, lightconv, add, H, W, LB)

    def const_spec(a):
        nd = a.ndim
        return pl.BlockSpec(a.shape, lambda s, _nd=nd: (0,) * _nd)

    in_specs = [pl.BlockSpec((c1, LB), lambda s: (0, s)),
                pl.BlockSpec((k * k, LB), lambda s: (0, s))]
    in_specs += [const_spec(p) for p in params]

    return pl.pallas_call(
        kernel,
        out_shape=jax.ShapeDtypeStruct((c2, Ltot), jnp.float32),
        grid=(lane_splits,),
        in_specs=in_specs,
        out_specs=pl.BlockSpec((c2, LB), lambda s: (0, s)),
        compiler_params=pltpu.CompilerParams(
            dimension_semantics=("parallel",)),
    )(x_cf, masks, *params)


def make_tap_masks(k, H, W):
    """0/1 validity mask per conv tap (di, dj) over the flattened H*W axis."""
    p = k // 2
    h = jnp.arange(H)[:, None]
    w = jnp.arange(W)[None, :]
    rows = []
    for di in range(k):
        for dj in range(k):
            valid = ((h + di - p >= 0) & (h + di - p < H) &
                     (w + dj - p >= 0) & (w + dj - p < W))
            rows.append(valid.reshape(H * W))
    return jnp.stack(rows).astype(jnp.float32)


# --------------------- deterministic parameter setup ------------------------

def _fold_bn(w, gamma, beta, mean, var, eps=1e-3):     # ultralytics BN eps=1e-3
    scale = gamma / jnp.sqrt(var + eps)
    return w * scale.reshape(-1, 1, 1, 1), beta - mean * scale


def _make_conv_bn(key, cout, cin_per_group, ksz):
    kw, kg, kb, km, kv = jax.random.split(key, 5)
    std = 0.5 / float(jnp.sqrt(jnp.float32(cin_per_group * ksz * ksz)))
    w = jax.random.normal(kw, (cout, cin_per_group, ksz, ksz), jnp.float32) * std
    gamma = 1.0 + 0.1 * jax.random.normal(kg, (cout,), jnp.float32)
    beta = 0.1 * jax.random.normal(kb, (cout,), jnp.float32)
    mean = 0.1 * jax.random.normal(km, (cout,), jnp.float32)
    var = 1.0 + 0.1 * jax.random.uniform(kv, (cout,), jnp.float32)
    return _fold_bn(w, gamma, beta, mean, var)


def init_hgblock_params(key, c1, cm, c2, k, n, lightconv):
    """Torch-layout BN-folded parameters (used by the pure-JAX reference)."""
    keys = jax.random.split(key, n + 2)
    torch_p = {"blocks": []}
    for i in range(n):
        cin = c1 if i == 0 else cm
        if lightconv:
            k1, k2 = jax.random.split(keys[i])
            w1, b1 = _make_conv_bn(k1, cm, cin, 1)          # 1x1, act=False
            wd, bd = _make_conv_bn(k2, cm, 1, k)            # depthwise kxk
            torch_p["blocks"].append((w1, b1, wd, bd))
        else:
            w, b = _make_conv_bn(keys[i], cm, cin, k)       # dense kxk
            torch_p["blocks"].append((w, b))
    torch_p["sc"] = _make_conv_bn(keys[n], c2 // 2, c1 + n * cm, 1)
    torch_p["ec"] = _make_conv_bn(keys[n + 1], c2, c2 // 2, 1)
    return torch_p


def pack_kernel_params(torch_p, c1, cm, c2, k, n, lightconv,
                       mxu_dtype=jnp.bfloat16):
    """BN-folded torch weights -> a few packed, MXU-ready (bf16) slabs.

    Per block i (which consumes ys[i]):
      rows [0:cm]        : block weight, bias in the trailing (ones-row) column
      rows [cm:cm+c2//2] : sc's 1x1 chunk for ys[i] (zero bias column)
    so one matmul yields both the block output and the sc contribution.
    """
    c2h = c2 // 2
    kk = k * k
    center = (k // 2) * k + (k // 2)
    wsc, bsc = torch_p["sc"]
    wec, bec = torch_p["ec"]
    wsc2 = wsc[:, :, 0, 0]                                    # (c2h, c1 + n*cm)
    offs = [0]
    for s in [c1] + [cm] * n:
        offs.append(offs[-1] + s)
    sc_chunk = lambda j: wsc2[:, offs[j]:offs[j + 1]]

    params = []
    if lightconv:
        first, rest, wdw_s, bdw_s = None, [], [], []
        for i in range(n):
            w1, b1, wd, bd = torch_p["blocks"][i]
            top = jnp.concatenate([w1[:, :, 0, 0], b1[:, None]], axis=1)
            bot = jnp.concatenate([sc_chunk(i), jnp.zeros((c2h, 1), jnp.float32)], axis=1)
            wst = jnp.concatenate([top, bot], axis=0)         # (cm+c2h, cin+1)
            if i == 0:
                first = wst
            else:
                rest.append(wst)
            wdw_s.append(wd[:, 0].reshape(cm, kk))
            bdw_s.append(bd.reshape(cm, 1))
        params.append(first.astype(mxu_dtype))
        if n > 1:
            params.append(jnp.stack(rest).astype(mxu_dtype))
        params.append(jnp.stack(wdw_s))                       # f32 (VPU path)
        params.append(jnp.stack(bdw_s))                       # f32
    else:
        first, rest = None, []
        for i in range(n):
            cin = c1 if i == 0 else cm
            w, b = torch_p["blocks"][i]
            wflat = jnp.transpose(w, (0, 2, 3, 1)).reshape(cm, kk * cin)
            top = jnp.concatenate([wflat, b[:, None]], axis=1)
            bot = jnp.zeros((c2h, kk * cin + 1), jnp.float32)
            bot = bot.at[:, center * cin:(center + 1) * cin].set(sc_chunk(i))
            wst = jnp.concatenate([top, bot], axis=0)         # (cm+c2h, kk*cin+1)
            if i == 0:
                first = wst
            else:
                rest.append(wst)
        params.append(first.astype(mxu_dtype))
        if n > 1:
            params.append(jnp.stack(rest).astype(mxu_dtype))
    # last concat chunk (z_n) + sc bias in its ones column
    params.append(jnp.concatenate([sc_chunk(n), bsc[:, None]], axis=1).astype(mxu_dtype))
    # ec 1x1 (+ bias column)
    params.append(jnp.concatenate([wec[:, :, 0, 0], bec[:, None]], axis=1).astype(mxu_dtype))
    return params


# --------------------------- pure-JAX reference ------------------------------

def _conv_ref(x, w, b, groups=1):
    y = jax.lax.conv_general_dilated(
        x, w, (1, 1), "SAME",
        dimension_numbers=("NCHW", "OIHW", "NCHW"),
        feature_group_count=groups)
    return y + b.reshape(1, -1, 1, 1)


def hgblock_ref(x, torch_p, k, n, lightconv, add, cm):
    relu = lambda v: jnp.maximum(v, 0.0)
    ys = [x]
    z = x
    for i in range(n):
        if lightconv:
            w1, b1, wd, bd = torch_p["blocks"][i]
            t = _conv_ref(z, w1, b1)                          # 1x1, no act
            z = relu(_conv_ref(t, wd, bd, groups=cm))         # dw kxk + act
        else:
            w, b = torch_p["blocks"][i]
            z = relu(_conv_ref(z, w, b))
        ys.append(z)
    cat = jnp.concatenate(ys, axis=1)
    wsc, bsc = torch_p["sc"]
    wec, bec = torch_p["ec"]
    s = relu(_conv_ref(cat, wsc, bsc))
    e = relu(_conv_ref(s, wec, bec))
    return e + x if add else e


# ---------------------------------- main -------------------------------------

if __name__ == "__main__":
    key = jax.random.PRNGKey(0)
    kx, kp_a, kp_b = jax.random.split(key, 3)

    B, C1, H, W = 2, 16, 16, 16
    CM, C2, K, N = 16, 16, 3, 6
    shortcut = True
    add = shortcut and (C1 == C2)

    x = jax.random.normal(kx, (B, C1, H, W), jnp.float32)      # PyTorch NCHW
    # Fold batch into the lane axis: (C1, B*H*W), image b at lanes [b*HW, (b+1)*HW).
    x_cf = jnp.transpose(x, (1, 0, 2, 3)).reshape(C1, B * H * W)
    masks = jnp.tile(make_tap_masks(K, H, W), (1, B))           # (k*k, B*H*W)

    # v7x has 2 TensorCores/chip -> keep a 2-step "parallel" grid over the lane
    # axis; single-TC chips (v5e/v6e) get one wide B*HW-lane step.
    try:
        kind = jax.devices()[0].device_kind.lower()
    except Exception:
        kind = ""
    lane_splits = 2 if ("v7" in kind and B >= 2) else 1

    for lightconv, kp_key in ((False, kp_a), (True, kp_b)):
        torch_p = init_hgblock_params(kp_key, C1, CM, C2, K, N, lightconv)
        kparams = pack_kernel_params(torch_p, C1, CM, C2, K, N, lightconv)
        out = hgblock_forward(x_cf, kparams, masks, c1=C1, cm=CM, c2=C2, n=N,
                              k=K, lightconv=lightconv, add=add, H=H, W=W,
                              lane_splits=lane_splits)
        out = jax.block_until_ready(out)
        out_nchw = jnp.transpose(out.reshape(C2, B, H, W), (1, 0, 2, 3))
        ref = hgblock_ref(x, torch_p, K, N, lightconv, add, CM)
        scale = float(jnp.maximum(jnp.max(jnp.abs(ref)), 1.0))
        err = float(jnp.max(jnp.abs(out_nchw - ref))) / scale
        # bf16 MXU feeds -> relaxed tolerance (was 1e-4 with f32 matmuls).
        assert err < 2e-2, f"HGBlock mismatch (lightconv={lightconv}): rel err {err}"

    print("KERNEL_OK")
</pallas_src>

<mosaic_0001>
module attributes {stable_mosaic.version = 11 : i64} {
  func.func @kernel(%arg0: i32, %arg1: memref<16x512xf32, #tpu.memory_space<vmem>>, %arg2: memref<9x512xf32, #tpu.memory_space<vmem>>, %arg3: memref<24x145xbf16, #tpu.memory_space<vmem>>, %arg4: memref<5x24x145xbf16, #tpu.memory_space<vmem>>, %arg5: memref<8x17xbf16, #tpu.memory_space<vmem>>, %arg6: memref<16x9xbf16, #tpu.memory_space<vmem>>, %arg7: memref<16x512xf32, #tpu.memory_space<vmem>>) attributes {dimension_semantics = [#tpu.dimension_semantics<parallel>], iteration_bounds = array<i64: 1>, scalar_prefetch = 0 : i64, scratch_operands = 0 : i64, tpu.core_type = #tpu.core_type<tc>, window_params = [{transform_indices = @transform_0, window_bounds = array<i64: 16, 512>}, {transform_indices = @transform_1, window_bounds = array<i64: 9, 512>}, {pipeline_mode = #tpu.pipeline_mode<synchronous>, transform_indices = @transform_2, window_bounds = array<i64: 24, 145>}, {pipeline_mode = #tpu.pipeline_mode<synchronous>, transform_indices = @transform_3, window_bounds = array<i64: 5, 24, 145>}, {pipeline_mode = #tpu.pipeline_mode<synchronous>, transform_indices = @transform_4, window_bounds = array<i64: 8, 17>}, {pipeline_mode = #tpu.pipeline_mode<synchronous>, transform_indices = @transform_5, window_bounds = array<i64: 16, 9>}, {transform_indices = @transform_6, window_bounds = array<i64: 16, 512>}]} {
    %c0 = arith.constant 0 : index
    %c0_0 = arith.constant 0 : index
    %0 = vector.load %arg2[%c0, %c0_0] : memref<9x512xf32, #tpu.memory_space<vmem>>, vector<9x512xf32>
    %c0_1 = arith.constant 0 : index
    %c0_2 = arith.constant 0 : index
    %1 = vector.load %arg1[%c0_1, %c0_2] : memref<16x512xf32, #tpu.memory_space<vmem>>, vector<16x512xf32>
    %cst = arith.constant 1.000000e+00 : f32
    %2 = vector.broadcast %cst : f32 to vector<1x512xf32>
    %3 = vector.extract_strided_slice %0 {offsets = [0, 0], sizes = [1, 512], strides = [1, 1]} : vector<9x512xf32> to vector<1x512xf32>
    %4 = vector.shape_cast %3 : vector<1x512xf32> to vector<1x512xf32>
    %5 = vector.broadcast %4 : vector<1x512xf32> to vector<16x512xf32>
    %6 = vector.extract_strided_slice %0 {offsets = [1, 0], sizes = [1, 512], strides = [1, 1]} : vector<9x512xf32> to vector<1x512xf32>
    %7 = vector.shape_cast %6 : vector<1x512xf32> to vector<1x512xf32>
    %8 = vector.broadcast %7 : vector<1x512xf32> to vector<16x512xf32>
    %9 = vector.extract_strided_slice %0 {offsets = [2, 0], sizes = [1, 512], strides = [1, 1]} : vector<9x512xf32> to vector<1x512xf32>
    %10 = vector.shape_cast %9 : vector<1x512xf32> to vector<1x512xf32>
    %11 = vector.broadcast %10 : vector<1x512xf32> to vector<16x512xf32>
    %12 = vector.extract_strided_slice %0 {offsets = [3, 0], sizes = [1, 512], strides = [1, 1]} : vector<9x512xf32> to vector<1x512xf32>
    %13 = vector.shape_cast %12 : vector<1x512xf32> to vector<1x512xf32>
    %14 = vector.broadcast %13 : vector<1x512xf32> to vector<16x512xf32>
    %15 = vector.extract_strided_slice %0 {offsets = [4, 0], sizes = [1, 512], strides = [1, 1]} : vector<9x512xf32> to vector<1x512xf32>
    %16 = vector.shape_cast %15 : vector<1x512xf32> to vector<1x512xf32>
    %17 = vector.broadcast %16 : vector<1x512xf32> to vector<16x512xf32>
    %18 = vector.extract_strided_slice %0 {offsets = [5, 0], sizes = [1, 512], strides = [1, 1]} : vector<9x512xf32> to vector<1x512xf32>
    %19 = vector.shape_cast %18 : vector<1x512xf32> to vector<1x512xf32>
    %20 = vector.broadcast %19 : vector<1x512xf32> to vector<16x512xf32>
    %21 = vector.extract_strided_slice %0 {offsets = [6, 0], sizes = [1, 512], strides = [1, 1]} : vector<9x512xf32> to vector<1x512xf32>
    %22 = vector.shape_cast %21 : vector<1x512xf32> to vector<1x512xf32>
    %23 = vector.broadcast %22 : vector<1x512xf32> to vector<16x512xf32>
    %24 = vector.extract_strided_slice %0 {offsets = [7, 0], sizes = [1, 512], strides = [1, 1]} : vector<9x512xf32> to vector<1x512xf32>
    %25 = vector.shape_cast %24 : vector<1x512xf32> to vector<1x512xf32>
    %26 = vector.broadcast %25 : vector<1x512xf32> to vector<16x512xf32>
    %27 = vector.extract_strided_slice %0 {offsets = [8, 0], sizes = [1, 512], strides = [1, 1]} : vector<9x512xf32> to vector<1x512xf32>
    %28 = vector.shape_cast %27 : vector<1x512xf32> to vector<1x512xf32>
    %29 = vector.broadcast %28 : vector<1x512xf32> to vector<16x512xf32>
    %30 = tpu.concatenate %5, %8, %11, %14, %17, %20, %23, %26, %29, %2 in 0 : vector<16x512xf32>, vector<16x512xf32>, vector<16x512xf32>, vector<16x512xf32>, vector<16x512xf32>, vector<16x512xf32>, vector<16x512xf32>, vector<16x512xf32>, vector<16x512xf32>, vector<1x512xf32> -> vector<145x512xf32>
    %c0_3 = arith.constant 0 : index
    %c0_4 = arith.constant 0 : index
    %31 = vector.load %arg3[%c0_3, %c0_4] : memref<24x145xbf16, #tpu.memory_space<vmem>>, vector<24x145xbf16>
    %c17_i32 = arith.constant 17 : i32
    %32 = tpu.dynamic_rotate %1 by %c17_i32 dim 1 : vector<16x512xf32>, i32 -> vector<16x512xf32>
    %c16_i32 = arith.constant 16 : i32
    %33 = tpu.dynamic_rotate %1 by %c16_i32 dim 1 : vector<16x512xf32>, i32 -> vector<16x512xf32>
    %c15_i32 = arith.constant 15 : i32
    %34 = tpu.dynamic_rotate %1 by %c15_i32 dim 1 : vector<16x512xf32>, i32 -> vector<16x512xf32>
    %c1_i32 = arith.constant 1 : i32
    %35 = tpu.dynamic_rotate %1 by %c1_i32 dim 1 : vector<16x512xf32>, i32 -> vector<16x512xf32>
    %c511_i32 = arith.constant 511 : i32
    %36 = tpu.dynamic_rotate %1 by %c511_i32 dim 1 : vector<16x512xf32>, i32 -> vector<16x512xf32>
    %c497_i32 = arith.constant 497 : i32
    %37 = tpu.dynamic_rotate %1 by %c497_i32 dim 1 : vector<16x512xf32>, i32 -> vector<16x512xf32>
    %c496_i32 = arith.constant 496 : i32
    %38 = tpu.dynamic_rotate %1 by %c496_i32 dim 1 : vector<16x512xf32>, i32 -> vector<16x512xf32>
    %c495_i32 = arith.constant 495 : i32
    %39 = tpu.dynamic_rotate %1 by %c495_i32 dim 1 : vector<16x512xf32>, i32 -> vector<16x512xf32>
    %40 = tpu.concatenate %32, %33, %34, %35, %1, %36, %37, %38, %39, %2 in 0 : vector<16x512xf32>, vector<16x512xf32>, vector<16x512xf32>, vector<16x512xf32>, vector<16x512xf32>, vector<16x512xf32>, vector<16x512xf32>, vector<16x512xf32>, vector<16x512xf32>, vector<1x512xf32> -> vector<145x512xf32>
    %41 = arith.mulf %40, %30 : vector<145x512xf32>
    %42 = arith.truncf %41 : vector<145x512xf32> to vector<145x512xbf16>
    %cst_5 = arith.constant dense<0.000000e+00> : vector<24x512xf32>
    %43 = tpu.matmul %31, %42, %cst_5 {dimension_numbers = #tpu.dot_dimension_numbers<[1], [0], [0], [1], [0, 0, 1, 1], [], []>} : vector<24x145xbf16>, vector<145x512xbf16>, vector<24x512xf32> -> vector<24x512xf32>
    %44 = vector.extract_strided_slice %43 {offsets = [0, 0], sizes = [16, 512], strides = [1, 1]} : vector<24x512xf32> to vector<16x512xf32>
    %cst_6 = arith.constant 0.000000e+00 : f32
    %45 = vector.broadcast %cst_6 : f32 to vector<16x512xf32>
    %46 = arith.maximumf %44, %45 : vector<16x512xf32>
    %47 = vector.extract_strided_slice %43 {offsets = [16, 0], sizes = [8, 512], strides = [1, 1]} : vector<24x512xf32> to vector<8x512xf32>
    %c0_7 = arith.constant 0 : index
    %c0_8 = arith.constant 0 : index
    %c0_9 = arith.constant 0 : index
    %48 = vector.load %arg4[%c0_7, %c0_8, %c0_9] : memref<5x24x145xbf16, #tpu.memory_space<vmem>>, vector<1x24x145xbf16>
    %49 = vector.shape_cast %48 : vector<1x24x145xbf16> to vector<24x145xbf16>
    %c17_i32_10 = arith.constant 17 : i32
    %50 = tpu.dynamic_rotate %46 by %c17_i32_10 dim 1 : vector<16x512xf32>, i32 -> vector<16x512xf32>
    %c16_i32_11 = arith.constant 16 : i32
    %51 = tpu.dynamic_rotate %46 by %c16_i32_11 dim 1 : vector<16x512xf32>, i32 -> vector<16x512xf32>
    %c15_i32_12 = arith.constant 15 : i32
    %52 = tpu.dynamic_rotate %46 by %c15_i32_12 dim 1 : vector<16x512xf32>, i32 -> vector<16x512xf32>
    %c1_i32_13 = arith.constant 1 : i32
    %53 = tpu.dynamic_rotate %46 by %c1_i32_13 dim 1 : vector<16x512xf32>, i32 -> vector<16x512xf32>
    %c511_i32_14 = arith.constant 511 : i32
    %54 = tpu.dynamic_rotate %46 by %c511_i32_14 dim 1 : vector<16x512xf32>, i32 -> vector<16x512xf32>
    %c497_i32_15 = arith.constant 497 : i32
    %55 = tpu.dynamic_rotate %46 by %c497_i32_15 dim 1 : vector<16x512xf32>, i32 -> vector<16x512xf32>
    %c496_i32_16 = arith.constant 496 : i32
    %56 = tpu.dynamic_rotate %46 by %c496_i32_16 dim 1 : vector<16x512xf32>, i32 -> vector<16x512xf32>
    %c495_i32_17 = arith.constant 495 : i32
    %57 = tpu.dynamic_rotate %46 by %c495_i32_17 dim 1 : vector<16x512xf32>, i32 -> vector<16x512xf32>
    %58 = tpu.concatenate %50, %51, %52, %53, %46, %54, %55, %56, %57, %2 in 0 : vector<16x512xf32>, vector<16x512xf32>, vector<16x512xf32>, vector<16x512xf32>, vector<16x512xf32>, vector<16x512xf32>, vector<16x512xf32>, vector<16x512xf32>, vector<16x512xf32>, vector<1x512xf32> -> vector<145x512xf32>
    %59 = arith.mulf %58, %30 : vector<145x512xf32>
    %60 = arith.truncf %59 : vector<145x512xf32> to vector<145x512xbf16>
    %cst_18 = arith.constant dense<0.000000e+00> : vector<24x512xf32>
    %61 = tpu.matmul %49, %60, %cst_18 {dimension_numbers = #tpu.dot_dimension_numbers<[1], [0], [0], [1], [0, 0, 1, 1], [], []>} : vector<24x145xbf16>, vector<145x512xbf16>, vector<24x512xf32> -> vector<24x512xf32>
    %62 = vector.extract_strided_slice %61 {offsets = [0, 0], sizes = [16, 512], strides = [1, 1]} : vector<24x512xf32> to vector<16x512xf32>
    %cst_19 = arith.constant 0.000000e+00 : f32
    %63 = vector.broadcast %cst_19 : f32 to vector<16x512xf32>
    %64 = arith.maximumf %62, %63 : vector<16x512xf32>
    %65 = vector.extract_strided_slice %61 {offsets = [16, 0], sizes = [8, 512], strides = [1, 1]} : vector<24x512xf32> to vector<8x512xf32>
    %66 = arith.addf %47, %65 : vector<8x512xf32>
    %c1 = arith.constant 1 : index
    %c0_20 = arith.constant 0 : index
    %c0_21 = arith.constant 0 : index
    %67 = vector.load %arg4[%c1, %c0_20, %c0_21] : memref<5x24x145xbf16, #tpu.memory_space<vmem>>, vector<1x24x145xbf16>
    %68 = vector.shape_cast %67 : vector<1x24x145xbf16> to vector<24x145xbf16>
    %c17_i32_22 = arith.constant 17 : i32
    %69 = tpu.dynamic_rotate %64 by %c17_i32_22 dim 1 : vector<16x512xf32>, i32 -> vector<16x512xf32>
    %c16_i32_23 = arith.constant 16 : i32
    %70 = tpu.dynamic_rotate %64 by %c16_i32_23 dim 1 : vector<16x512xf32>, i32 -> vector<16x512xf32>
    %c15_i32_24 = arith.constant 15 : i32
    %71 = tpu.dynamic_rotate %64 by %c15_i32_24 dim 1 : vector<16x512xf32>, i32 -> vector<16x512xf32>
    %c1_i32_25 = arith.constant 1 : i32
    %72 = tpu.dynamic_rotate %64 by %c1_i32_25 dim 1 : vector<16x512xf32>, i32 -> vector<16x512xf32>
    %c511_i32_26 = arith.constant 511 : i32
    %73 = tpu.dynamic_rotate %64 by %c511_i32_26 dim 1 : vector<16x512xf32>, i32 -> vector<16x512xf32>
    %c497_i32_27 = arith.constant 497 : i32
    %74 = tpu.dynamic_rotate %64 by %c497_i32_27 dim 1 : vector<16x512xf32>, i32 -> vector<16x512xf32>
    %c496_i32_28 = arith.constant 496 : i32
    %75 = tpu.dynamic_rotate %64 by %c496_i32_28 dim 1 : vector<16x512xf32>, i32 -> vector<16x512xf32>
    %c495_i32_29 = arith.constant 495 : i32
    %76 = tpu.dynamic_rotate %64 by %c495_i32_29 dim 1 : vector<16x512xf32>, i32 -> vector<16x512xf32>
    %77 = tpu.concatenate %69, %70, %71, %72, %64, %73, %74, %75, %76, %2 in 0 : vector<16x512xf32>, vector<16x512xf32>, vector<16x512xf32>, vector<16x512xf32>, vector<16x512xf32>, vector<16x512xf32>, vector<16x512xf32>, vector<16x512xf32>, vector<16x512xf32>, vector<1x512xf32> -> vector<145x512xf32>
    %78 = arith.mulf %77, %30 : vector<145x512xf32>
    %79 = arith.truncf %78 : vector<145x512xf32> to vector<145x512xbf16>
    %cst_30 = arith.constant dense<0.000000e+00> : vector<24x512xf32>
    %80 = tpu.matmul %68, %79, %cst_30 {dimension_numbers = #tpu.dot_dimension_numbers<[1], [0], [0], [1], [0, 0, 1, 1], [], []>} : vector<24x145xbf16>, vector<145x512xbf16>, vector<24x512xf32> -> vector<24x512xf32>
    %81 = vector.extract_strided_slice %80 {offsets = [0, 0], sizes = [16, 512], strides = [1, 1]} : vector<24x512xf32> to vector<16x512xf32>
    %cst_31 = arith.constant 0.000000e+00 : f32
    %82 = vector.broadcast %cst_31 : f32 to vector<16x512xf32>
    %83 = arith.maximumf %81, %82 : vector<16x512xf32>
    %84 = vector.extract_strided_slice %80 {offsets = [16, 0], sizes = [8, 512], strides = [1, 1]} : vector<24x512xf32> to vector<8x512xf32>
    %85 = arith.addf %66, %84 : vector<8x512xf32>
    %c2 = arith.constant 2 : index
    %c0_32 = arith.constant 0 : index
    %c0_33 = arith.constant 0 : index
    %86 = vector.load %arg4[%c2, %c0_32, %c0_33] : memref<5x24x145xbf16, #tpu.memory_space<vmem>>, vector<1x24x145xbf16>
    %87 = vector.shape_cast %86 : vector<1x24x145xbf16> to vector<24x145xbf16>
    %c17_i32_34 = arith.constant 17 : i32
    %88 = tpu.dynamic_rotate %83 by %c17_i32_34 dim 1 : vector<16x512xf32>, i32 -> vector<16x512xf32>
    %c16_i32_35 = arith.constant 16 : i32
    %89 = tpu.dynamic_rotate %83 by %c16_i32_35 dim 1 : vector<16x512xf32>, i32 -> vector<16x512xf32>
    %c15_i32_36 = arith.constant 15 : i32
    %90 = tpu.dynamic_rotate %83 by %c15_i32_36 dim 1 : vector<16x512xf32>, i32 -> vector<16x512xf32>
    %c1_i32_37 = arith.constant 1 : i32
    %91 = tpu.dynamic_rotate %83 by %c1_i32_37 dim 1 : vector<16x512xf32>, i32 -> vector<16x512xf32>
    %c511_i32_38 = arith.constant 511 : i32
    %92 = tpu.dynamic_rotate %83 by %c511_i32_38 dim 1 : vector<16x512xf32>, i32 -> vector<16x512xf32>
    %c497_i32_39 = arith.constant 497 : i32
    %93 = tpu.dynamic_rotate %83 by %c497_i32_39 dim 1 : vector<16x512xf32>, i32 -> vector<16x512xf32>
    %c496_i32_40 = arith.constant 496 : i32
    %94 = tpu.dynamic_rotate %83 by %c496_i32_40 dim 1 : vector<16x512xf32>, i32 -> vector<16x512xf32>
    %c495_i32_41 = arith.constant 495 : i32
    %95 = tpu.dynamic_rotate %83 by %c495_i32_41 dim 1 : vector<16x512xf32>, i32 -> vector<16x512xf32>
    %96 = tpu.concatenate %88, %89, %90, %91, %83, %92, %93, %94, %95, %2 in 0 : vector<16x512xf32>, vector<16x512xf32>, vector<16x512xf32>, vector<16x512xf32>, vector<16x512xf32>, vector<16x512xf32>, vector<16x512xf32>, vector<16x512xf32>, vector<16x512xf32>, vector<1x512xf32> -> vector<145x512xf32>
    %97 = arith.mulf %96, %30 : vector<145x512xf32>
    %98 = arith.truncf %97 : vector<145x512xf32> to vector<145x512xbf16>
    %cst_42 = arith.constant dense<0.000000e+00> : vector<24x512xf32>
    %99 = tpu.matmul %87, %98, %cst_42 {dimension_numbers = #tpu.dot_dimension_numbers<[1], [0], [0], [1], [0, 0, 1, 1], [], []>} : vector<24x145xbf16>, vector<145x512xbf16>, vector<24x512xf32> -> vector<24x512xf32>
    %100 = vector.extract_strided_slice %99 {offsets = [0, 0], sizes = [16, 512], strides = [1, 1]} : vector<24x512xf32> to vector<16x512xf32>
    %cst_43 = arith.constant 0.000000e+00 : f32
    %101 = vector.broadcast %cst_43 : f32 to vector<16x512xf32>
    %102 = arith.maximumf %100, %101 : vector<16x512xf32>
    %103 = vector.extract_strided_slice %99 {offsets = [16, 0], sizes = [8, 512], strides = [1, 1]} : vector<24x512xf32> to vector<8x512xf32>
    %104 = arith.addf %85, %103 : vector<8x512xf32>
    %c3 = arith.constant 3 : index
    %c0_44 = arith.constant 0 : index
    %c0_45 = arith.constant 0 : index
    %105 = vector.load %arg4[%c3, %c0_44, %c0_45] : memref<5x24x145xbf16, #tpu.memory_space<vmem>>, vector<1x24x145xbf16>
    %106 = vector.shape_cast %105 : vector<1x24x145xbf16> to vector<24x145xbf16>
    %c17_i32_46 = arith.constant 17 : i32
    %107 = tpu.dynamic_rotate %102 by %c17_i32_46 dim 1 : vector<16x512xf32>, i32 -> vector<16x512xf32>
    %c16_i32_47 = arith.constant 16 : i32
    %108 = tpu.dynamic_rotate %102 by %c16_i32_47 dim 1 : vector<16x512xf32>, i32 -> vector<16x512xf32>
    %c15_i32_48 = arith.constant 15 : i32
    %109 = tpu.dynamic_rotate %102 by %c15_i32_48 dim 1 : vector<16x512xf32>, i32 -> vector<16x512xf32>
    %c1_i32_49 = arith.constant 1 : i32
    %110 = tpu.dynamic_rotate %102 by %c1_i32_49 dim 1 : vector<16x512xf32>, i32 -> vector<16x512xf32>
    %c511_i32_50 = arith.constant 511 : i32
    %111 = tpu.dynamic_rotate %102 by %c511_i32_50 dim 1 : vector<16x512xf32>, i32 -> vector<16x512xf32>
    %c497_i32_51 = arith.constant 497 : i32
    %112 = tpu.dynamic_rotate %102 by %c497_i32_51 dim 1 : vector<16x512xf32>, i32 -> vector<16x512xf32>
    %c496_i32_52 = arith.constant 496 : i32
    %113 = tpu.dynamic_rotate %102 by %c496_i32_52 dim 1 : vector<16x512xf32>, i32 -> vector<16x512xf32>
    %c495_i32_53 = arith.constant 495 : i32
    %114 = tpu.dynamic_rotate %102 by %c495_i32_53 dim 1 : vector<16x512xf32>, i32 -> vector<16x512xf32>
    %115 = tpu.concatenate %107, %108, %109, %110, %102, %111, %112, %113, %114, %2 in 0 : vector<16x512xf32>, vector<16x512xf32>, vector<16x512xf32>, vector<16x512xf32>, vector<16x512xf32>, vector<16x512xf32>, vector<16x512xf32>, vector<16x512xf32>, vector<16x512xf32>, vector<1x512xf32> -> vector<145x512xf32>
    %116 = arith.mulf %115, %30 : vector<145x512xf32>
    %117 = arith.truncf %116 : vector<145x512xf32> to vector<145x512xbf16>
    %cst_54 = arith.constant dense<0.000000e+00> : vector<24x512xf32>
    %118 = tpu.matmul %106, %117, %cst_54 {dimension_numbers = #tpu.dot_dimension_numbers<[1], [0], [0], [1], [0, 0, 1, 1], [], []>} : vector<24x145xbf16>, vector<145x512xbf16>, vector<24x512xf32> -> vector<24x512xf32>
    %119 = vector.extract_strided_slice %118 {offsets = [0, 0], sizes = [16, 512], strides = [1, 1]} : vector<24x512xf32> to vector<16x512xf32>
    %cst_55 = arith.constant 0.000000e+00 : f32
    %120 = vector.broadcast %cst_55 : f32 to vector<16x512xf32>
    %121 = arith.maximumf %119, %120 : vector<16x512xf32>
    %122 = vector.extract_strided_slice %118 {offsets = [16, 0], sizes = [8, 512], strides = [1, 1]} : vector<24x512xf32> to vector<8x512xf32>
    %123 = arith.addf %104, %122 : vector<8x512xf32>
    %c4 = arith.constant 4 : index
    %c0_56 = arith.constant 0 : index
    %c0_57 = arith.constant 0 : index
    %124 = vector.load %arg4[%c4, %c0_56, %c0_57] : memref<5x24x145xbf16, #tpu.memory_space<vmem>>, vector<1x24x145xbf16>
    %125 = vector.shape_cast %124 : vector<1x24x145xbf16> to vector<24x145xbf16>
    %c17_i32_58 = arith.constant 17 : i32
    %126 = tpu.dynamic_rotate %121 by %c17_i32_58 dim 1 : vector<16x512xf32>, i32 -> vector<16x512xf32>
    %c16_i32_59 = arith.constant 16 : i32
    %127 = tpu.dynamic_rotate %121 by %c16_i32_59 dim 1 : vector<16x512xf32>, i32 -> vector<16x512xf32>
    %c15_i32_60 = arith.constant 15 : i32
    %128 = tpu.dynamic_rotate %121 by %c15_i32_60 dim 1 : vector<16x512xf32>, i32 -> vector<16x512xf32>
    %c1_i32_61 = arith.constant 1 : i32
    %129 = tpu.dynamic_rotate %121 by %c1_i32_61 dim 1 : vector<16x512xf32>, i32 -> vector<16x512xf32>
    %c511_i32_62 = arith.constant 511 : i32
    %130 = tpu.dynamic_rotate %121 by %c511_i32_62 dim 1 : vector<16x512xf32>, i32 -> vector<16x512xf32>
    %c497_i32_63 = arith.constant 497 : i32
    %131 = tpu.dynamic_rotate %121 by %c497_i32_63 dim 1 : vector<16x512xf32>, i32 -> vector<16x512xf32>
    %c496_i32_64 = arith.constant 496 : i32
    %132 = tpu.dynamic_rotate %121 by %c496_i32_64 dim 1 : vector<16x512xf32>, i32 -> vector<16x512xf32>
    %c495_i32_65 = arith.constant 495 : i32
    %133 = tpu.dynamic_rotate %121 by %c495_i32_65 dim 1 : vector<16x512xf32>, i32 -> vector<16x512xf32>
    %134 = tpu.concatenate %126, %127, %128, %129, %121, %130, %131, %132, %133, %2 in 0 : vector<16x512xf32>, vector<16x512xf32>, vector<16x512xf32>, vector<16x512xf32>, vector<16x512xf32>, vector<16x512xf32>, vector<16x512xf32>, vector<16x512xf32>, vector<16x512xf32>, vector<1x512xf32> -> vector<145x512xf32>
    %135 = arith.mulf %134, %30 : vector<145x512xf32>
    %136 = arith.truncf %135 : vector<145x512xf32> to vector<145x512xbf16>
    %cst_66 = arith.constant dense<0.000000e+00> : vector<24x512xf32>
    %137 = tpu.matmul %125, %136, %cst_66 {dimension_numbers = #tpu.dot_dimension_numbers<[1], [0], [0], [1], [0, 0, 1, 1], [], []>} : vector<24x145xbf16>, vector<145x512xbf16>, vector<24x512xf32> -> vector<24x512xf32>
    %138 = vector.extract_strided_slice %137 {offsets = [0, 0], sizes = [16, 512], strides = [1, 1]} : vector<24x512xf32> to vector<16x512xf32>
    %cst_67 = arith.constant 0.000000e+00 : f32
    %139 = vector.broadcast %cst_67 : f32 to vector<16x512xf32>
    %140 = arith.maximumf %138, %139 : vector<16x512xf32>
    %141 = vector.extract_strided_slice %137 {offsets = [16, 0], sizes = [8, 512], strides = [1, 1]} : vector<24x512xf32> to vector<8x512xf32>
    %142 = arith.addf %123, %141 : vector<8x512xf32>
    %143 = tpu.concatenate %140, %2 in 0 : vector<16x512xf32>, vector<1x512xf32> -> vector<17x512xf32>
    %144 = arith.truncf %143 : vector<17x512xf32> to vector<17x512xbf16>
    %c0_68 = arith.constant 0 : index
    %c0_69 = arith.constant 0 : index
    %145 = vector.load %arg5[%c0_68, %c0_69] : memref<8x17xbf16, #tpu.memory_space<vmem>>, vector<8x17xbf16>
    %cst_70 = arith.constant dense<0.000000e+00> : vector<8x512xf32>
    %146 = tpu.matmul %145, %144, %cst_70 {dimension_numbers = #tpu.dot_dimension_numbers<[1], [0], [0], [1], [0, 0, 1, 1], [], []>} : vector<8x17xbf16>, vector<17x512xbf16>, vector<8x512xf32> -> vector<8x512xf32>
    %147 = arith.addf %142, %146 : vector<8x512xf32>
    %cst_71 = arith.constant 0.000000e+00 : f32
    %148 = vector.broadcast %cst_71 : f32 to vector<8x512xf32>
    %149 = arith.maximumf %147, %148 : vector<8x512xf32>
    %150 = tpu.concatenate %149, %2 in 0 : vector<8x512xf32>, vector<1x512xf32> -> vector<9x512xf32>
    %151 = arith.truncf %150 : vector<9x512xf32> to vector<9x512xbf16>
    %c0_72 = arith.constant 0 : index
    %c0_73 = arith.constant 0 : index
    %152 = vector.load %arg6[%c0_72, %c0_73] : memref<16x9xbf16, #tpu.memory_space<vmem>>, vector<16x9xbf16>
    %cst_74 = arith.constant dense<0.000000e+00> : vector<16x512xf32>
    %153 = tpu.matmul %152, %151, %cst_74 {dimension_numbers = #tpu.dot_dimension_numbers<[1], [0], [0], [1], [0, 0, 1, 1], [], []>} : vector<16x9xbf16>, vector<9x512xbf16>, vector<16x512xf32> -> vector<16x512xf32>
    %cst_75 = arith.constant 0.000000e+00 : f32
    %154 = vector.broadcast %cst_75 : f32 to vector<16x512xf32>
    %155 = arith.maximumf %153, %154 : vector<16x512xf32>
    %156 = arith.addf %155, %1 : vector<16x512xf32>
    %c0_76 = arith.constant 0 : index
    %c0_77 = arith.constant 0 : index
    %157 = vector.load %arg7[%c0_76, %c0_77] : memref<16x512xf32, #tpu.memory_space<vmem>>, vector<16x512xf32>
    tpu.vector_store %arg7[%c0_76, %c0_77], %156 {strides = array<i32>} : memref<16x512xf32, #tpu.memory_space<vmem>>, vector<16x512xf32>,
    return
  }
  func.func @transform_0(%arg0: i32) -> (i32, i32) {
    %c0_i32 = arith.constant 0 : i32
    %c0_i32_0 = arith.constant 0 : i32
    return %c0_i32, %arg0 : i32, i32
  }
  func.func @transform_1(%arg0: i32) -> (i32, i32) {
    %c0_i32 = arith.constant 0 : i32
    %c0_i32_0 = arith.constant 0 : i32
    return %c0_i32, %arg0 : i32, i32
  }
  func.func @transform_2(%arg0: i32) -> (i32, i32) {
    %c0_i32 = arith.constant 0 : i32
    %c0_i32_0 = arith.constant 0 : i32
    %c0_i32_1 = arith.constant 0 : i32
    return %c0_i32, %c0_i32_0 : i32, i32
  }
  func.func @transform_3(%arg0: i32) -> (i32, i32, i32) {
    %c0_i32 = arith.constant 0 : i32
    %c0_i32_0 = arith.constant 0 : i32
    %c0_i32_1 = arith.constant 0 : i32
    %c0_i32_2 = arith.constant 0 : i32
    return %c0_i32, %c0_i32_0, %c0_i32_1 : i32, i32, i32
  }
  func.func @transform_4(%arg0: i32) -> (i32, i32) {
    %c0_i32 = arith.constant 0 : i32
    %c0_i32_0 = arith.constant 0 : i32
    %c0_i32_1 = arith.constant 0 : i32
    return %c0_i32, %c0_i32_0 : i32, i32
  }
  func.func @transform_5(%arg0: i32) -> (i32, i32) {
    %c0_i32 = arith.constant 0 : i32
    %c0_i32_0 = arith.constant 0 : i32
    %c0_i32_1 = arith.constant 0 : i32
    return %c0_i32, %c0_i32_0 : i32, i32
  }
  func.func @transform_6(%arg0: i32) -> (i32, i32) {
    %c0_i32 = arith.constant 0 : i32
    %c0_i32_0 = arith.constant 0 : i32
    return %c0_i32, %arg0 : i32, i32
  }
}

</mosaic_0001>

<bundles_post_ra>
// kernel: tpu_custom_call.1
= control target key start
LH: loop header
LB: loop body
LE: loop exit
PB: predicated region body
PF: predicated region fallthrough
CT: control target
= control target key end

     0   :  { %11 = vsyncpa [#allocation3], 0  ;;  %s6322_s0 = inlined_call_operand.hbm [shape: f32[16,512], index: 0, kind: input, shape index: {}]   ;;  %s6323_s1 = inlined_call_operand.hbm [shape: f32[9,512], index: 1, kind: input, shape index: {}]   ;;  %s6324_s2 = inlined_call_operand.hbm [shape: bf16[24,145], index: 2, kind: input, shape index: {}]   ;;  %s6325_s3 = inlined_call_operand.hbm [shape: bf16[5,24,145], index: 3, kind: input, shape index: {}]   ;;  %s6326_s4 = inlined_call_operand.vmem [shape: bf16[8,17], index: 4, kind: input, shape index: {}]   ;;  %s6327_s5 = inlined_call_operand.vmem [shape: bf16[16,9], index: 5, kind: input, shape index: {}]   ;;  %s6328_s6 = inlined_call_operand.hbm [shape: f32[16,512], index: 6, kind: output, shape index: {}]  }
   0x1   :  { %12 = vsyncpa [#allocation6], 0 }
   0x2   :  { %13 = vsyncpa [#allocation9], 0 }
   0x3   :  { %14 = vsyncpa [#allocation4], 0  ;;  %s3434_s21 = smov [#allocation5]   ;;  %s3435_s23 = smov [#allocation2]  }
   0x4   :  { %s32_s22 = sshll.u32 %s3434_s21, 4  ;;  %s20_s24 = sshll.u32 %s3435_s23, 4  ;;  %s33_s22 = int_to_ptr.vmem [resolvable:$true] %s32_s22  ;;  %s3489_s24 = int_to_ptr.vmem [resolvable:$true] %s20_s24 }
   0x5   :  { %s3316_s27 = scalar_lea.hbm %s6323_s1, 1024 }
   0x6   :  { %p3317_p0 = scmp.ne.s32.totalorder %s6323_s1, %s3316_s27  ;;  %p3320_p1 = scmp.lt.u32.totalorder %s3316_s27, %s6323_s1 }
   0x8   :  { %p3322_p2 = pnand %p3320_p1, %p3317_p0 }
   0xa   :  { %3325 = shalt.err (!%p3322_p2)
}
   0xb   :  { %s3326_s8 = scalar_lea.vmem %s33_s22, 1024  ;;  %p3331_p4 = scmp.lt.s32.totalorder %s33_s22, %s33_s22 }
   0xc   :  { %p3327_p3 = scmp.ne.s32.totalorder %s33_s22, %s3326_s8  ;;  %p3332_p5 = scmp.lt.s32.totalorder %s3326_s8, %s3326_s8 }
   0xe   :  { %p3333_p6 = por %p3332_p5, %p3331_p4 }
  0x10   :  { %p3334_p7 = pnand %p3333_p6, %p3327_p3 }
  0x12   :  { %3337 = shalt.err (!%p3334_p7)
}
  0x13   :  { %s3436_s9 = smov 512   ;;  %s3437_s10 = smov 32  }
  0x14   :  { %38 = dma.hbm_to_vmem [thread:$0]  %s6323_s1, 1024, %s33_s22, [#allocation6], %s3436_s9, %s3436_s9, %s3437_s10  }
  0x15   :  { %s3338_s15 = scalar_lea.hbm %s6322_s0, 1024 }
  0x16   :  { %p3339_p8 = scmp.ne.s32.totalorder %s6322_s0, %s3338_s15  ;;  %p3342_p9 = scmp.lt.u32.totalorder %s3338_s15, %s6322_s0 }
  0x18   :  { %p3344_p10 = pnand %p3342_p9, %p3339_p8 }
  0x1a   :  { %3347 = shalt.err (!%p3344_p10)
}
  0x1b   :  { %s3348_s20 = scalar_lea.vmem %s3489_s24, 1024  ;;  %p3353_p12 = scmp.lt.s32.totalorder %s3489_s24, %s3489_s24 }
  0x1c   :  { %p3349_p11 = scmp.ne.s32.totalorder %s3489_s24, %s3348_s20  ;;  %p3354_p13 = scmp.lt.s32.totalorder %s3348_s20, %s3348_s20 }
  0x1e   :  { %p3355_p0 = por %p3354_p13, %p3353_p12 }
  0x20   :  { %p3356_p1 = pnand %p3355_p0, %p3349_p11 }
  0x22   :  { %3359 = shalt.err (!%p3356_p1)
}
  0x23   :  { %26 = dma.hbm_to_vmem [thread:$0]  %s6322_s0, 1024, %s3489_s24, [#allocation3], %s3436_s9, %s3436_s9, %s3437_s10  }
  0x24   :  { %s3438_s22 = smov [#allocation7]   ;;  %s3360_s27 = scalar_lea.hbm %s6324_s2, 384 }
  0x25   :  { %s44_s23 = sshll.u32 %s3438_s22, 4  ;;  %p3361_p2 = scmp.ne.s32.totalorder %s6324_s2, %s3360_s27  ;;  %s45_s23 = int_to_ptr.vmem [resolvable:$true] %s44_s23 }
  0x26   :  { %p3364_p3 = scmp.lt.u32.totalorder %s3360_s27, %s6324_s2 }
  0x28   :  { %p3366_p4 = pnand %p3364_p3, %p3361_p2 }
  0x2a   :  { %3369 = shalt.err (!%p3366_p4)
}
  0x2b   :  { %s3370_s8 = scalar_lea.vmem %s45_s23, 384  ;;  %p3375_p6 = scmp.lt.s32.totalorder %s45_s23, %s45_s23 }
  0x2c   :  { %p3371_p5 = scmp.ne.s32.totalorder %s45_s23, %s3370_s8  ;;  %p3376_p7 = scmp.lt.s32.totalorder %s3370_s8, %s3370_s8 }
  0x2e   :  { %p3377_p8 = por %p3376_p7, %p3375_p6 }
  0x30   :  { %p3378_p9 = pnand %p3377_p8, %p3371_p5 }
  0x32   :  { %3381 = shalt.err (!%p3378_p9)
}
  0x33   :  { %s3439_s0 = smov 128   ;;  %s3440_s24 = smov 8  }
  0x34   :  { %50 = dma.hbm_to_vmem [thread:$0]  %s6324_s2, 384, %s45_s23, [#allocation6], %s3439_s0, %s3439_s0, %s3440_s24  }
  0x35   :  { %s3441_s13 = smov [#allocation8]   ;;  %s3382_s17 = scalar_lea.hbm %s6325_s3, 1920 }
  0x36   :  { %s56_s14 = sshll.u32 %s3441_s13, 4  ;;  %p3383_p10 = scmp.ne.s32.totalorder %s6325_s3, %s3382_s17  ;;  %s57_s14 = int_to_ptr.vmem [resolvable:$true] %s56_s14 }
  0x37   :  { %p3386_p11 = scmp.lt.u32.totalorder %s3382_s17, %s6325_s3 }
  0x39   :  { %p3388_p12 = pnand %p3386_p11, %p3383_p10 }
  0x3b   :  { %3391 = shalt.err (!%p3388_p12)
}
  0x3c   :  { %s3392_s21 = scalar_lea.vmem %s57_s14, 1920  ;;  %p3397_p0 = scmp.lt.s32.totalorder %s57_s14, %s57_s14 }
  0x3d   :  { %p3393_p13 = scmp.ne.s32.totalorder %s57_s14, %s3392_s21  ;;  %p3398_p1 = scmp.lt.s32.totalorder %s3392_s21, %s3392_s21 }
  0x3f   :  { %p3399_p2 = por %p3398_p1, %p3397_p0 }
  0x41   :  { %p3400_p3 = pnand %p3399_p2, %p3393_p13 }
  0x43   :  { %3403 = shalt.err (!%p3400_p3)
}
  0x44   :  { %62 = dma.hbm_to_vmem [thread:$0]  %s6325_s3, 1920, %s57_s14, [#allocation9], %s3439_s0, %s3439_s0, %s3440_s24  }
  0x45   :  { %3426 = dma.done.wait [#allocation3], 1024  }
  0x46   :  { %3427 = vsyncadd [#allocation3], 4294966272 }
  0x47   :  { %3428 = dma.done.wait [#allocation6], 1408  }
  0x48   :  { %3429 = vsyncadd [#allocation6], 4294965888 }
  0x49   :  { %3430 = dma.done.wait [#allocation9], 1920  }
  0x4a   :  { %3431 = vsyncadd [#allocation9], 4294965376  ;;  %v3550_v0 = vld [vmem:[#allocation2 + $0x8] sm:$0xff]  ;;  %v3552_v1 = vld [vmem:[#allocation2] sm:$0xff]  ;;  %s3442_s23 = smov 17   ;;  %s3443_s3 = smov 16   ;;  %v96_v8 = vlaneseq }
  0x4b   :  { %247 = vrot.lane.b32.xlu1 %v3550_v0, %s3442_s23  ;;  %243 = vrot.lane.b32.xlu0 %v3552_v1, %s3442_s23  ;;  %v3558_v2 = vld [vmem:[#allocation2 + $0x28] sm:$0xff]  ;;  %v3560_v3 = vld [vmem:[#allocation2 + $0x20] sm:$0xff]  ;;  %v3562_v4 = vld [vmem:[#allocation2 + $0x30] sm:$0xff]  ;;  %s3444_s25 = smov 15   ;;  %s3445_s26 = smov 1   ;;  %vm569_vm1 = vcmask 138240  }
  0x4c   :  { %v3564_v5 = vld [vmem:[#allocation2 + $0x10] sm:$0xff]  ;;  %v3574_v6 = vld [vmem:[#allocation2 + $0x38] sm:$0xff]  ;;  %s3446_s27 = smov 127   ;;  %s3447_s28 = smov 113   ;;  %v3678_v9 = vshrl.u32 %v96_v8, 7  ;;  %v3680_v10 = vand.u32 127, %v96_v8 }
  0x4d   :  { %v3576_v7 = vld [vmem:[#allocation2 + $0x18] sm:$0xff]  ;;  %s3448_s29 = smov 112   ;;  %s3449_s30 = smov 111   ;;  %v3687_v12 = vld [vmem:[#allocation5 + $0x8] sm:$0xff]  ;;  %v3701_v21 = vld [vmem:[#allocation5 + $0x10] sm:$0xff]  ;;  %vm576_vm9 = vcmask 1040384  }
  0x4e   :  { %v98_v11 = vsub.s32 0, %v3678_v9  ;;  %vm261_vm0 = vcmp.lt.s32.totalorder %v3680_v10, 17  ;;  %v3271_v17 = vld [vmem:[#allocation7 + $0x4] ss:$8 sps:$4 sm:$0xff]   ;;  %v3713_v25 = vld [vmem:[#allocation5 + $0x18] sm:$0xff]  ;;  %v114_v38 = vsub.s32 1, %v3678_v9 }
  0x4f   :  { %249 = vrot.lane.b32.xlu1 %v3558_v2, %s3442_s23  ;;  %245 = vrot.lane.b32.xlu0 %v3560_v3, %s3442_s23  ;;  %v3711_v24 = vld [vmem:[#allocation5] sm:$0xff]  ;;  %vm286_vm2 = vcmp.lt.s32.totalorder %v3680_v10, 16  ;;  %vm311_vm3 = vcmp.lt.s32.totalorder %v3680_v10, 15  ;;  %vm336_vm4 = vcmp.lt.s32.totalorder %v3680_v10, 1  ;;  %vm361_vm5 = vcmp.lt.s32.totalorder %v3680_v10, 127 }
  0x50   :  { %v3695_v15 = vrot.slane %v3687_v12, %v98_v11  ;;  %3152 = vmatprep.mubr.msk.bf16.mxu0 %vm569_vm1, %v3271_v17  ;;  %3154 = vmatprep.mubr.msk.bf16.mxu1 %vm569_vm1, %v3271_v17  ;;  %v3716_v29 = vrot.slane %v3701_v21, %v98_v11  ;;  %v3727_v32 = vrot.slane %v3711_v24, %v98_v11  ;;  %vm386_vm6 = vcmp.lt.s32.totalorder %v3680_v10, 113 }
  0x51   :  { %v3730_v33 = vrot.slane %v3713_v25, %v98_v11  ;;  %v3749_v52 = vrot.slane %v3687_v12, %v114_v38  ;;  %v3758_v60 = vrot.slane %v3701_v21, %v114_v38  ;;  %v3765_v11 = vrot.slane %v3711_v24, %v114_v38 }
  0x52   :  { %6494 = vst [vmem:[#allocation15_spill] sm:$0xff] %v3695_v15  ;;  %vm411_vm7 = vcmp.lt.s32.totalorder %v3680_v10, 112  ;;  %vm436_vm8 = vcmp.lt.s32.totalorder %v3680_v10, 111  ;;  %v2450_v10 = vld [vmem:[#allocation8 + $0x70] sm:$0xff]  ;;  %vm2999_vm10 = vcmask 1043456   ;;  %vm3000_vm11 = vcmask 1044480  }
  0x53   :  { %253 = vrot.lane.b32.xlu1 %v3562_v4, %s3442_s23  ;;  %251 = vrot.lane.b32.xlu0 %v3564_v5, %s3442_s23  ;;  %vm2995_vm12 = vcmask 72704  }
  0x57   :  { %257 = vrot.lane.b32.xlu1 %v3574_v6, %s3442_s23  ;;  %255 = vrot.lane.b32.xlu0 %v3576_v7, %s3442_s23 }
  0x5b   :  { %272 = vrot.lane.b32.xlu1 %v3560_v3, %s3443_s3  ;;  %270 = vrot.lane.b32.xlu0 %v3552_v1, %s3443_s3 }
  0x5f   :  { %276 = vrot.lane.b32.xlu1 %v3558_v2, %s3443_s3  ;;  %274 = vrot.lane.b32.xlu0 %v3550_v0, %s3443_s3 }
  0x63   :  { %280 = vrot.lane.b32.xlu1 %v3562_v4, %s3443_s3  ;;  %278 = vrot.lane.b32.xlu0 %v3564_v5, %s3443_s3 }
  0x67   :  { %284 = vrot.lane.b32.xlu1 %v3574_v6, %s3443_s3  ;;  %282 = vrot.lane.b32.xlu0 %v3576_v7, %s3443_s3 }
  0x6b   :  { %297 = vrot.lane.b32.xlu1 %v3560_v3, %s3444_s25  ;;  %295 = vrot.lane.b32.xlu0 %v3552_v1, %s3444_s25 }
  0x6f   :  { %301 = vrot.lane.b32.xlu1 %v3558_v2, %s3444_s25  ;;  %299 = vrot.lane.b32.xlu0 %v3550_v0, %s3444_s25 }
  0x73   :  { %305 = vrot.lane.b32.xlu1 %v3562_v4, %s3444_s25  ;;  %303 = vrot.lane.b32.xlu0 %v3564_v5, %s3444_s25 }
  0x77   :  { %309 = vrot.lane.b32.xlu1 %v3574_v6, %s3444_s25  ;;  %307 = vrot.lane.b32.xlu0 %v3576_v7, %s3444_s25 }
  0x7b   :  { %322 = vrot.lane.b32.xlu1 %v3560_v3, %s3445_s26  ;;  %320 = vrot.lane.b32.xlu0 %v3552_v1, %s3445_s26 }
  0x7f   :  { %326 = vrot.lane.b32.xlu1 %v3558_v2, %s3445_s26  ;;  %324 = vrot.lane.b32.xlu0 %v3550_v0, %s3445_s26 }
  0x83   :  { %330 = vrot.lane.b32.xlu1 %v3562_v4, %s3445_s26  ;;  %328 = vrot.lane.b32.xlu0 %v3564_v5, %s3445_s26 }
  0x87   :  { %334 = vrot.lane.b32.xlu1 %v3574_v6, %s3445_s26  ;;  %332 = vrot.lane.b32.xlu0 %v3576_v7, %s3445_s26 }
  0x8b   :  { %347 = vrot.lane.b32.xlu1 %v3560_v3, %s3446_s27  ;;  %345 = vrot.lane.b32.xlu0 %v3552_v1, %s3446_s27 }
  0x8f   :  { %351 = vrot.lane.b32.xlu1 %v3558_v2, %s3446_s27  ;;  %349 = vrot.lane.b32.xlu0 %v3550_v0, %s3446_s27 }
  0x93   :  { %355 = vrot.lane.b32.xlu1 %v3562_v4, %s3446_s27  ;;  %353 = vrot.lane.b32.xlu0 %v3564_v5, %s3446_s27 }
  0x97   :  { %359 = vrot.lane.b32.xlu1 %v3574_v6, %s3446_s27  ;;  %357 = vrot.lane.b32.xlu0 %v3576_v7, %s3446_s27 }
  0x9b   :  { %372 = vrot.lane.b32.xlu1 %v3560_v3, %s3447_s28  ;;  %370 = vrot.lane.b32.xlu0 %v3552_v1, %s3447_s28 }
  0x9f   :  { %376 = vrot.lane.b32.xlu1 %v3558_v2, %s3447_s28  ;;  %374 = vrot.lane.b32.xlu0 %v3550_v0, %s3447_s28 }
  0xa3   :  { %380 = vrot.lane.b32.xlu1 %v3562_v4, %s3447_s28  ;;  %378 = vrot.lane.b32.xlu0 %v3564_v5, %s3447_s28 }
  0xa7   :  { %384 = vrot.lane.b32.xlu1 %v3574_v6, %s3447_s28  ;;  %382 = vrot.lane.b32.xlu0 %v3576_v7, %s3447_s28 }
  0xab   :  { %397 = vrot.lane.b32.xlu1 %v3560_v3, %s3448_s29  ;;  %395 = vrot.lane.b32.xlu0 %v3552_v1, %s3448_s29 }
  0xaf   :  { %401 = vrot.lane.b32.xlu1 %v3558_v2, %s3448_s29  ;;  %399 = vrot.lane.b32.xlu0 %v3550_v0, %s3448_s29 }
  0xb3   :  { %405 = vrot.lane.b32.xlu1 %v3562_v4, %s3448_s29  ;;  %403 = vrot.lane.b32.xlu0 %v3564_v5, %s3448_s29 }
  0xb7   :  { %409 = vrot.lane.b32.xlu1 %v3574_v6, %s3448_s29  ;;  %407 = vrot.lane.b32.xlu0 %v3576_v7, %s3448_s29 }
  0xbb   :  { %422 = vrot.lane.b32.xlu1 %v3560_v3, %s3449_s30  ;;  %420 = vrot.lane.b32.xlu0 %v3552_v1, %s3449_s30 }
  0xbd   :  { %v248_v13 = vpop.permute.xlu1 %247  ;;  %v244_v14 = vpop.permute.xlu0 %243 }
  0xbe   :  { %v266_v16 = vsel %vm261_vm0, %v244_v14, %v248_v13 }
  0xbf   :  { %426 = vrot.lane.b32.xlu1 %v3558_v2, %s3449_s30  ;;  %424 = vrot.lane.b32.xlu0 %v3550_v0, %s3449_s30  ;;  %v446_v22 = vmul.f32 %v266_v16, %v3695_v15 }
  0xc1   :  { %v250_v18 = vpop.permute.xlu1 %249  ;;  %v246_v19 = vpop.permute.xlu0 %245 }
  0xc2   :  { %v267_v20 = vsel %vm261_vm0, %v246_v19, %v250_v18 }
  0xc3   :  { %430 = vrot.lane.b32.xlu1 %v3562_v4, %s3449_s30  ;;  %428 = vrot.lane.b32.xlu0 %v3564_v5, %s3449_s30  ;;  %v450_v23 = vmul.f32 %v267_v20, %v3695_v15 }
  0xc5   :  { %v254_v26 = vpop.permute.xlu1 %253  ;;  %v252_v27 = vpop.permute.xlu0 %251  ;;  %v518_v28 = vpack.c.bf16 %v450_v23, %v446_v22 }
  0xc6   :  { %v265_v30 = vsel %vm261_vm0, %v250_v18, %v254_v26  ;;  %v264_v31 = vsel %vm261_vm0, %v248_v13, %v252_v27  ;;  %v3768_v13 = vrot.slane %v3713_v25, %v114_v38 }
  0xc7   :  { %434 = vrot.lane.b32.xlu1 %v3574_v6, %s3449_s30  ;;  %432 = vrot.lane.b32.xlu0 %v3576_v7, %s3449_s30  ;;  %v447_v36 = vmul.f32 %v264_v31, %v3716_v29  ;;  %v451_v37 = vmul.f32 %v265_v30, %v3716_v29 }
  0xc8   :  { %582 = vmatprep.subr.bf16.mxu0 %v518_v28 }
  0xc9   :  { %v258_v34 = vpop.permute.xlu1 %257  ;;  %v256_v35 = vpop.permute.xlu0 %255  ;;  %v519_v51 = vpack.c.bf16 %v451_v37, %v447_v36 }
  0xca   :  { %v269_v39 = vsel %vm261_vm0, %v258_v34, %v246_v19  ;;  %v268_v40 = vsel %vm261_vm0, %v256_v35, %v244_v14  ;;  %v262_v41 = vsel %vm261_vm0, %v252_v27, %v256_v35  ;;  %v263_v42 = vsel %vm261_vm0, %v254_v26, %v258_v34 }
  0xcb   :  { %v445_v43 = vmul.f32 %v268_v40, %v3727_v32  ;;  %v449_v44 = vmul.f32 %v269_v39, %v3727_v32  ;;  %v448_v45 = vmul.f32 %v262_v41, %v3730_v33  ;;  %v452_v46 = vmul.f32 %v263_v42, %v3730_v33 }
  0xcc   :  { %v130_v19 = vsub.s32 2, %v3678_v9 }
  0xcd   :  { %v273_v47 = vpop.permute.xlu1 %272  ;;  %v271_v48 = vpop.permute.xlu0 %270  ;;  %v517_v49 = vpack.c.bf16 %v449_v44, %v445_v43  ;;  %v520_v50 = vpack.c.bf16 %v452_v46, %v448_v45 }
  0xce   :  { %v3787_v39 = vrot.slane %v3687_v12, %v130_v19 }
  0xcf   :  { %583 = vmatpush1.bf16.msra.mxu0 %v517_v49  ;;  %633 = vmatprep.subr.bf16.mxu1 %v520_v50 }
  0xd0   :  { %634 = vmatpush1.bf16.msra.mxu1 %v519_v51 }
  0xd1   :  { %v277_v53 = vpop.permute.xlu1 %276  ;;  %v275_v54 = vpop.permute.xlu0 %274 }
  0xd2   :  { %v292_v55 = vsel %vm286_vm2, %v273_v47, %v277_v53  ;;  %v291_v56 = vsel %vm286_vm2, %v271_v48, %v275_v54 }
  0xd3   :  { %v458_v57 = vmul.f32 %v292_v55, %v3749_v52  ;;  %v454_v58 = vmul.f32 %v291_v56, %v3749_v52 }
  0xd5   :  { %v281_v59 = vpop.permute.xlu1 %280  ;;  %v279_v61 = vpop.permute.xlu0 %278  ;;  %v522_v62 = vpack.c.bf16 %v458_v57, %v454_v58 }
  0xd6   :  { %v290_v63 = vsel %vm286_vm2, %v277_v53, %v281_v59  ;;  %v289_v8 = vsel %vm286_vm2, %v275_v54, %v279_v61  ;;  %v3803_v53 = vrot.slane %v3711_v24, %v130_v19  ;;  %v3806_v54 = vrot.slane %v3713_v25, %v130_v19 }
  0xd7   :  { %584 = vmatprep.subr.bf16.mxu0 %v522_v62  ;;  %v459_v14 = vmul.f32 %v290_v63, %v3758_v60  ;;  %v455_v16 = vmul.f32 %v289_v8, %v3758_v60 }
  0xd9   :  { %v285_v17 = vpop.permute.xlu1 %284  ;;  %v283_v18 = vpop.permute.xlu0 %282  ;;  %v523_v38 = vpack.c.bf16 %v459_v14, %v455_v16 }
  0xda   :  { %v288_v20 = vsel %vm286_vm2, %v281_v59, %v285_v17  ;;  %v294_v22 = vsel %vm286_vm2, %v285_v17, %v273_v47  ;;  %v287_v23 = vsel %vm286_vm2, %v279_v61, %v283_v18  ;;  %v293_v26 = vsel %vm286_vm2, %v283_v18, %v271_v48 }
  0xdb   :  { %v457_v27 = vmul.f32 %v294_v22, %v3765_v11  ;;  %v460_v28 = vmul.f32 %v288_v20, %v3768_v13  ;;  %v453_v30 = vmul.f32 %v293_v26, %v3765_v11  ;;  %v456_v31 = vmul.f32 %v287_v23, %v3768_v13 }
  0xdc   :  { %v3796_v47 = vrot.slane %v3701_v21, %v130_v19  ;;  %v146_v59 = vsub.s32 3, %v3678_v9 }
  0xdd   :  { %v298_v34 = vpop.permute.xlu1 %297  ;;  %v296_v35 = vpop.permute.xlu0 %295  ;;  %v521_v36 = vpack.c.bf16 %v457_v27, %v453_v30  ;;  %v524_v37 = vpack.c.bf16 %v460_v28, %v456_v31  ;;  %v162_v28 = vsub.s32 4, %v3678_v9 }
  0xde   :  { %v3825_v27 = vrot.slane %v3687_v12, %v146_v59 }
  0xdf   :  { %585 = vmatpush1.bf16.msra.mxu0 %v521_v36  ;;  %635 = vmatprep.subr.bf16.mxu1 %v524_v37 }
  0xe0   :  { %636 = vmatpush1.bf16.msra.mxu1 %v523_v38  ;;  %v3835_v38 = vrot.slane %v3687_v12, %v162_v28 }
  0xe1   :  { %v302_v40 = vpop.permute.xlu1 %301  ;;  %v300_v41 = vpop.permute.xlu0 %299 }
  0xe2   :  { %v317_v42 = vsel %vm311_vm3, %v298_v34, %v302_v40  ;;  %v316_v43 = vsel %vm311_vm3, %v296_v35, %v300_v41 }
  0xe3   :  { %v466_v44 = vmul.f32 %v317_v42, %v3787_v39  ;;  %v462_v45 = vmul.f32 %v316_v43, %v3787_v39  ;;  %v3841_v42 = vrot.slane %v3701_v21, %v146_v59 }
  0xe5   :  { %v306_v46 = vpop.permute.xlu1 %305  ;;  %v304_v48 = vpop.permute.xlu0 %303  ;;  %v526_v49 = vpack.c.bf16 %v466_v44, %v462_v45  ;;  %v3844_v45 = vrot.slane %v3713_v25, %v162_v28 }
  0xe6   :  { %v315_v50 = vsel %vm311_vm3, %v302_v40, %v306_v46  ;;  %v314_v51 = vsel %vm311_vm3, %v300_v41, %v304_v48  ;;  %v3838_v40 = vrot.slane %v3711_v24, %v162_v28 }
  0xe7   :  { %586 = vmatprep.subr.bf16.mxu0 %v526_v49  ;;  %v467_v55 = vmul.f32 %v315_v50, %v3796_v47  ;;  %v463_v56 = vmul.f32 %v314_v51, %v3796_v47  ;;  %v3851_v49 = vrot.slane %v3711_v24, %v146_v59  ;;  %v3854_v50 = vrot.slane %v3713_v25, %v146_v59 }
  0xe8   :  { %6495 = vst [vmem:[#allocation16_spill] sm:$0xff] %v3838_v40  ;;  %v478_v51 = vmul.f32 %v3835_v38, %v3550_v0  ;;  %v480_v0 = vmul.f32 %v3844_v45, %v3576_v7 }
  0xe9   :  { %v310_v57 = vpop.permute.xlu1 %309  ;;  %v308_v58 = vpop.permute.xlu0 %307  ;;  %v527_v26 = vpack.c.bf16 %v467_v55, %v463_v56  ;;  %v482_v55 = vmul.f32 %v3835_v38, %v3558_v2  ;;  %v477_v56 = vmul.f32 %v3838_v40, %v3552_v1  ;;  %v484_v2 = vmul.f32 %v3844_v45, %v3574_v6 }
  0xea   :  { %v313_v61 = vsel %vm311_vm3, %v306_v46, %v310_v57  ;;  %v319_v62 = vsel %vm311_vm3, %v310_v57, %v298_v34  ;;  %v312_v63 = vsel %vm311_vm3, %v304_v48, %v308_v58  ;;  %v318_v8 = vsel %vm311_vm3, %v308_v58, %v296_v35 }
  0xeb   :  { %v465_v14 = vmul.f32 %v319_v62, %v3803_v53  ;;  %v468_v16 = vmul.f32 %v313_v61, %v3806_v54  ;;  %v461_v17 = vmul.f32 %v318_v8, %v3803_v53  ;;  %v464_v18 = vmul.f32 %v312_v63, %v3806_v54 }
  0xec   :  { %v481_v57 = vmul.f32 %v3838_v40, %v3560_v3  ;;  %v3865_v58 = vrot.slane %v3701_v21, %v162_v28 }
  0xed   :  { %v323_v19 = vpop.permute.xlu1 %322  ;;  %v321_v20 = vpop.permute.xlu0 %320  ;;  %v525_v22 = vpack.c.bf16 %v465_v14, %v461_v17  ;;  %v528_v23 = vpack.c.bf16 %v468_v16, %v464_v18  ;;  %v534_v18 = vpack.c.bf16 %v482_v55, %v478_v51 }
  0xee   :  { %6496 = vst [vmem:[#allocation17_spill] sm:$0xff] %v3865_v58 }
  0xef   :  { %587 = vmatpush1.bf16.msra.mxu0 %v525_v22  ;;  %637 = vmatprep.subr.bf16.mxu1 %v528_v23  ;;  %v479_v22 = vmul.f32 %v3865_v58, %v3564_v5 }
  0xf0   :  { %638 = vmatpush1.bf16.msra.mxu1 %v527_v26 }
  0xf1   :  { %v327_v30 = vpop.permute.xlu1 %326  ;;  %v325_v31 = vpop.permute.xlu0 %324 }
  0xf2   :  { %v342_v34 = vsel %vm336_vm4, %v323_v19, %v327_v30  ;;  %v341_v35 = vsel %vm336_vm4, %v321_v20, %v325_v31 }
  0xf3   :  { %v474_v36 = vmul.f32 %v342_v34, %v3825_v27  ;;  %v470_v37 = vmul.f32 %v341_v35, %v3825_v27  ;;  %v533_v35 = vpack.c.bf16 %v481_v57, %v477_v56 }
  0xf5   :  { %v331_v41 = vpop.permute.xlu1 %330  ;;  %v329_v43 = vpop.permute.xlu0 %328  ;;  %v530_v44 = vpack.c.bf16 %v474_v36, %v470_v37 }
  0xf6   :  { %v340_v46 = vsel %vm336_vm4, %v327_v30, %v331_v41  ;;  %v339_v48 = vsel %vm336_vm4, %v325_v31, %v329_v43  ;;  %v536_v31 = vpack.c.bf16 %v484_v2, %v480_v0 }
  0xf7   :  { %588 = vmatprep.subr.bf16.mxu0 %v530_v44  ;;  %v475_v61 = vmul.f32 %v340_v46, %v3841_v42  ;;  %v471_v59 = vmul.f32 %v339_v48, %v3841_v42 }
  0xf9   :  { %v335_v62 = vpop.permute.xlu1 %334  ;;  %v333_v63 = vpop.permute.xlu0 %332  ;;  %v531_v34 = vpack.c.bf16 %v475_v61, %v471_v59 }
  0xfa   :  { %v338_v1 = vsel %vm336_vm4, %v331_v41, %v335_v62  ;;  %v344_v3 = vsel %vm336_vm4, %v335_v62, %v323_v19  ;;  %v337_v8 = vsel %vm336_vm4, %v329_v43, %v333_v63  ;;  %v343_v14 = vsel %vm336_vm4, %v333_v63, %v321_v20 }
  0xfb   :  { %v473_v16 = vmul.f32 %v344_v3, %v3851_v49  ;;  %v476_v17 = vmul.f32 %v338_v1, %v3854_v50  ;;  %v469_v7 = vmul.f32 %v343_v14, %v3851_v49  ;;  %v472_v6 = vmul.f32 %v337_v8, %v3854_v50 }
  0xfc   :  { %v483_v19 = vmul.f32 %v3865_v58, %v3562_v4  ;;  %v178_v20 = vsub.s32 5, %v3678_v9 }
  0xfd   :  { %v348_v23 = vpop.permute.xlu1 %347  ;;  %v346_v26 = vpop.permute.xlu0 %345  ;;  %v529_v28 = vpack.c.bf16 %v473_v16, %v469_v7  ;;  %v532_v30 = vpack.c.bf16 %v476_v17, %v472_v6 }
  0xfe   :  { %v535_v36 = vpack.c.bf16 %v483_v19, %v479_v22  ;;  %v3892_v37 = vrot.slane %v3711_v24, %v178_v20  ;;  %v3899_v44 = vrot.slane %v3687_v12, %v178_v20  ;;  %v3910_v62 = vrot.slane %v3701_v21, %v178_v20 }
  0xff   :  { %589 = vmatpush1.bf16.msra.mxu0 %v529_v28  ;;  %639 = vmatprep.subr.bf16.mxu1 %v532_v30  ;;  %v3913_v63 = vrot.slane %v3713_v25, %v178_v20  ;;  %v194_v20 = vsub.s32 6, %v3678_v9 }
 0x100   :  { %640 = vmatpush1.bf16.msra.mxu1 %v531_v34  ;;  %590 = vmatprep.subr.bf16.mxu0 %v534_v18 }
 0x101   :  { %v352_v5 = vpop.permute.xlu1 %351  ;;  %v350_v4 = vpop.permute.xlu0 %349  ;;  %641 = vmatprep.subr.bf16.mxu1 %v536_v31  ;;  %v3930_v31 = vrot.slane %v3711_v24, %v194_v20 }
 0x102   :  { %v367_v41 = vsel %vm361_vm5, %v348_v23, %v352_v5  ;;  %v366_v43 = vsel %vm361_vm5, %v346_v26, %v350_v4 }
 0x103   :  { %591 = vmatpush1.bf16.msra.mxu0 %v533_v35  ;;  %v489_v46 = vmul.f32 %v367_v41, %v3892_v37  ;;  %v485_v48 = vmul.f32 %v366_v43, %v3892_v37  ;;  %6497 = vst [vmem:[#allocation18_spill] sm:$0xff] %v3930_v31 }
 0x104   :  { %642 = vmatpush1.bf16.msra.mxu1 %v535_v36 }
 0x105   :  { %v356_v51 = vpop.permute.xlu1 %355  ;;  %v354_v55 = vpop.permute.xlu0 %353  ;;  %v537_v3 = vpack.c.bf16 %v489_v46, %v485_v48 }
 0x106   :  { %v365_v56 = vsel %vm361_vm5, %v352_v5, %v356_v51  ;;  %v364_v57 = vsel %vm361_vm5, %v350_v4, %v354_v55  ;;  %v3937_v5 = vrot.slane %v3687_v12, %v194_v20 }
 0x107   :  { %v490_v61 = vmul.f32 %v365_v56, %v3899_v44  ;;  %v486_v59 = vmul.f32 %v364_v57, %v3899_v44  ;;  %v3948_v57 = vrot.slane %v3701_v21, %v194_v20 }
 0x108   :  { %6498 = vst [vmem:[#allocation19_spill] sm:$0xff] %v3937_v5 }
 0x109   :  { %v360_v0 = vpop.permute.xlu1 %359  ;;  %v358_v2 = vpop.permute.xlu0 %357  ;;  %v538_v1 = vpack.c.bf16 %v490_v61, %v486_v59  ;;  %6499 = vst [vmem:[#allocation20_spill] sm:$0xff] %v3948_v57  ;;  %v3951_v61 = vrot.slane %v3713_v25, %v194_v20  ;;  %v210_v20 = vsub.s32 7, %v3678_v9 }
 0x10a   :  { %v363_v8 = vsel %vm361_vm5, %v356_v51, %v360_v0  ;;  %v369_v14 = vsel %vm361_vm5, %v360_v0, %v348_v23  ;;  %v362_v16 = vsel %vm361_vm5, %v354_v55, %v358_v2  ;;  %v368_v17 = vsel %vm361_vm5, %v358_v2, %v346_v26 }
 0x10b   :  { %v491_v7 = vmul.f32 %v363_v8, %v3910_v62  ;;  %v492_v6 = vmul.f32 %v369_v14, %v3913_v63  ;;  %v487_v18 = vmul.f32 %v362_v16, %v3910_v62  ;;  %v488_v22 = vmul.f32 %v368_v17, %v3913_v63  ;;  %592 = vmatprep.subr.bf16.mxu0 %v538_v1 }
 0x10c   :  { %593 = vmatpush1.bf16.msra.mxu0 %v537_v3  ;;  %6500 = vst [vmem:[#allocation21_spill] sm:$0xff] %v3951_v61 }
 0x10d   :  { %v373_v19 = vpop.permute.xlu1 %372  ;;  %v371_v28 = vpop.permute.xlu0 %370  ;;  %v540_v30 = vpack.c.bf16 %v492_v6, %v488_v22  ;;  %v539_v23 = vpack.c.bf16 %v491_v7, %v487_v18 }
 0x10f   :  { %643 = vmatprep.subr.bf16.mxu1 %v540_v30 }
 0x110   :  { %644 = vmatpush1.bf16.msra.mxu1 %v539_v23 }
 0x111   :  { %v377_v26 = vpop.permute.xlu1 %376  ;;  %v375_v34 = vpop.permute.xlu0 %374 }
 0x112   :  { %v392_v35 = vsel %vm386_vm6, %v373_v19, %v377_v26  ;;  %v391_v36 = vsel %vm386_vm6, %v371_v28, %v375_v34 }
 0x113   :  { %v497_v4 = vmul.f32 %v392_v35, %v3930_v31  ;;  %v493_v41 = vmul.f32 %v391_v36, %v3930_v31 }
 0x115   :  { %v381_v43 = vpop.permute.xlu1 %380  ;;  %v379_v46 = vpop.permute.xlu0 %378  ;;  %v541_v1 = vpack.c.bf16 %v497_v4, %v493_v41  ;;  %v3975_v4 = vrot.slane %v3687_v12, %v210_v20  ;;  %v3989_v12 = vrot.slane %v3713_v25, %v210_v20 }
 0x116   :  { %v390_v48 = vsel %vm386_vm6, %v377_v26, %v381_v43  ;;  %v389_v51 = vsel %vm386_vm6, %v375_v34, %v379_v46  ;;  %v3968_v26 = vrot.slane %v3711_v24, %v210_v20 }
 0x117   :  { %v498_v55 = vmul.f32 %v390_v48, %v3937_v5  ;;  %v494_v56 = vmul.f32 %v389_v51, %v3937_v5  ;;  %6502 = vst [vmem:[#allocation23_spill] sm:$0xff] %v3975_v4  ;;  %6504 = vst [vmem:[#allocation25_spill] sm:$0xff] %v3989_v12 }
 0x118   :  { %6501 = vst [vmem:[#allocation22_spill] sm:$0xff] %v3968_v26 }
 0x119   :  { %v385_v59 = vpop.permute.xlu1 %384  ;;  %v383_v0 = vpop.permute.xlu0 %382  ;;  %v542_v2 = vpack.c.bf16 %v498_v55, %v494_v56  ;;  %v3986_v56 = vrot.slane %v3701_v21, %v210_v20  ;;  %v4004_v20 = vld [vmem:[#allocation5 + $0x20] ss:$0 sm:$0xff] }
 0x11a   :  { %v388_v3 = vsel %vm386_vm6, %v381_v43, %v385_v59  ;;  %v394_v8 = vsel %vm386_vm6, %v385_v59, %v373_v19  ;;  %v387_v14 = vsel %vm386_vm6, %v379_v46, %v383_v0  ;;  %v393_v16 = vsel %vm386_vm6, %v383_v0, %v371_v28  ;;  %6505 = vst [vmem:[#allocation26_spill] sm:$0xff] %v4004_v20 }
 0x11b   :  { %v499_v17 = vmul.f32 %v388_v3, %v3948_v57  ;;  %v500_v7 = vmul.f32 %v394_v8, %v3951_v61  ;;  %v495_v6 = vmul.f32 %v387_v14, %v3948_v57  ;;  %v496_v18 = vmul.f32 %v393_v16, %v3951_v61  ;;  %594 = vmatprep.subr.bf16.mxu0 %v542_v2 }
 0x11c   :  { %595 = vmatpush1.bf16.msra.mxu0 %v541_v1  ;;  %6503 = vst [vmem:[#allocation24_spill] sm:$0xff] %v3986_v56 }
 0x11d   :  { %v398_v22 = vpop.permute.xlu1 %397  ;;  %v396_v30 = vpop.permute.xlu0 %395  ;;  %v544_v23 = vpack.c.bf16 %v500_v7, %v496_v18  ;;  %v543_v19 = vpack.c.bf16 %v499_v17, %v495_v6 }
 0x11f   :  { %645 = vmatprep.subr.bf16.mxu1 %v544_v23 }
 0x120   :  { %646 = vmatpush1.bf16.msra.mxu1 %v543_v19 }
 0x121   :  { %v402_v28 = vpop.permute.xlu1 %401  ;;  %v400_v34 = vpop.permute.xlu0 %399 }
 0x122   :  { %v417_v35 = vsel %vm411_vm7, %v398_v22, %v402_v28  ;;  %v416_v36 = vsel %vm411_vm7, %v396_v30, %v400_v34 }
 0x123   :  { %v505_v9 = vmul.f32 %v417_v35, %v3968_v26  ;;  %v501_v41 = vmul.f32 %v416_v36, %v3968_v26  ;;  %v4010_v35 = vld [vmem:[#allocation5 + $0x28] ss:$0 sm:$0xff] }
 0x124   :  { %6506 = vst [vmem:[#allocation27_spill] sm:$0xff] %v4010_v35 }
 0x125   :  { %v406_v43 = vpop.permute.xlu1 %405  ;;  %v404_v46 = vpop.permute.xlu0 %403  ;;  %v545_v1 = vpack.c.bf16 %v505_v9, %v501_v41 }
 0x126   :  { %v415_v24 = vsel %vm411_vm7, %v402_v28, %v406_v43  ;;  %v414_v48 = vsel %vm411_vm7, %v400_v34, %v404_v46 }
 0x127   :  { %v506_v51 = vmul.f32 %v415_v24, %v3975_v4  ;;  %v502_v55 = vmul.f32 %v414_v48, %v3975_v4  ;;  %v6329_v48 = vmov 0  }
 0x129   :  { %v410_v59 = vpop.permute.xlu1 %409  ;;  %v408_v0 = vpop.permute.xlu0 %407  ;;  %v546_v2 = vpack.c.bf16 %v506_v51, %v502_v55  ;;  %v578_v51 = vsel %vm576_vm9, 65535, %v6329_v48 }
 0x12a   :  { %v413_v3 = vsel %vm411_vm7, %v406_v43, %v410_v59  ;;  %v419_v8 = vsel %vm411_vm7, %v410_v59, %v398_v22  ;;  %v412_v14 = vsel %vm411_vm7, %v404_v46, %v408_v0  ;;  %v418_v21 = vsel %vm411_vm7, %v408_v0, %v396_v30  ;;  %v4021_v0 = vld [vmem:[#allocation5 + $0x30] ss:$0 sm:$0xff] }
 0x12b   :  { %v507_v16 = vmul.f32 %v413_v3, %v3986_v56  ;;  %v508_v25 = vmul.f32 %v419_v8, %v3989_v12  ;;  %v503_v17 = vmul.f32 %v412_v14, %v3986_v56  ;;  %v504_v7 = vmul.f32 %v418_v21, %v3989_v12  ;;  %596 = vmatprep.subr.bf16.mxu0 %v546_v2  ;;  %v4023_v2 = vld [vmem:[#allocation5 + $0x38] ss:$0 sm:$0xff] }
 0x12c   :  { %597 = vmatpush1.bf16.msra.mxu0 %v545_v1  ;;  %6507 = vst [vmem:[#allocation28_spill] sm:$0xff] %v4021_v0  ;;  %6508 = vst [vmem:[#allocation29_spill] sm:$0xff] %v4023_v2  ;;  %v4025_v21 = vand.u32 1.0|1.0, %v578_v51 }
 0x12d   :  { %v423_v6 = vpop.permute.xlu1 %422  ;;  %v421_v18 = vpop.permute.xlu0 %420  ;;  %v548_v23 = vpack.c.bf16 %v508_v25, %v504_v7  ;;  %v547_v22 = vpack.c.bf16 %v507_v16, %v503_v17 }
 0x12e   :  { %6509 = vst [vmem:[#allocation30_spill] sm:$0xff] %v4025_v21 }
 0x12f   :  { %647 = vmatprep.subr.bf16.mxu1 %v548_v23 }
 0x130   :  { %648 = vmatpush1.bf16.msra.mxu1 %v547_v22 }
 0x131   :  { %v427_v19 = vpop.permute.xlu1 %426  ;;  %v425_v30 = vpop.permute.xlu0 %424 }
 0x132   :  { %v442_v28 = vsel %vm436_vm8, %v423_v6, %v427_v19  ;;  %v441_v34 = vsel %vm436_vm8, %v421_v18, %v425_v30 }
 0x133   :  { %v513_v36 = vmul.f32 %v4004_v20, %v442_v28  ;;  %v509_v9 = vmul.f32 %v4004_v20, %v441_v34  ;;  %v3269_v34 = vld [vmem:[#allocation7] ss:$8 sps:$4 sm:$0xff]  }
 0x135   :  { %v431_v41 = vpop.permute.xlu1 %430  ;;  %v429_v43 = vpop.permute.xlu0 %428  ;;  %v549_v14 = vpack.c.bf16 %v513_v36, %v509_v9 }
 0x136   :  { %v440_v46 = vsel %vm436_vm8, %v427_v19, %v431_v41  ;;  %v439_v24 = vsel %vm436_vm8, %v425_v30, %v429_v43 }
 0x137   :  { %v514_v55 = vmul.f32 %v4010_v35, %v440_v46  ;;  %v510_v59 = vmul.f32 %v4010_v35, %v439_v24 }
 0x139   :  { %v435_v1 = vpop.permute.xlu1 %434  ;;  %v433_v3 = vpop.permute.xlu0 %432  ;;  %v550_v8 = vpack.c.bf16 %v514_v55, %v510_v59 }
 0x13a   :  { %v438_v16 = vsel %vm436_vm8, %v431_v41, %v435_v1  ;;  %v444_v25 = vsel %vm436_vm8, %v435_v1, %v423_v6  ;;  %v437_v17 = vsel %vm436_vm8, %v429_v43, %v433_v3  ;;  %v443_v7 = vsel %vm436_vm8, %v433_v3, %v421_v18 }
 0x13b   :  { %v515_v23 = vmul.f32 %v4021_v0, %v438_v16  ;;  %v516_v22 = vmul.f32 %v4023_v2, %v444_v25  ;;  %v511_v19 = vmul.f32 %v4021_v0, %v437_v17  ;;  %v512_v30 = vmul.f32 %v4023_v2, %v443_v7  ;;  %598 = vmatprep.subr.bf16.mxu0 %v550_v8 }
 0x13c   :  { %599 = vmatpush1.bf16.msra.mxu0 %v549_v14 }
 0x13d   :  { %600 = vmatprep.subr.bf16.mxu0 %v4025_v21  ;;  %v552_v28 = vpack.c.bf16 %v516_v22, %v512_v30  ;;  %v551_v6 = vpack.c.bf16 %v515_v23, %v511_v19 }
 0x13f   :  { %649 = vmatprep.subr.bf16.mxu1 %v552_v28  ;;  %v242_v28 = vld [vmem:[#allocation7 + $0x10] sm:$0xff] }
 0x140   :  { %601 = vmatpush1.bf16.msra.mxu0 %v4025_v21  ;;  %650 = vmatpush1.bf16.msra.mxu1 %v551_v6  ;;  %v3151_v6 = vcombine.high %v242_v28, %v242_v28 }
 0x141   :  { %651 = vmatprep.subr.bf16.mxu1 %v4025_v21 }
 0x143   :  { %615 = vmatmul.mubr.bf16.vlgmr.msra.gmra.mrb[0].mxu0 %v3269_v34 }
 0x144   :  { %652 = vmatpush1.bf16.msra.mxu1 %v4025_v21  ;;  %3153 = vmatprep.mubr.msk.bf16.mxu0 %vm569_vm1, %v3151_v6 }
 0x147   :  { %666 = vmatmul.mubr.bf16.vlgmr.msra.gmra.mrb[0].mxu1 %v3269_v34  ;;  %v3150_v34 = vcombine.low %v242_v28, %v242_v28 }
 0x148   :  { %3155 = vmatprep.mubr.msk.bf16.mxu1 %vm569_vm1, %v3151_v6 }
 0x14b   :  { %625 = vmatmul.mubr.bf16.gmra.mrb[4].mxu0 %v3150_v34 }
 0x14f   :  { %676 = vmatmul.mubr.bf16.gmra.mrb[4].mxu1 %v3150_v34 }
 0x216   :  { %v616_v18 = vpop.f32.mrb[0].mxu0 }
 0x217   :  { %v684_v36 = vmax.f32 %v616_v18, 0.0  ;;  %v618_v9 = vpop.f32.mrb[1].mxu0 }
 0x218   :  { %v620_v41 = vpop.f32.mrb[2].mxu0  ;;  %v4090_v23 = vmax.f32 %v618_v9, 0.0 }
 0x219   :  { %v688_v43 = vmax.f32 %v620_v41, 0.0  ;;  %695 = vrot.lane.b32.xlu0 %v684_v36, %s3442_s23  ;;  %v622_v46 = vpop.f32.mrb[3].mxu0  ;;  %v4046_v59 = vmul.f32 %v684_v36, %v3838_v40  ;;  %v3276_v41 = vld [vmem:[#allocation8 + $0x4] ss:$8 sps:$4 sm:$0xff]  }
 0x21a   :  { %v667_v24 = vpop.f32.mrb[0].mxu1  ;;  %v4093_v22 = vmax.f32 %v622_v46, 0.0  ;;  %3160 = vmatprep.mubr.msk.bf16.mxu0 %vm569_vm1, %v3276_v41  ;;  %3162 = vmatprep.mubr.msk.bf16.mxu1 %vm569_vm1, %v3276_v41 }
 0x21b   :  { %v686_v51 = vmax.f32 %v667_v24, 0.0  ;;  %v669_v55 = vpop.f32.mrb[1].mxu1  ;;  %697 = vrot.lane.b32.xlu1 %v688_v43, %s3442_s23  ;;  %v4049_v1 = vmul.f32 %v688_v43, %v3838_v40 }
 0x21c   :  { %v671_v3 = vpop.f32.mrb[2].mxu1  ;;  %v4097_v19 = vmax.f32 %v669_v55, 0.0 }
 0x21d   :  { %v690_v8 = vmax.f32 %v671_v3, 0.0  ;;  %v673_v14 = vpop.f32.mrb[3].mxu1  ;;  %703 = vrot.lane.b32.xlu0 %v686_v51, %s3442_s23  ;;  %v4056_v25 = vmul.f32 %v686_v51, %v3865_v58 }
 0x21e   :  { %v4101_v30 = vmax.f32 %v673_v14, 0.0 }
 0x21f   :  { %705 = vrot.lane.b32.xlu1 %v690_v8, %s3442_s23  ;;  %6510 = vst [vmem:[#allocation31_spill] sm:$0xff] %v4056_v25  ;;  %v4059_v17 = vmul.f32 %v690_v8, %v3865_v58 }
 0x221   :  { %6511 = vst [vmem:[#allocation32_spill] sm:$0xff] %v4059_v17  ;;  %719 = vrot.lane.b32.xlu0 %v684_v36, %s3443_s3 }
 0x223   :  { %721 = vrot.lane.b32.xlu1 %v688_v43, %s3443_s3 }
 0x225   :  { %727 = vrot.lane.b32.xlu0 %v686_v51, %s3443_s3 }
 0x227   :  { %729 = vrot.lane.b32.xlu1 %v690_v8, %s3443_s3 }
 0x229   :  { %743 = vrot.lane.b32.xlu0 %v684_v36, %s3444_s25 }
 0x22b   :  { %745 = vrot.lane.b32.xlu1 %v688_v43, %s3444_s25 }
 0x22d   :  { %751 = vrot.lane.b32.xlu0 %v686_v51, %s3444_s25 }
 0x22f   :  { %753 = vrot.lane.b32.xlu1 %v690_v8, %s3444_s25 }
 0x231   :  { %767 = vrot.lane.b32.xlu0 %v684_v36, %s3445_s26 }
 0x233   :  { %769 = vrot.lane.b32.xlu1 %v688_v43, %s3445_s26 }
 0x235   :  { %775 = vrot.lane.b32.xlu0 %v686_v51, %s3445_s26 }
 0x237   :  { %777 = vrot.lane.b32.xlu1 %v690_v8, %s3445_s26 }
 0x239   :  { %791 = vrot.lane.b32.xlu0 %v684_v36, %s3446_s27 }
 0x23b   :  { %793 = vrot.lane.b32.xlu1 %v688_v43, %s3446_s27 }
 0x23d   :  { %799 = vrot.lane.b32.xlu0 %v686_v51, %s3446_s27 }
 0x23f   :  { %801 = vrot.lane.b32.xlu1 %v690_v8, %s3446_s27 }
 0x241   :  { %815 = vrot.lane.b32.xlu0 %v684_v36, %s3447_s28 }
 0x243   :  { %817 = vrot.lane.b32.xlu1 %v688_v43, %s3447_s28 }
 0x245   :  { %823 = vrot.lane.b32.xlu0 %v686_v51, %s3447_s28 }
 0x247   :  { %825 = vrot.lane.b32.xlu1 %v690_v8, %s3447_s28 }
 0x249   :  { %839 = vrot.lane.b32.xlu0 %v684_v36, %s3448_s29 }
 0x24b   :  { %841 = vrot.lane.b32.xlu1 %v688_v43, %s3448_s29 }
 0x24d   :  { %847 = vrot.lane.b32.xlu0 %v686_v51, %s3448_s29 }
 0x24f   :  { %849 = vrot.lane.b32.xlu1 %v690_v8, %s3448_s29 }
 0x251   :  { %863 = vrot.lane.b32.xlu0 %v684_v36, %s3449_s30 }
 0x253   :  { %865 = vrot.lane.b32.xlu1 %v688_v43, %s3449_s30 }
 0x255   :  { %871 = vrot.lane.b32.xlu0 %v686_v51, %s3449_s30 }
 0x257   :  { %873 = vrot.lane.b32.xlu1 %v690_v8, %s3449_s30 }
 0x259   :  { %699 = vrot.lane.b32.xlu0 %v4090_v23, %s3442_s23 }
 0x25b   :  { %701 = vrot.lane.b32.xlu1 %v4093_v22, %s3442_s23 }
 0x25d   :  { %707 = vrot.lane.b32.xlu0 %v4097_v19, %s3442_s23 }
 0x25f   :  { %709 = vrot.lane.b32.xlu1 %v4101_v30, %s3442_s23 }
 0x261   :  { %723 = vrot.lane.b32.xlu0 %v4090_v23, %s3443_s3 }
 0x263   :  { %725 = vrot.lane.b32.xlu1 %v4093_v22, %s3443_s3 }
 0x265   :  { %731 = vrot.lane.b32.xlu0 %v4097_v19, %s3443_s3 }
 0x267   :  { %733 = vrot.lane.b32.xlu1 %v4101_v30, %s3443_s3 }
 0x269   :  { %747 = vrot.lane.b32.xlu0 %v4090_v23, %s3444_s25 }
 0x26b   :  { %749 = vrot.lane.b32.xlu1 %v4093_v22, %s3444_s25 }
 0x26d   :  { %755 = vrot.lane.b32.xlu0 %v4097_v19, %s3444_s25 }
 0x26f   :  { %757 = vrot.lane.b32.xlu1 %v4101_v30, %s3444_s25 }
 0x271   :  { %771 = vrot.lane.b32.xlu0 %v4090_v23, %s3445_s26 }
 0x273   :  { %773 = vrot.lane.b32.xlu1 %v4093_v22, %s3445_s26 }
 0x275   :  { %779 = vrot.lane.b32.xlu0 %v4097_v19, %s3445_s26 }
 0x277   :  { %781 = vrot.lane.b32.xlu1 %v4101_v30, %s3445_s26 }
 0x279   :  { %795 = vrot.lane.b32.xlu0 %v4090_v23, %s3446_s27 }
 0x27b   :  { %797 = vrot.lane.b32.xlu1 %v4093_v22, %s3446_s27 }
 0x27d   :  { %803 = vrot.lane.b32.xlu0 %v4097_v19, %s3446_s27 }
 0x27f   :  { %805 = vrot.lane.b32.xlu1 %v4101_v30, %s3446_s27 }
 0x281   :  { %819 = vrot.lane.b32.xlu0 %v4090_v23, %s3447_s28 }
 0x283   :  { %821 = vrot.lane.b32.xlu1 %v4093_v22, %s3447_s28 }
 0x285   :  { %827 = vrot.lane.b32.xlu0 %v4097_v19, %s3447_s28 }
 0x287   :  { %829 = vrot.lane.b32.xlu1 %v4101_v30, %s3447_s28 }
 0x289   :  { %843 = vrot.lane.b32.xlu0 %v4090_v23, %s3448_s29 }
 0x28b   :  { %v696_v18 = vpop.permute.xlu0 %695  ;;  %845 = vrot.lane.b32.xlu1 %v4093_v22, %s3448_s29 }
 0x28d   :  { %851 = vrot.lane.b32.xlu0 %v4097_v19, %s3448_s29  ;;  %v698_v36 = vpop.permute.xlu1 %697 }
 0x28f   :  { %v704_v9 = vpop.permute.xlu0 %703  ;;  %853 = vrot.lane.b32.xlu1 %v4101_v30, %s3448_s29 }
 0x291   :  { %867 = vrot.lane.b32.xlu0 %v4090_v23, %s3449_s30  ;;  %v706_v43 = vpop.permute.xlu1 %705 }
 0x293   :  { %v4161_v46 = vpop.permute.xlu0 %719  ;;  %869 = vrot.lane.b32.xlu1 %v4093_v22, %s3449_s30 }
 0x295   :  { %875 = vrot.lane.b32.xlu0 %v4097_v19, %s3449_s30  ;;  %v4167_v24 = vpop.permute.xlu1 %721 }
 0x297   :  { %v4169_v51 = vpop.permute.xlu0 %727  ;;  %877 = vrot.lane.b32.xlu1 %v4101_v30, %s3449_s30 }
 0x299   :  { %v4173_v55 = vpop.permute.xlu1 %729 }
 0x29b   :  { %v4175_v3 = vpop.permute.xlu0 %743 }
 0x29d   :  { %v4177_v8 = vpop.permute.xlu1 %745 }
 0x29f   :  { %v4179_v14 = vpop.permute.xlu0 %751 }
 0x2a1   :  { %v4181_v28 = vpop.permute.xlu1 %753 }
 0x2a3   :  { %v4183_v6 = vpop.permute.xlu0 %767 }
 0x2a5   :  { %v4185_v34 = vpop.permute.xlu1 %769 }
 0x2a7   :  { %v4187_v41 = vpop.permute.xlu0 %775 }
 0x2a9   :  { %v4189_v48 = vpop.permute.xlu1 %777 }
 0x2ab   :  { %v4191_v7 = vpop.permute.xlu0 %791 }
 0x2ad   :  { %v4193_v16 = vpop.permute.xlu1 %793 }
 0x2af   :  { %v4195_v58 = vpop.permute.xlu0 %799 }
 0x2b1   :  { %v4197_v40 = vpop.permute.xlu1 %801 }
 0x2b3   :  { %v4199_v21 = vpop.permute.xlu0 %815 }
 0x2b4   :  { %6512 = vst [vmem:[#allocation33_spill] sm:$0xff] %v4199_v21 }
 0x2b5   :  { %v4201_v2 = vpop.permute.xlu1 %817 }
 0x2b6   :  { %6513 = vst [vmem:[#allocation34_spill] sm:$0xff] %v4201_v2 }
 0x2b7   :  { %v4203_v0 = vpop.permute.xlu0 %823 }
 0x2b8   :  { %6514 = vst [vmem:[#allocation35_spill] sm:$0xff] %v4203_v0 }
 0x2b9   :  { %v4205_v35 = vpop.permute.xlu1 %825 }
 0x2ba   :  { %6515 = vst [vmem:[#allocation36_spill] sm:$0xff] %v4205_v35 }
 0x2bb   :  { %v4207_v20 = vpop.permute.xlu0 %839 }
 0x2bc   :  { %6516 = vst [vmem:[#allocation37_spill] sm:$0xff] %v4207_v20 }
 0x2bd   :  { %v4209_v12 = vpop.permute.xlu1 %841 }
 0x2be   :  { %6517 = vst [vmem:[#allocation38_spill] sm:$0xff] %v4209_v12 }
 0x2bf   :  { %v4211_v56 = vpop.permute.xlu0 %847 }
 0x2c0   :  { %6518 = vst [vmem:[#allocation39_spill] sm:$0xff] %v4211_v56 }
 0x2c1   :  { %v4213_v4 = vpop.permute.xlu1 %849 }
 0x2c2   :  { %6519 = vst [vmem:[#allocation40_spill] sm:$0xff] %v4213_v4 }
 0x2c3   :  { %v4215_v26 = vpop.permute.xlu0 %863 }
 0x2c4   :  { %6520 = vst [vmem:[#allocation41_spill] sm:$0xff] %v4215_v26 }
 0x2c5   :  { %v4217_v61 = vpop.permute.xlu1 %865 }
 0x2c6   :  { %6521 = vst [vmem:[#allocation42_spill] sm:$0xff] %v4217_v61 }
 0x2c7   :  { %v4219_v57 = vpop.permute.xlu0 %871 }
 0x2c8   :  { %6522 = vst [vmem:[#allocation43_spill] sm:$0xff] %v4219_v57 }
 0x2c9   :  { %v4221_v5 = vpop.permute.xlu1 %873 }
 0x2ca   :  { %6523 = vst [vmem:[#allocation44_spill] sm:$0xff] %v4221_v5 }
 0x2cb   :  { %v700_v2 = vpop.permute.xlu0 %699 }
 0x2cc   :  { %v715_v35 = vsel %vm261_vm0, %v696_v18, %v700_v2  ;;  %v713_v56 = vsel %vm261_vm0, %v700_v2, %v704_v9 }
 0x2cd   :  { %v702_v31 = vpop.permute.xlu1 %701  ;;  %v888_v20 = vmul.f32 %v715_v35, %v3695_v15 }
 0x2ce   :  { %v716_v12 = vsel %vm261_vm0, %v698_v36, %v702_v31  ;;  %v714_v4 = vsel %vm261_vm0, %v702_v31, %v706_v43 }
 0x2cf   :  { %v892_v26 = vmul.f32 %v716_v12, %v3695_v15  ;;  %v708_v61 = vpop.permute.xlu0 %707  ;;  %v893_v21 = vmul.f32 %v714_v4, %v3716_v29 }
 0x2d0   :  { %v711_v57 = vsel %vm261_vm0, %v704_v9, %v708_v61  ;;  %v717_v5 = vsel %vm261_vm0, %v708_v61, %v696_v18 }
 0x2d1   :  { %v710_v25 = vpop.permute.xlu1 %709  ;;  %v960_v17 = vpack.c.bf16 %v892_v26, %v888_v20  ;;  %v887_v12 = vmul.f32 %v717_v5, %v3727_v32  ;;  %v890_v15 = vmul.f32 %v711_v57, %v3730_v33  ;;  %v889_v26 = vmul.f32 %v713_v56, %v3716_v29 }
 0x2d2   :  { %v712_v35 = vsel %vm261_vm0, %v706_v43, %v710_v25  ;;  %v718_v31 = vsel %vm261_vm0, %v710_v25, %v698_v36 }
 0x2d3   :  { %v891_v0 = vmul.f32 %v718_v31, %v3727_v32  ;;  %v894_v61 = vmul.f32 %v712_v35, %v3730_v33  ;;  %v724_v18 = vpop.permute.xlu0 %723  ;;  %1016 = vmatprep.subr.bf16.mxu0 %v960_v17  ;;  %v961_v25 = vpack.c.bf16 %v893_v21, %v889_v26 }
 0x2d4   :  { %v739_v4 = vsel %vm286_vm2, %v4161_v46, %v724_v18  ;;  %v737_v21 = vsel %vm286_vm2, %v724_v18, %v4169_v51 }
 0x2d5   :  { %v959_v20 = vpack.c.bf16 %v891_v0, %v887_v12  ;;  %v726_v2 = vpop.permute.xlu1 %725  ;;  %v962_v9 = vpack.c.bf16 %v894_v61, %v890_v15  ;;  %v896_v57 = vmul.f32 %v739_v4, %v3749_v52 }
 0x2d6   :  { %v740_v5 = vsel %vm286_vm2, %v4167_v24, %v726_v2  ;;  %v738_v17 = vsel %vm286_vm2, %v726_v2, %v4173_v55 }
 0x2d7   :  { %v900_v56 = vmul.f32 %v740_v5, %v3749_v52  ;;  %v732_v36 = vpop.permute.xlu0 %731  ;;  %1017 = vmatpush1.bf16.msra.mxu0 %v959_v20  ;;  %1067 = vmatprep.subr.bf16.mxu1 %v962_v9  ;;  %v901_v31 = vmul.f32 %v738_v17, %v3758_v60  ;;  %v897_v20 = vmul.f32 %v737_v21, %v3758_v60 }
 0x2d8   :  { %v735_v15 = vsel %vm286_vm2, %v4169_v51, %v732_v36  ;;  %v741_v0 = vsel %vm286_vm2, %v732_v36, %v4161_v46  ;;  %1068 = vmatpush1.bf16.msra.mxu1 %v961_v25 }
 0x2d9   :  { %v734_v43 = vpop.permute.xlu1 %733  ;;  %v964_v35 = vpack.c.bf16 %v900_v56, %v896_v57  ;;  %v895_v26 = vmul.f32 %v741_v0, %v3765_v11  ;;  %v898_v46 = vmul.f32 %v735_v15, %v3768_v13 }
 0x2da   :  { %v736_v12 = vsel %vm286_vm2, %v4173_v55, %v734_v43  ;;  %v742_v61 = vsel %vm286_vm2, %v734_v43, %v4167_v24  ;;  %v965_v24 = vpack.c.bf16 %v901_v31, %v897_v20 }
 0x2db   :  { %v899_v4 = vmul.f32 %v742_v61, %v3765_v11  ;;  %v902_v51 = vmul.f32 %v736_v12, %v3768_v13  ;;  %v748_v18 = vpop.permute.xlu0 %747  ;;  %1018 = vmatprep.subr.bf16.mxu0 %v964_v35 }
 0x2dc   :  { %v763_v55 = vsel %vm311_vm3, %v4175_v3, %v748_v18  ;;  %v761_v21 = vsel %vm311_vm3, %v748_v18, %v4179_v14 }
 0x2dd   :  { %v963_v2 = vpack.c.bf16 %v899_v4, %v895_v26  ;;  %v750_v9 = vpop.permute.xlu1 %749  ;;  %v966_v25 = vpack.c.bf16 %v902_v51, %v898_v46  ;;  %v904_v57 = vmul.f32 %v763_v55, %v3787_v39  ;;  %v905_v51 = vmul.f32 %v761_v21, %v3796_v47 }
 0x2de   :  { %v764_v5 = vsel %vm311_vm3, %v4177_v8, %v750_v9  ;;  %v762_v17 = vsel %vm311_vm3, %v750_v9, %v4181_v28  ;;  %v924_v21 = vmul.f32 %v4093_v22, %v3835_v38 }
 0x2df   :  { %v908_v56 = vmul.f32 %v764_v5, %v3787_v39  ;;  %v756_v36 = vpop.permute.xlu0 %755  ;;  %1019 = vmatpush1.bf16.msra.mxu0 %v963_v2  ;;  %1069 = vmatprep.subr.bf16.mxu1 %v966_v25  ;;  %v909_v31 = vmul.f32 %v762_v17, %v3796_v47 }
 0x2e0   :  { %v759_v15 = vsel %vm311_vm3, %v4179_v14, %v756_v36  ;;  %v765_v0 = vsel %vm311_vm3, %v756_v36, %v4175_v3  ;;  %1070 = vmatpush1.bf16.msra.mxu1 %v965_v24 }
 0x2e1   :  { %v758_v43 = vpop.permute.xlu1 %757  ;;  %v968_v35 = vpack.c.bf16 %v908_v56, %v904_v57  ;;  %v903_v26 = vmul.f32 %v765_v0, %v3803_v53  ;;  %v906_v3 = vmul.f32 %v759_v15, %v3806_v54  ;;  %v920_v0 = vmul.f32 %v4090_v23, %v3835_v38 }
 0x2e2   :  { %v760_v12 = vsel %vm311_vm3, %v4181_v28, %v758_v43  ;;  %v766_v61 = vsel %vm311_vm3, %v758_v43, %v4177_v8  ;;  %v969_v8 = vpack.c.bf16 %v909_v31, %v905_v51 }
 0x2e3   :  { %v907_v46 = vmul.f32 %v766_v61, %v3803_v53  ;;  %v910_v14 = vmul.f32 %v760_v12, %v3806_v54  ;;  %v772_v4 = vpop.permute.xlu0 %771  ;;  %1020 = vmatprep.subr.bf16.mxu0 %v968_v35 }
 0x2e4   :  { %v787_v28 = vsel %vm336_vm4, %v4183_v6, %v772_v4  ;;  %v785_v56 = vsel %vm336_vm4, %v772_v4, %v4187_v41 }
 0x2e5   :  { %v967_v18 = vpack.c.bf16 %v907_v46, %v903_v26  ;;  %v774_v20 = vpop.permute.xlu1 %773  ;;  %v970_v55 = vpack.c.bf16 %v910_v14, %v906_v3  ;;  %v912_v9 = vmul.f32 %v787_v28, %v3825_v27  ;;  %v913_v26 = vmul.f32 %v785_v56, %v3841_v42 }
 0x2e6   :  { %v788_v2 = vsel %vm336_vm4, %v4185_v34, %v774_v20  ;;  %v786_v25 = vsel %vm336_vm4, %v774_v20, %v4189_v48  ;;  %v976_v14 = vpack.c.bf16 %v924_v21, %v920_v0  ;;  %v6524_v21 = vpack.c.bf16 %v4049_v1, %v4046_v59  ;;  %v6531_v1 = vld [vmem:[#allocation36_spill] sm:$0xff] }
 0x2e7   :  { %v916_v24 = vmul.f32 %v788_v2, %v3825_v27  ;;  %v780_v5 = vpop.permute.xlu0 %779  ;;  %1021 = vmatpush1.bf16.msra.mxu0 %v967_v18  ;;  %1071 = vmatprep.subr.bf16.mxu1 %v970_v55  ;;  %v917_v43 = vmul.f32 %v786_v25, %v3841_v42 }
 0x2e8   :  { %v783_v57 = vsel %vm336_vm4, %v4187_v41, %v780_v5  ;;  %v789_v17 = vsel %vm336_vm4, %v780_v5, %v4183_v6  ;;  %1072 = vmatpush1.bf16.msra.mxu1 %v969_v8  ;;  %v926_v41 = vmul.f32 %v4101_v30, %v3844_v45 }
 0x2e9   :  { %v782_v36 = vpop.permute.xlu1 %781  ;;  %v972_v15 = vpack.c.bf16 %v916_v24, %v912_v9  ;;  %v911_v31 = vmul.f32 %v789_v17, %v3851_v49  ;;  %v914_v23 = vmul.f32 %v783_v57, %v3854_v50  ;;  %v973_v4 = vpack.c.bf16 %v917_v43, %v913_v26  ;;  %v6525_v43 = vld [vmem:[#allocation35_spill] sm:$0xff]  ;;  %v6530_v26 = vld [vmem:[#allocation18_spill] sm:$0xff] }
 0x2ea   :  { %v784_v35 = vsel %vm336_vm4, %v4189_v48, %v782_v36  ;;  %v790_v6 = vsel %vm336_vm4, %v782_v36, %v4185_v34  ;;  %v922_v34 = vmul.f32 %v4097_v19, %v3844_v45 }
 0x2eb   :  { %v915_v12 = vmul.f32 %v790_v6, %v3851_v49  ;;  %v918_v22 = vmul.f32 %v784_v35, %v3854_v50  ;;  %v796_v61 = vpop.permute.xlu0 %795  ;;  %1022 = vmatprep.subr.bf16.mxu0 %v972_v15  ;;  %v6526_v35 = vld [vmem:[#allocation33_spill] sm:$0xff]  ;;  %v6527_v6 = vld [vmem:[#allocation32_spill] sm:$0xff] }
 0x2ec   :  { %v809_v48 = vsel %vm361_vm5, %v796_v61, %v4195_v58  ;;  %v978_v18 = vpack.c.bf16 %v926_v41, %v922_v34  ;;  %v811_v20 = vsel %vm361_vm5, %v4191_v7, %v796_v61  ;;  %v6528_v41 = vld [vmem:[#allocation31_spill] sm:$0xff]  ;;  %v6532_v34 = vld [vmem:[#allocation34_spill] sm:$0xff] }
 0x2ed   :  { %v971_v30 = vpack.c.bf16 %v915_v12, %v911_v31  ;;  %v798_v3 = vpop.permute.xlu1 %797  ;;  %v974_v46 = vpack.c.bf16 %v918_v22, %v914_v23  ;;  %v928_v19 = vmul.f32 %v809_v48, %v3899_v44  ;;  %v927_v57 = vmul.f32 %v811_v20, %v3892_v37 }
 0x2ee   :  { %v810_v51 = vsel %vm361_vm5, %v798_v3, %v4197_v40  ;;  %v812_v28 = vsel %vm361_vm5, %v4193_v16, %v798_v3  ;;  %v6529_v31 = vpack.c.bf16 %v6527_v6, %v6528_v41  ;;  %v6533_v3 = vld [vmem:[#allocation19_spill] sm:$0xff]  ;;  %v6540_v41 = vld [vmem:[#allocation22_spill] sm:$0xff] }
 0x2ef   :  { %v932_v55 = vmul.f32 %v810_v51, %v3899_v44  ;;  %v804_v8 = vpop.permute.xlu0 %803  ;;  %1023 = vmatpush1.bf16.msra.mxu0 %v971_v30  ;;  %1073 = vmatprep.subr.bf16.mxu1 %v974_v46  ;;  %v931_v25 = vmul.f32 %v812_v28, %v3892_v37 }
 0x2f0   :  { %v807_v2 = vsel %vm361_vm5, %v4195_v58, %v804_v8  ;;  %v813_v9 = vsel %vm361_vm5, %v804_v8, %v4191_v7  ;;  %1024 = vmatprep.subr.bf16.mxu0 %v976_v14  ;;  %1074 = vmatpush1.bf16.msra.mxu1 %v973_v4 }
 0x2f1   :  { %1075 = vmatprep.subr.bf16.mxu1 %v978_v18  ;;  %v806_v24 = vpop.permute.xlu1 %805  ;;  %v980_v5 = vpack.c.bf16 %v932_v55, %v928_v19  ;;  %v929_v56 = vmul.f32 %v807_v2, %v3910_v62  ;;  %v930_v7 = vmul.f32 %v813_v9, %v3913_v63  ;;  %v979_v23 = vpack.c.bf16 %v931_v25, %v927_v57  ;;  %v6534_v9 = vld [vmem:[#allocation20_spill] sm:$0xff] }
 0x2f2   :  { %v808_v17 = vsel %vm361_vm5, %v4197_v40, %v806_v24  ;;  %v814_v58 = vsel %vm361_vm5, %v806_v24, %v4193_v16  ;;  %v6535_v24 = vld [vmem:[#allocation21_spill] sm:$0xff] }
 0x2f3   :  { %v933_v36 = vmul.f32 %v808_v17, %v3910_v62  ;;  %v934_v15 = vmul.f32 %v814_v58, %v3913_v63  ;;  %v820_v0 = vpop.permute.xlu0 %819  ;;  %1025 = vmatpush1.bf16.msra.mxu0 %v6524_v21 }
 0x2f4   :  { %v833_v40 = vsel %vm386_vm6, %v820_v0, %v6525_v43  ;;  %v835_v16 = vsel %vm386_vm6, %v6526_v35, %v820_v0  ;;  %1026 = vmatprep.subr.bf16.mxu0 %v980_v5  ;;  %1076 = vmatpush1.bf16.msra.mxu1 %v6529_v31 }
 0x2f5   :  { %v981_v12 = vpack.c.bf16 %v933_v36, %v929_v56  ;;  %v822_v22 = vpop.permute.xlu1 %821  ;;  %v982_v61 = vpack.c.bf16 %v934_v15, %v930_v7  ;;  %v935_v59 = vmul.f32 %v835_v16, %v6530_v26  ;;  %v936_v46 = vmul.f32 %v833_v40, %v6533_v3  ;;  %v6536_v56 = vld [vmem:[#allocation39_spill] sm:$0xff]  ;;  %v6537_v36 = vld [vmem:[#allocation37_spill] sm:$0xff]  ;;  %v6538_v40 = vld [vmem:[#allocation40_spill] sm:$0xff] }
 0x2f6   :  { %v834_v48 = vsel %vm386_vm6, %v822_v22, %v6531_v1  ;;  %v836_v30 = vsel %vm386_vm6, %v6532_v34, %v822_v22  ;;  %v6539_v16 = vld [vmem:[#allocation38_spill] sm:$0xff] }
 0x2f7   :  { %v939_v14 = vmul.f32 %v836_v30, %v6530_v26  ;;  %v940_v4 = vmul.f32 %v834_v48, %v6533_v3  ;;  %v828_v51 = vpop.permute.xlu0 %827  ;;  %1027 = vmatpush1.bf16.msra.mxu0 %v979_v23  ;;  %1077 = vmatprep.subr.bf16.mxu1 %v982_v61  ;;  %v6541_v23 = vld [vmem:[#allocation23_spill] sm:$0xff] }
 0x2f8   :  { %v831_v28 = vsel %vm386_vm6, %v6525_v43, %v828_v51  ;;  %v837_v18 = vsel %vm386_vm6, %v828_v51, %v6526_v35  ;;  %1078 = vmatpush1.bf16.msra.mxu1 %v981_v12  ;;  %v6542_v51 = vld [vmem:[#allocation24_spill] sm:$0xff] }
 0x2f9   :  { %v983_v20 = vpack.c.bf16 %v939_v14, %v935_v59  ;;  %v830_v19 = vpop.permute.xlu1 %829  ;;  %v984_v55 = vpack.c.bf16 %v940_v4, %v936_v46  ;;  %v937_v25 = vmul.f32 %v831_v28, %v6534_v9  ;;  %v938_v5 = vmul.f32 %v837_v18, %v6535_v24  ;;  %v6543_v18 = vld [vmem:[#allocation25_spill] sm:$0xff] }
 0x2fa   :  { %v832_v8 = vsel %vm386_vm6, %v6531_v1, %v830_v19  ;;  %v838_v2 = vsel %vm386_vm6, %v830_v19, %v6532_v34 }
 0x2fb   :  { %v941_v57 = vmul.f32 %v832_v8, %v6534_v9  ;;  %v942_v17 = vmul.f32 %v838_v2, %v6535_v24  ;;  %v844_v58 = vpop.permute.xlu0 %843  ;;  %1028 = vmatprep.subr.bf16.mxu0 %v984_v55  ;;  %v6544_v2 = vld [vmem:[#allocation43_spill] sm:$0xff] }
 0x2fc   :  { %v857_v7 = vsel %vm411_vm7, %v844_v58, %v6536_v56  ;;  %v859_v15 = vsel %vm411_vm7, %v6537_v36, %v844_v58  ;;  %1029 = vmatpush1.bf16.msra.mxu0 %v983_v20 }
 0x2fd   :  { %v985_v0 = vpack.c.bf16 %v941_v57, %v937_v25  ;;  %v846_v21 = vpop.permute.xlu1 %845  ;;  %v986_v43 = vpack.c.bf16 %v942_v17, %v938_v5  ;;  %v943_v31 = vmul.f32 %v859_v15, %v6540_v41  ;;  %v944_v12 = vmul.f32 %v857_v7, %v6541_v23  ;;  %v6545_v5 = vld [vmem:[#allocation41_spill] sm:$0xff]  ;;  %v6546_v7 = vld [vmem:[#allocation44_spill] sm:$0xff]  ;;  %v6547_v15 = vld [vmem:[#allocation42_spill] sm:$0xff] }
 0x2fe   :  { %v858_v35 = vsel %vm411_vm7, %v846_v21, %v6538_v40  ;;  %v860_v6 = vsel %vm411_vm7, %v6539_v16, %v846_v21  ;;  %v6548_v21 = vld [vmem:[#allocation26_spill] sm:$0xff] }
 0x2ff   :  { %v947_v22 = vmul.f32 %v860_v6, %v6540_v41  ;;  %v948_v61 = vmul.f32 %v858_v35, %v6541_v23  ;;  %v852_v59 = vpop.permute.xlu0 %851  ;;  %1079 = vmatprep.subr.bf16.mxu1 %v986_v43 }
 0x300   :  { %v855_v1 = vsel %vm411_vm7, %v6536_v56, %v852_v59  ;;  %v861_v48 = vsel %vm411_vm7, %v852_v59, %v6537_v36  ;;  %1080 = vmatpush1.bf16.msra.mxu1 %v985_v0 }
 0x301   :  { %v987_v34 = vpack.c.bf16 %v947_v22, %v943_v31  ;;  %v854_v30 = vpop.permute.xlu1 %853  ;;  %v988_v46 = vpack.c.bf16 %v948_v61, %v944_v12  ;;  %v945_v28 = vmul.f32 %v855_v1, %v6542_v51  ;;  %v946_v20 = vmul.f32 %v861_v48, %v6543_v18 }
 0x302   :  { %v856_v14 = vsel %vm411_vm7, %v6538_v40, %v854_v30  ;;  %v862_v4 = vsel %vm411_vm7, %v854_v30, %v6539_v16  ;;  %v6549_v40 = vld [vmem:[#allocation27_spill] sm:$0xff]  ;;  %v6550_v30 = vld [vmem:[#allocation28_spill] sm:$0xff] }
 0x303   :  { %v949_v19 = vmul.f32 %v856_v14, %v6542_v51  ;;  %v950_v55 = vmul.f32 %v862_v4, %v6543_v18  ;;  %v868_v8 = vpop.permute.xlu0 %867  ;;  %1030 = vmatprep.subr.bf16.mxu0 %v988_v46  ;;  %v6551_v14 = vld [vmem:[#allocation29_spill] sm:$0xff] }
 0x304   :  { %v881_v25 = vsel %vm436_vm8, %v868_v8, %v6544_v2  ;;  %v883_v57 = vsel %vm436_vm8, %v6545_v5, %v868_v8  ;;  %1031 = vmatpush1.bf16.msra.mxu0 %v987_v34 }
 0x305   :  { %v989_v17 = vpack.c.bf16 %v949_v19, %v945_v28  ;;  %v870_v58 = vpop.permute.xlu1 %869  ;;  %v990_v56 = vpack.c.bf16 %v950_v55, %v946_v20  ;;  %v951_v43 = vmul.f32 %v6548_v21, %v883_v57  ;;  %v952_v35 = vmul.f32 %v6549_v40, %v881_v25  ;;  %v6552_v55 = vld [vmem:[#allocation30_spill] sm:$0xff] }
 0x306   :  { %v882_v36 = vsel %vm436_vm8, %v870_v58, %v6546_v7  ;;  %v884_v0 = vsel %vm436_vm8, %v6547_v15, %v870_v58 }
 0x307   :  { %v955_v16 = vmul.f32 %v6548_v21, %v884_v0  ;;  %v956_v6 = vmul.f32 %v6549_v40, %v882_v36  ;;  %v876_v31 = vpop.permute.xlu0 %875  ;;  %1081 = vmatprep.subr.bf16.mxu1 %v990_v56  ;;  %v6553_v0 = vld [vmem:[#allocation16_spill] sm:$0xff] }
 0x308   :  { %v879_v12 = vsel %vm436_vm8, %v6544_v2, %v876_v31  ;;  %v885_v22 = vsel %vm436_vm8, %v876_v31, %v6545_v5  ;;  %1082 = vmatpush1.bf16.msra.mxu1 %v989_v17  ;;  %v3274_v2 = vld [vmem:[#allocation8] ss:$8 sps:$4 sm:$0xff]  }
 0x309   :  { %v991_v61 = vpack.c.bf16 %v955_v16, %v951_v43  ;;  %v878_v59 = vpop.permute.xlu1 %877  ;;  %v992_v1 = vpack.c.bf16 %v956_v6, %v952_v35  ;;  %v953_v46 = vmul.f32 %v6550_v30, %v879_v12  ;;  %v954_v4 = vmul.f32 %v6551_v14, %v885_v22  ;;  %v6554_v31 = vld [vmem:[#allocation17_spill] sm:$0xff] }
 0x30a   :  { %v880_v48 = vsel %vm436_vm8, %v6546_v7, %v878_v59  ;;  %v886_v34 = vsel %vm436_vm8, %v878_v59, %v6547_v15 }
 0x30b   :  { %v957_v28 = vmul.f32 %v6550_v30, %v880_v48  ;;  %v958_v20 = vmul.f32 %v6551_v14, %v886_v34  ;;  %1032 = vmatprep.subr.bf16.mxu0 %v992_v1  ;;  %v694_v30 = vld [vmem:[#allocation8 + $0x10] sm:$0xff] }
 0x30c   :  { %1033 = vmatpush1.bf16.msra.mxu0 %v991_v61  ;;  %v3158_v14 = vcombine.low %v694_v30, %v694_v30 }
 0x30d   :  { %v993_v19 = vpack.c.bf16 %v957_v28, %v953_v46  ;;  %1034 = vmatprep.subr.bf16.mxu0 %v6552_v55  ;;  %v994_v8 = vpack.c.bf16 %v958_v20, %v954_v4  ;;  %v3159_v46 = vcombine.high %v694_v30, %v694_v30 }
 0x30f   :  { %1083 = vmatprep.subr.bf16.mxu1 %v994_v8 }
 0x310   :  { %1035 = vmatpush1.bf16.msra.mxu0 %v6552_v55  ;;  %1084 = vmatpush1.bf16.msra.mxu1 %v993_v19  ;;  %v3281_v19 = vld [vmem:[#allocation8 + $0x1c] ss:$8 sps:$4 sm:$0xff]  }
 0x311   :  { %1085 = vmatprep.subr.bf16.mxu1 %v6552_v55 }
 0x313   :  { %1049 = vmatmul.mubr.bf16.vlgmr.msra.gmra.mrb[8].mxu0 %v3274_v2 }
 0x314   :  { %1086 = vmatpush1.bf16.msra.mxu1 %v6552_v55  ;;  %3161 = vmatprep.mubr.msk.bf16.mxu0 %vm569_vm1, %v3159_v46 }
 0x317   :  { %1100 = vmatmul.mubr.bf16.vlgmr.msra.gmra.mrb[8].mxu1 %v3274_v2 }
 0x318   :  { %3163 = vmatprep.mubr.msk.bf16.mxu1 %vm569_vm1, %v3159_v46 }
 0x31b   :  { %1059 = vmatmul.mubr.bf16.gmra.mrb[4].mxu0 %v3158_v14 }
 0x31c   :  { %3168 = vmatprep.mubr.msk.bf16.mxu0 %vm569_vm1, %v3281_v19 }
 0x31f   :  { %1110 = vmatmul.mubr.bf16.gmra.mrb[4].mxu1 %v3158_v14 }
 0x320   :  { %3170 = vmatprep.mubr.msk.bf16.mxu1 %vm569_vm1, %v3281_v19 }
 0x3e6   :  { %v1050_v25 = vpop.f32.mrb[8].mxu0 }
 0x3e7   :  { %v1118_v5 = vmax.f32 %v1050_v25, 0.0  ;;  %v1052_v57 = vpop.f32.mrb[9].mxu0 }
 0x3e8   :  { %v1054_v17 = vpop.f32.mrb[10].mxu0  ;;  %v4536_v59 = vmax.f32 %v1052_v57, 0.0 }
 0x3e9   :  { %v1122_v58 = vmax.f32 %v1054_v17, 0.0  ;;  %1134 = vrot.lane.b32.xlu0 %v1118_v5, %s3442_s23  ;;  %v1056_v56 = vpop.f32.mrb[11].mxu0  ;;  %v4492_v21 = vmul.f32 %v1118_v5, %v6553_v0 }
 0x3ea   :  { %v1101_v7 = vpop.f32.mrb[8].mxu1  ;;  %v4539_v1 = vmax.f32 %v1056_v56, 0.0 }
 0x3eb   :  { %v1120_v36 = vmax.f32 %v1101_v7, 0.0  ;;  %v1103_v15 = vpop.f32.mrb[9].mxu1  ;;  %1136 = vrot.lane.b32.xlu1 %v1122_v58, %s3442_s23  ;;  %v4495_v43 = vmul.f32 %v1122_v58, %v6553_v0 }
 0x3ec   :  { %v1105_v40 = vpop.f32.mrb[10].mxu1  ;;  %v4543_v48 = vmax.f32 %v1103_v15, 0.0 }
 0x3ed   :  { %v1124_v35 = vmax.f32 %v1105_v40, 0.0  ;;  %v1107_v16 = vpop.f32.mrb[11].mxu1  ;;  %1142 = vrot.lane.b32.xlu0 %v1120_v36, %s3442_s23  ;;  %v4502_v12 = vmul.f32 %v1120_v36, %v6554_v31 }
 0x3ee   :  { %v4547_v34 = vmax.f32 %v1107_v16, 0.0 }
 0x3ef   :  { %1144 = vrot.lane.b32.xlu1 %v1124_v35, %s3442_s23  ;;  %6555 = vst [vmem:[#allocation35_spill] sm:$0xff] %v4502_v12  ;;  %v4505_v22 = vmul.f32 %v1124_v35, %v6554_v31 }
 0x3f1   :  { %6556 = vst [vmem:[#allocation33_spill] sm:$0xff] %v4505_v22  ;;  %1158 = vrot.lane.b32.xlu0 %v1118_v5, %s3443_s3 }
 0x3f3   :  { %1160 = vrot.lane.b32.xlu1 %v1122_v58, %s3443_s3 }
 0x3f5   :  { %1166 = vrot.lane.b32.xlu0 %v1120_v36, %s3443_s3 }
 0x3f7   :  { %1168 = vrot.lane.b32.xlu1 %v1124_v35, %s3443_s3 }
 0x3f9   :  { %1182 = vrot.lane.b32.xlu0 %v1118_v5, %s3444_s25 }
 0x3fb   :  { %1184 = vrot.lane.b32.xlu1 %v1122_v58, %s3444_s25 }
 0x3fd   :  { %1190 = vrot.lane.b32.xlu0 %v1120_v36, %s3444_s25 }
 0x3ff   :  { %1192 = vrot.lane.b32.xlu1 %v1124_v35, %s3444_s25 }
 0x401   :  { %1206 = vrot.lane.b32.xlu0 %v1118_v5, %s3445_s26 }
 0x403   :  { %1208 = vrot.lane.b32.xlu1 %v1122_v58, %s3445_s26 }
 0x405   :  { %1214 = vrot.lane.b32.xlu0 %v1120_v36, %s3445_s26 }
 0x407   :  { %1216 = vrot.lane.b32.xlu1 %v1124_v35, %s3445_s26 }
 0x409   :  { %1230 = vrot.lane.b32.xlu0 %v1118_v5, %s3446_s27 }
 0x40b   :  { %1232 = vrot.lane.b32.xlu1 %v1122_v58, %s3446_s27 }
 0x40d   :  { %1238 = vrot.lane.b32.xlu0 %v1120_v36, %s3446_s27 }
 0x40f   :  { %1240 = vrot.lane.b32.xlu1 %v1124_v35, %s3446_s27 }
 0x411   :  { %1254 = vrot.lane.b32.xlu0 %v1118_v5, %s3447_s28 }
 0x413   :  { %1256 = vrot.lane.b32.xlu1 %v1122_v58, %s3447_s28 }
 0x415   :  { %1262 = vrot.lane.b32.xlu0 %v1120_v36, %s3447_s28 }
 0x417   :  { %1264 = vrot.lane.b32.xlu1 %v1124_v35, %s3447_s28 }
 0x419   :  { %1278 = vrot.lane.b32.xlu0 %v1118_v5, %s3448_s29 }
 0x41b   :  { %1280 = vrot.lane.b32.xlu1 %v1122_v58, %s3448_s29 }
 0x41d   :  { %1286 = vrot.lane.b32.xlu0 %v1120_v36, %s3448_s29 }
 0x41f   :  { %1288 = vrot.lane.b32.xlu1 %v1124_v35, %s3448_s29 }
 0x421   :  { %1302 = vrot.lane.b32.xlu0 %v1118_v5, %s3449_s30 }
 0x423   :  { %1304 = vrot.lane.b32.xlu1 %v1122_v58, %s3449_s30 }
 0x425   :  { %1310 = vrot.lane.b32.xlu0 %v1120_v36, %s3449_s30 }
 0x427   :  { %1312 = vrot.lane.b32.xlu1 %v1124_v35, %s3449_s30 }
 0x429   :  { %1138 = vrot.lane.b32.xlu0 %v4536_v59, %s3442_s23 }
 0x42b   :  { %1140 = vrot.lane.b32.xlu1 %v4539_v1, %s3442_s23 }
 0x42d   :  { %1146 = vrot.lane.b32.xlu0 %v4543_v48, %s3442_s23 }
 0x42f   :  { %1148 = vrot.lane.b32.xlu1 %v4547_v34, %s3442_s23 }
 0x431   :  { %1162 = vrot.lane.b32.xlu0 %v4536_v59, %s3443_s3 }
 0x433   :  { %1164 = vrot.lane.b32.xlu1 %v4539_v1, %s3443_s3 }
 0x435   :  { %1170 = vrot.lane.b32.xlu0 %v4543_v48, %s3443_s3 }
 0x437   :  { %1172 = vrot.lane.b32.xlu1 %v4547_v34, %s3443_s3 }
 0x439   :  { %1186 = vrot.lane.b32.xlu0 %v4536_v59, %s3444_s25 }
 0x43b   :  { %1188 = vrot.lane.b32.xlu1 %v4539_v1, %s3444_s25 }
 0x43d   :  { %1194 = vrot.lane.b32.xlu0 %v4543_v48, %s3444_s25 }
 0x43f   :  { %1196 = vrot.lane.b32.xlu1 %v4547_v34, %s3444_s25 }
 0x441   :  { %1210 = vrot.lane.b32.xlu0 %v4536_v59, %s3445_s26 }
 0x443   :  { %1212 = vrot.lane.b32.xlu1 %v4539_v1, %s3445_s26 }
 0x445   :  { %1218 = vrot.lane.b32.xlu0 %v4543_v48, %s3445_s26 }
 0x447   :  { %1220 = vrot.lane.b32.xlu1 %v4547_v34, %s3445_s26 }
 0x449   :  { %1234 = vrot.lane.b32.xlu0 %v4536_v59, %s3446_s27 }
 0x44b   :  { %1236 = vrot.lane.b32.xlu1 %v4539_v1, %s3446_s27 }
 0x44d   :  { %1242 = vrot.lane.b32.xlu0 %v4543_v48, %s3446_s27 }
 0x44f   :  { %1244 = vrot.lane.b32.xlu1 %v4547_v34, %s3446_s27 }
 0x451   :  { %1258 = vrot.lane.b32.xlu0 %v4536_v59, %s3447_s28 }
 0x453   :  { %1260 = vrot.lane.b32.xlu1 %v4539_v1, %s3447_s28 }
 0x455   :  { %1266 = vrot.lane.b32.xlu0 %v4543_v48, %s3447_s28 }
 0x457   :  { %1268 = vrot.lane.b32.xlu1 %v4547_v34, %s3447_s28 }
 0x459   :  { %1282 = vrot.lane.b32.xlu0 %v4536_v59, %s3448_s29 }
 0x45b   :  { %v1135_v4 = vpop.permute.xlu0 %1134  ;;  %1284 = vrot.lane.b32.xlu1 %v4539_v1, %s3448_s29 }
 0x45d   :  { %1290 = vrot.lane.b32.xlu0 %v4543_v48, %s3448_s29  ;;  %v1137_v28 = vpop.permute.xlu1 %1136 }
 0x45f   :  { %v1143_v20 = vpop.permute.xlu0 %1142  ;;  %1292 = vrot.lane.b32.xlu1 %v4547_v34, %s3448_s29 }
 0x461   :  { %1306 = vrot.lane.b32.xlu0 %v4536_v59, %s3449_s30  ;;  %v1145_v8 = vpop.permute.xlu1 %1144 }
 0x463   :  { %v4607_v2 = vpop.permute.xlu0 %1158  ;;  %1308 = vrot.lane.b32.xlu1 %v4539_v1, %s3449_s30 }
 0x465   :  { %1314 = vrot.lane.b32.xlu0 %v4543_v48, %s3449_s30  ;;  %v4613_v25 = vpop.permute.xlu1 %1160 }
 0x467   :  { %v4615_v5 = vpop.permute.xlu0 %1166  ;;  %1316 = vrot.lane.b32.xlu1 %v4547_v34, %s3449_s30 }
 0x469   :  { %v4619_v57 = vpop.permute.xlu1 %1168 }
 0x46b   :  { %v4621_v17 = vpop.permute.xlu0 %1182 }
 0x46d   :  { %v4623_v58 = vpop.permute.xlu1 %1184 }
 0x46f   :  { %v4625_v56 = vpop.permute.xlu0 %1190 }
 0x471   :  { %v4627_v7 = vpop.permute.xlu1 %1192 }
 0x473   :  { %v4629_v36 = vpop.permute.xlu0 %1206 }
 0x475   :  { %v4631_v15 = vpop.permute.xlu1 %1208 }
 0x477   :  { %v4633_v40 = vpop.permute.xlu0 %1214 }
 0x479   :  { %v4635_v35 = vpop.permute.xlu1 %1216 }
 0x47b   :  { %v4637_v16 = vpop.permute.xlu0 %1230 }
 0x47d   :  { %v4639_v30 = vpop.permute.xlu1 %1232 }
 0x47f   :  { %v4641_v46 = vpop.permute.xlu0 %1238 }
 0x481   :  { %v4643_v14 = vpop.permute.xlu1 %1240 }
 0x483   :  { %v4645_v19 = vpop.permute.xlu0 %1254 }
 0x484   :  { %6557 = vst [vmem:[#allocation32_spill] sm:$0xff] %v4645_v19 }
 0x485   :  { %v4647_v61 = vpop.permute.xlu1 %1256 }
 0x486   :  { %6558 = vst [vmem:[#allocation31_spill] sm:$0xff] %v4647_v61 }
 0x487   :  { %v4649_v6 = vpop.permute.xlu0 %1262 }
 0x488   :  { %6559 = vst [vmem:[#allocation36_spill] sm:$0xff] %v4649_v6 }
 0x489   :  { %v4651_v31 = vpop.permute.xlu1 %1264 }
 0x48a   :  { %6560 = vst [vmem:[#allocation34_spill] sm:$0xff] %v4651_v31 }
 0x48b   :  { %v4653_v0 = vpop.permute.xlu0 %1278 }
 0x48c   :  { %6561 = vst [vmem:[#allocation39_spill] sm:$0xff] %v4653_v0  ;;  %v6569_v0 = vld [vmem:[#allocation15_spill] sm:$0xff] }
 0x48d   :  { %v4655_v55 = vpop.permute.xlu1 %1280 }
 0x48e   :  { %6562 = vst [vmem:[#allocation37_spill] sm:$0xff] %v4655_v55 }
 0x48f   :  { %v4657_v18 = vpop.permute.xlu0 %1286 }
 0x490   :  { %6563 = vst [vmem:[#allocation40_spill] sm:$0xff] %v4657_v18 }
 0x491   :  { %v4659_v51 = vpop.permute.xlu1 %1288 }
 0x492   :  { %6564 = vst [vmem:[#allocation38_spill] sm:$0xff] %v4659_v51 }
 0x493   :  { %v4661_v23 = vpop.permute.xlu0 %1302 }
 0x494   :  { %6565 = vst [vmem:[#allocation43_spill] sm:$0xff] %v4661_v23 }
 0x495   :  { %v4663_v41 = vpop.permute.xlu1 %1304 }
 0x496   :  { %6566 = vst [vmem:[#allocation41_spill] sm:$0xff] %v4663_v41 }
 0x497   :  { %v4665_v24 = vpop.permute.xlu0 %1310 }
 0x498   :  { %6567 = vst [vmem:[#allocation44_spill] sm:$0xff] %v4665_v24 }
 0x499   :  { %v4667_v9 = vpop.permute.xlu1 %1312 }
 0x49a   :  { %6568 = vst [vmem:[#allocation42_spill] sm:$0xff] %v4667_v9 }
 0x49b   :  { %v1139_v3 = vpop.permute.xlu0 %1138 }
 0x49c   :  { %v1154_v61 = vsel %vm261_vm0, %v1135_v4, %v1139_v3  ;;  %v1152_v26 = vsel %vm261_vm0, %v1139_v3, %v1143_v20 }
 0x49d   :  { %v1141_v31 = vpop.permute.xlu1 %1140  ;;  %v1327_v18 = vmul.f32 %v1154_v61, %v6569_v0  ;;  %v1328_v3 = vmul.f32 %v1152_v26, %v3716_v29 }
 0x49e   :  { %v1155_v55 = vsel %vm261_vm0, %v1137_v28, %v1141_v31  ;;  %v1153_v51 = vsel %vm261_vm0, %v1141_v31, %v1145_v8 }
 0x49f   :  { %v1331_v23 = vmul.f32 %v1155_v55, %v6569_v0  ;;  %v1147_v41 = vpop.permute.xlu0 %1146  ;;  %v1332_v19 = vmul.f32 %v1153_v51, %v3716_v29 }
 0x4a0   :  { %v1150_v24 = vsel %vm261_vm0, %v1143_v20, %v1147_v41  ;;  %v1156_v9 = vsel %vm261_vm0, %v1147_v41, %v1135_v4 }
 0x4a1   :  { %v1149_v12 = vpop.permute.xlu1 %1148  ;;  %v1399_v22 = vpack.c.bf16 %v1331_v23, %v1327_v18  ;;  %v1326_v31 = vmul.f32 %v1156_v9, %v3727_v32  ;;  %v1329_v0 = vmul.f32 %v1150_v24, %v3730_v33 }
 0x4a2   :  { %v1151_v61 = vsel %vm261_vm0, %v1145_v8, %v1149_v12  ;;  %v1157_v55 = vsel %vm261_vm0, %v1149_v12, %v1137_v28  ;;  %v1400_v12 = vpack.c.bf16 %v1332_v19, %v1328_v3 }
 0x4a3   :  { %v1330_v6 = vmul.f32 %v1157_v55, %v3727_v32  ;;  %v1333_v41 = vmul.f32 %v1151_v61, %v3730_v33  ;;  %v1163_v4 = vpop.permute.xlu0 %1162  ;;  %1455 = vmatprep.subr.bf16.mxu0 %v1399_v22 }
 0x4a4   :  { %v1178_v23 = vsel %vm286_vm2, %v4607_v2, %v1163_v4  ;;  %v1176_v8 = vsel %vm286_vm2, %v1163_v4, %v4615_v5 }
 0x4a5   :  { %v1398_v51 = vpack.c.bf16 %v1330_v6, %v1326_v31  ;;  %v1165_v18 = vpop.permute.xlu1 %1164  ;;  %v1401_v20 = vpack.c.bf16 %v1333_v41, %v1329_v0  ;;  %v1335_v24 = vmul.f32 %v1178_v23, %v3749_v52 }
 0x4a6   :  { %v1179_v9 = vsel %vm286_vm2, %v4613_v25, %v1165_v18  ;;  %v1177_v22 = vsel %vm286_vm2, %v1165_v18, %v4619_v57 }
 0x4a7   :  { %v1339_v26 = vmul.f32 %v1179_v9, %v3749_v52  ;;  %v1171_v28 = vpop.permute.xlu0 %1170  ;;  %1456 = vmatpush1.bf16.msra.mxu0 %v1398_v51  ;;  %1506 = vmatprep.subr.bf16.mxu1 %v1401_v20  ;;  %v1340_v55 = vmul.f32 %v1177_v22, %v3758_v60  ;;  %v1336_v51 = vmul.f32 %v1176_v8, %v3758_v60 }
 0x4a8   :  { %v1174_v0 = vsel %vm286_vm2, %v4615_v5, %v1171_v28  ;;  %v1180_v6 = vsel %vm286_vm2, %v1171_v28, %v4607_v2  ;;  %1507 = vmatpush1.bf16.msra.mxu1 %v1400_v12 }
 0x4a9   :  { %v1173_v19 = vpop.permute.xlu1 %1172  ;;  %v1403_v61 = vpack.c.bf16 %v1339_v26, %v1335_v24  ;;  %v1334_v3 = vmul.f32 %v1180_v6, %v3765_v11  ;;  %v1337_v2 = vmul.f32 %v1174_v0, %v3768_v13 }
 0x4aa   :  { %v1175_v31 = vsel %vm286_vm2, %v4619_v57, %v1173_v19  ;;  %v1181_v41 = vsel %vm286_vm2, %v1173_v19, %v4613_v25  ;;  %v1404_v25 = vpack.c.bf16 %v1340_v55, %v1336_v51 }
 0x4ab   :  { %v1338_v23 = vmul.f32 %v1181_v41, %v3765_v11  ;;  %v1341_v5 = vmul.f32 %v1175_v31, %v3768_v13  ;;  %v1187_v4 = vpop.permute.xlu0 %1186  ;;  %1457 = vmatprep.subr.bf16.mxu0 %v1403_v61 }
 0x4ac   :  { %v1202_v57 = vsel %vm311_vm3, %v4621_v17, %v1187_v4  ;;  %v1200_v8 = vsel %vm311_vm3, %v1187_v4, %v4625_v56 }
 0x4ad   :  { %v1402_v18 = vpack.c.bf16 %v1338_v23, %v1334_v3  ;;  %v1189_v20 = vpop.permute.xlu1 %1188  ;;  %v1405_v12 = vpack.c.bf16 %v1341_v5, %v1337_v2  ;;  %v1343_v24 = vmul.f32 %v1202_v57, %v3787_v39  ;;  %v1344_v5 = vmul.f32 %v1200_v8, %v3796_v47 }
 0x4ae   :  { %v1203_v9 = vsel %vm311_vm3, %v4623_v58, %v1189_v20  ;;  %v1201_v22 = vsel %vm311_vm3, %v1189_v20, %v4627_v7  ;;  %v1363_v8 = vmul.f32 %v4539_v1, %v3835_v38 }
 0x4af   :  { %v1347_v26 = vmul.f32 %v1203_v9, %v3787_v39  ;;  %v1195_v28 = vpop.permute.xlu0 %1194  ;;  %1458 = vmatpush1.bf16.msra.mxu0 %v1402_v18  ;;  %1508 = vmatprep.subr.bf16.mxu1 %v1405_v12  ;;  %v1348_v55 = vmul.f32 %v1201_v22, %v3796_v47 }
 0x4b0   :  { %v1198_v0 = vsel %vm311_vm3, %v4625_v56, %v1195_v28  ;;  %v1204_v6 = vsel %vm311_vm3, %v1195_v28, %v4621_v17  ;;  %1509 = vmatpush1.bf16.msra.mxu1 %v1404_v25 }
 0x4b1   :  { %v1197_v19 = vpop.permute.xlu1 %1196  ;;  %v1407_v61 = vpack.c.bf16 %v1347_v26, %v1343_v24  ;;  %v1342_v3 = vmul.f32 %v1204_v6, %v3803_v53  ;;  %v1345_v17 = vmul.f32 %v1198_v0, %v3806_v54  ;;  %v1359_v6 = vmul.f32 %v4536_v59, %v3835_v38 }
 0x4b2   :  { %v1199_v31 = vsel %vm311_vm3, %v4627_v7, %v1197_v19  ;;  %v1205_v41 = vsel %vm311_vm3, %v1197_v19, %v4623_v58  ;;  %v1408_v58 = vpack.c.bf16 %v1348_v55, %v1344_v5 }
 0x4b3   :  { %v1346_v2 = vmul.f32 %v1205_v41, %v3803_v53  ;;  %v1349_v56 = vmul.f32 %v1199_v31, %v3806_v54  ;;  %v1211_v23 = vpop.permute.xlu0 %1210  ;;  %1459 = vmatprep.subr.bf16.mxu0 %v1407_v61 }
 0x4b4   :  { %v1226_v7 = vsel %vm336_vm4, %v4629_v36, %v1211_v23  ;;  %v1224_v26 = vsel %vm336_vm4, %v1211_v23, %v4633_v40 }
 0x4b5   :  { %v1406_v4 = vpack.c.bf16 %v1346_v2, %v1342_v3  ;;  %v1213_v51 = vpop.permute.xlu1 %1212  ;;  %v1409_v57 = vpack.c.bf16 %v1349_v56, %v1345_v17  ;;  %v1351_v20 = vmul.f32 %v1226_v7, %v3825_v27  ;;  %v1352_v3 = vmul.f32 %v1224_v26, %v3841_v42 }
 0x4b6   :  { %v1227_v18 = vsel %vm336_vm4, %v4631_v15, %v1213_v51  ;;  %v1225_v12 = vsel %vm336_vm4, %v1213_v51, %v4635_v35  ;;  %v1415_v56 = vpack.c.bf16 %v1363_v8, %v1359_v6  ;;  %v6570_v8 = vpack.c.bf16 %v4495_v43, %v4492_v21  ;;  %v6577_v43 = vld [vmem:[#allocation34_spill] sm:$0xff] }
 0x4b7   :  { %v1355_v25 = vmul.f32 %v1227_v18, %v3825_v27  ;;  %v1219_v9 = vpop.permute.xlu0 %1218  ;;  %1460 = vmatpush1.bf16.msra.mxu0 %v1406_v4  ;;  %1510 = vmatprep.subr.bf16.mxu1 %v1409_v57  ;;  %v1356_v19 = vmul.f32 %v1225_v12, %v3841_v42 }
 0x4b8   :  { %v1222_v24 = vsel %vm336_vm4, %v4633_v40, %v1219_v9  ;;  %v1228_v22 = vsel %vm336_vm4, %v1219_v9, %v4629_v36  ;;  %1511 = vmatpush1.bf16.msra.mxu1 %v1408_v58  ;;  %v1365_v40 = vmul.f32 %v4547_v34, %v3844_v45 }
 0x4b9   :  { %v1221_v28 = vpop.permute.xlu1 %1220  ;;  %v1411_v0 = vpack.c.bf16 %v1355_v25, %v1351_v20  ;;  %v1350_v55 = vmul.f32 %v1228_v22, %v3851_v49  ;;  %v1353_v59 = vmul.f32 %v1222_v24, %v3854_v50  ;;  %v1412_v23 = vpack.c.bf16 %v1356_v19, %v1352_v3  ;;  %v6571_v19 = vld [vmem:[#allocation36_spill] sm:$0xff]  ;;  %v6576_v3 = vld [vmem:[#allocation18_spill] sm:$0xff] }
 0x4ba   :  { %v1223_v61 = vsel %vm336_vm4, %v4635_v35, %v1221_v28  ;;  %v1229_v36 = vsel %vm336_vm4, %v1221_v28, %v4631_v15  ;;  %v1361_v15 = vmul.f32 %v4543_v48, %v3844_v45 }
 0x4bb   :  { %v1354_v31 = vmul.f32 %v1229_v36, %v3851_v49  ;;  %v1357_v1 = vmul.f32 %v1223_v61, %v3854_v50  ;;  %v1235_v41 = vpop.permute.xlu0 %1234  ;;  %1461 = vmatprep.subr.bf16.mxu0 %v1411_v0  ;;  %v6572_v61 = vld [vmem:[#allocation32_spill] sm:$0xff]  ;;  %v6573_v36 = vld [vmem:[#allocation33_spill] sm:$0xff] }
 0x4bc   :  { %v1248_v35 = vsel %vm361_vm5, %v1235_v41, %v4641_v46  ;;  %v1417_v4 = vpack.c.bf16 %v1365_v40, %v1361_v15  ;;  %v1250_v51 = vsel %vm361_vm5, %v4637_v16, %v1235_v41  ;;  %v6574_v40 = vld [vmem:[#allocation35_spill] sm:$0xff] }
 0x4bd   :  { %v1410_v34 = vpack.c.bf16 %v1354_v31, %v1350_v55  ;;  %v1237_v17 = vpop.permute.xlu1 %1236  ;;  %v1413_v2 = vpack.c.bf16 %v1357_v1, %v1353_v59  ;;  %v1367_v48 = vmul.f32 %v1248_v35, %v3899_v44  ;;  %v1366_v24 = vmul.f32 %v1250_v51, %v3892_v37  ;;  %v6578_v15 = vld [vmem:[#allocation31_spill] sm:$0xff] }
 0x4be   :  { %v1249_v5 = vsel %vm361_vm5, %v1237_v17, %v4643_v14  ;;  %v1251_v7 = vsel %vm361_vm5, %v4639_v30, %v1237_v17  ;;  %v6575_v55 = vpack.c.bf16 %v6573_v36, %v6574_v40  ;;  %v6579_v17 = vld [vmem:[#allocation19_spill] sm:$0xff]  ;;  %v6586_v40 = vld [vmem:[#allocation22_spill] sm:$0xff] }
 0x4bf   :  { %v1371_v57 = vmul.f32 %v1249_v5, %v3899_v44  ;;  %v1243_v58 = vpop.permute.xlu0 %1242  ;;  %1462 = vmatpush1.bf16.msra.mxu0 %v1410_v34  ;;  %1512 = vmatprep.subr.bf16.mxu1 %v1413_v2  ;;  %v1370_v12 = vmul.f32 %v1251_v7, %v3892_v37 }
 0x4c0   :  { %v1246_v18 = vsel %vm361_vm5, %v4641_v46, %v1243_v58  ;;  %v1252_v20 = vsel %vm361_vm5, %v1243_v58, %v4637_v16  ;;  %1463 = vmatprep.subr.bf16.mxu0 %v1415_v56  ;;  %1513 = vmatpush1.bf16.msra.mxu1 %v1412_v23 }
 0x4c1   :  { %1514 = vmatprep.subr.bf16.mxu1 %v1417_v4  ;;  %v1245_v25 = vpop.permute.xlu1 %1244  ;;  %v1419_v9 = vpack.c.bf16 %v1371_v57, %v1367_v48  ;;  %v1368_v26 = vmul.f32 %v1246_v18, %v3910_v62  ;;  %v1369_v16 = vmul.f32 %v1252_v20, %v3913_v63  ;;  %v1418_v59 = vpack.c.bf16 %v1370_v12, %v1366_v24  ;;  %v6580_v20 = vld [vmem:[#allocation20_spill] sm:$0xff] }
 0x4c2   :  { %v1247_v22 = vsel %vm361_vm5, %v4643_v14, %v1245_v25  ;;  %v1253_v46 = vsel %vm361_vm5, %v1245_v25, %v4639_v30  ;;  %v6581_v25 = vld [vmem:[#allocation21_spill] sm:$0xff] }
 0x4c3   :  { %v1372_v28 = vmul.f32 %v1247_v22, %v3910_v62  ;;  %v1373_v0 = vmul.f32 %v1253_v46, %v3913_v63  ;;  %v1259_v6 = vpop.permute.xlu0 %1258  ;;  %1464 = vmatpush1.bf16.msra.mxu0 %v6570_v8 }
 0x4c4   :  { %v1272_v14 = vsel %vm386_vm6, %v1259_v6, %v6571_v19  ;;  %v1274_v30 = vsel %vm386_vm6, %v6572_v61, %v1259_v6  ;;  %1465 = vmatprep.subr.bf16.mxu0 %v1419_v9  ;;  %1515 = vmatpush1.bf16.msra.mxu1 %v6575_v55 }
 0x4c5   :  { %v1420_v31 = vpack.c.bf16 %v1372_v28, %v1368_v26  ;;  %v1261_v1 = vpop.permute.xlu1 %1260  ;;  %v1421_v41 = vpack.c.bf16 %v1373_v0, %v1369_v16  ;;  %v1374_v21 = vmul.f32 %v1274_v30, %v6576_v3  ;;  %v1375_v2 = vmul.f32 %v1272_v14, %v6579_v17  ;;  %v6582_v26 = vld [vmem:[#allocation40_spill] sm:$0xff]  ;;  %v6583_v28 = vld [vmem:[#allocation39_spill] sm:$0xff]  ;;  %v6584_v14 = vld [vmem:[#allocation38_spill] sm:$0xff] }
 0x4c6   :  { %v1273_v35 = vsel %vm386_vm6, %v1261_v1, %v6577_v43  ;;  %v1275_v34 = vsel %vm386_vm6, %v6578_v15, %v1261_v1  ;;  %v6585_v30 = vld [vmem:[#allocation37_spill] sm:$0xff] }
 0x4c7   :  { %v1378_v56 = vmul.f32 %v1275_v34, %v6576_v3  ;;  %v1379_v23 = vmul.f32 %v1273_v35, %v6579_v17  ;;  %v1267_v5 = vpop.permute.xlu0 %1266  ;;  %1466 = vmatpush1.bf16.msra.mxu0 %v1418_v59  ;;  %1516 = vmatprep.subr.bf16.mxu1 %v1421_v41  ;;  %v6587_v59 = vld [vmem:[#allocation23_spill] sm:$0xff] }
 0x4c8   :  { %v1270_v7 = vsel %vm386_vm6, %v6571_v19, %v1267_v5  ;;  %v1276_v4 = vsel %vm386_vm6, %v1267_v5, %v6572_v61  ;;  %1517 = vmatpush1.bf16.msra.mxu1 %v1420_v31  ;;  %v6588_v5 = vld [vmem:[#allocation24_spill] sm:$0xff] }
 0x4c9   :  { %v1422_v51 = vpack.c.bf16 %v1378_v56, %v1374_v21  ;;  %v1269_v48 = vpop.permute.xlu1 %1268  ;;  %v1423_v57 = vpack.c.bf16 %v1379_v23, %v1375_v2  ;;  %v1376_v12 = vmul.f32 %v1270_v7, %v6580_v20  ;;  %v1377_v9 = vmul.f32 %v1276_v4, %v6581_v25  ;;  %v6589_v4 = vld [vmem:[#allocation25_spill] sm:$0xff] }
 0x4ca   :  { %v1271_v58 = vsel %vm386_vm6, %v6577_v43, %v1269_v48  ;;  %v1277_v18 = vsel %vm386_vm6, %v1269_v48, %v6578_v15 }
 0x4cb   :  { %v1380_v24 = vmul.f32 %v1271_v58, %v6580_v20  ;;  %v1381_v22 = vmul.f32 %v1277_v18, %v6581_v25  ;;  %v1283_v46 = vpop.permute.xlu0 %1282  ;;  %1467 = vmatprep.subr.bf16.mxu0 %v1423_v57  ;;  %v6590_v18 = vld [vmem:[#allocation44_spill] sm:$0xff] }
 0x4cc   :  { %v1296_v16 = vsel %vm411_vm7, %v1283_v46, %v6582_v26  ;;  %v1298_v0 = vsel %vm411_vm7, %v6583_v28, %v1283_v46  ;;  %1468 = vmatpush1.bf16.msra.mxu0 %v1422_v51 }
 0x4cd   :  { %v1424_v6 = vpack.c.bf16 %v1380_v24, %v1376_v12  ;;  %v1285_v8 = vpop.permute.xlu1 %1284  ;;  %v1425_v19 = vpack.c.bf16 %v1381_v22, %v1377_v9  ;;  %v1382_v55 = vmul.f32 %v1298_v0, %v6586_v40  ;;  %v1383_v31 = vmul.f32 %v1296_v16, %v6587_v59  ;;  %v6591_v9 = vld [vmem:[#allocation43_spill] sm:$0xff]  ;;  %v6592_v16 = vld [vmem:[#allocation42_spill] sm:$0xff]  ;;  %v6593_v0 = vld [vmem:[#allocation41_spill] sm:$0xff] }
 0x4ce   :  { %v1297_v61 = vsel %vm411_vm7, %v1285_v8, %v6584_v14  ;;  %v1299_v36 = vsel %vm411_vm7, %v6585_v30, %v1285_v8  ;;  %v4911_v8 = vld [vmem:[#allocation5 + $0x20] ss:$0 sm:$0xff] }
 0x4cf   :  { %v1386_v1 = vmul.f32 %v1299_v36, %v6586_v40  ;;  %v1387_v41 = vmul.f32 %v1297_v61, %v6587_v59  ;;  %v1291_v21 = vpop.permute.xlu0 %1290  ;;  %1518 = vmatprep.subr.bf16.mxu1 %v1425_v19  ;;  %6594 = vst [vmem:[#allocation26_spill] sm:$0xff] %v4911_v8 }
 0x4d0   :  { %v1294_v43 = vsel %vm411_vm7, %v6582_v26, %v1291_v21  ;;  %v1300_v35 = vsel %vm411_vm7, %v1291_v21, %v6583_v28  ;;  %1519 = vmatpush1.bf16.msra.mxu1 %v1424_v6 }
 0x4d1   :  { %v1426_v15 = vpack.c.bf16 %v1386_v1, %v1382_v55  ;;  %v1293_v34 = vpop.permute.xlu1 %1292  ;;  %v1427_v2 = vpack.c.bf16 %v1387_v41, %v1383_v31  ;;  %v1384_v7 = vmul.f32 %v1294_v43, %v6588_v5  ;;  %v1385_v51 = vmul.f32 %v1300_v35, %v6589_v4 }
 0x4d2   :  { %v1295_v56 = vsel %vm411_vm7, %v6584_v14, %v1293_v34  ;;  %v1301_v23 = vsel %vm411_vm7, %v1293_v34, %v6585_v30  ;;  %v4914_v14 = vld [vmem:[#allocation5 + $0x28] ss:$0 sm:$0xff]  ;;  %v4931_v34 = vld [vmem:[#allocation5 + $0x30] ss:$0 sm:$0xff] }
 0x4d3   :  { %v1388_v48 = vmul.f32 %v1295_v56, %v6588_v5  ;;  %v1389_v57 = vmul.f32 %v1301_v23, %v6589_v4  ;;  %v1307_v58 = vpop.permute.xlu0 %1306  ;;  %1469 = vmatprep.subr.bf16.mxu0 %v1427_v2  ;;  %6595 = vst [vmem:[#allocation27_spill] sm:$0xff] %v4914_v14  ;;  %6596 = vst [vmem:[#allocation28_spill] sm:$0xff] %v4931_v34  ;;  %v4934_v56 = vld [vmem:[#allocation5 + $0x38] ss:$0 sm:$0xff] }
 0x4d4   :  { %v1320_v12 = vsel %vm436_vm8, %v1307_v58, %v6590_v18  ;;  %v1322_v24 = vsel %vm436_vm8, %v6591_v9, %v1307_v58  ;;  %1470 = vmatpush1.bf16.msra.mxu0 %v1426_v15  ;;  %6597 = vst [vmem:[#allocation29_spill] sm:$0xff] %v4934_v56 }
 0x4d5   :  { %v1428_v22 = vpack.c.bf16 %v1388_v48, %v1384_v7  ;;  %v1309_v46 = vpop.permute.xlu1 %1308  ;;  %v1429_v26 = vpack.c.bf16 %v1389_v57, %v1385_v51  ;;  %v1390_v19 = vmul.f32 %v4911_v8, %v1322_v24  ;;  %v1391_v61 = vmul.f32 %v4914_v14, %v1320_v12  ;;  %v6598_v57 = vld [vmem:[#allocation30_spill] sm:$0xff] }
 0x4d6   :  { %v1321_v28 = vsel %vm436_vm8, %v1309_v46, %v6592_v16  ;;  %v1323_v6 = vsel %vm436_vm8, %v6593_v0, %v1309_v46 }
 0x4d7   :  { %v1394_v30 = vmul.f32 %v4911_v8, %v1323_v6  ;;  %v1395_v36 = vmul.f32 %v4914_v14, %v1321_v28  ;;  %v1315_v55 = vpop.permute.xlu0 %1314  ;;  %1520 = vmatprep.subr.bf16.mxu1 %v1429_v26  ;;  %v6599_v6 = vld [vmem:[#allocation16_spill] sm:$0xff] }
 0x4d8   :  { %v1318_v31 = vsel %vm436_vm8, %v6590_v18, %v1315_v55  ;;  %v1324_v1 = vsel %vm436_vm8, %v1315_v55, %v6591_v9  ;;  %1521 = vmatpush1.bf16.msra.mxu1 %v1428_v22  ;;  %v3279_v18 = vld [vmem:[#allocation8 + $0x18] ss:$8 sps:$4 sm:$0xff]  }
 0x4d9   :  { %v1430_v41 = vpack.c.bf16 %v1394_v30, %v1390_v19  ;;  %v1317_v21 = vpop.permute.xlu1 %1316  ;;  %v1431_v43 = vpack.c.bf16 %v1395_v36, %v1391_v61  ;;  %v1392_v2 = vmul.f32 %v4931_v34, %v1318_v31  ;;  %v1393_v23 = vmul.f32 %v4934_v56, %v1324_v1  ;;  %v6600_v1 = vld [vmem:[#allocation17_spill] sm:$0xff] }
 0x4da   :  { %v1319_v35 = vsel %vm436_vm8, %v6592_v16, %v1317_v21  ;;  %v1325_v15 = vsel %vm436_vm8, %v1317_v21, %v6593_v0 }
 0x4db   :  { %v1396_v7 = vmul.f32 %v4931_v34, %v1319_v35  ;;  %v1397_v51 = vmul.f32 %v4934_v56, %v1325_v15  ;;  %1471 = vmatprep.subr.bf16.mxu0 %v1431_v43 }
 0x4dc   :  { %1472 = vmatpush1.bf16.msra.mxu0 %v1430_v41 }
 0x4dd   :  { %v1432_v48 = vpack.c.bf16 %v1396_v7, %v1392_v2  ;;  %1473 = vmatprep.subr.bf16.mxu0 %v6598_v57  ;;  %v1433_v58 = vpack.c.bf16 %v1397_v51, %v1393_v23  ;;  %v1133_v7 = vld [vmem:[#allocation8 + $0x28] sm:$0xff] }
 0x4de   :  { %v3167_v51 = vcombine.high %v1133_v7, %v1133_v7 }
 0x4df   :  { %1522 = vmatprep.subr.bf16.mxu1 %v1433_v58 }
 0x4e0   :  { %1474 = vmatpush1.bf16.msra.mxu0 %v6598_v57  ;;  %1523 = vmatpush1.bf16.msra.mxu1 %v1432_v48  ;;  %v3166_v48 = vcombine.low %v1133_v7, %v1133_v7 }
 0x4e1   :  { %1524 = vmatprep.subr.bf16.mxu1 %v6598_v57 }
 0x4e3   :  { %1488 = vmatmul.mubr.bf16.vlgmr.msra.gmra.mrb[12].mxu0 %v3279_v18 }
 0x4e4   :  { %1525 = vmatpush1.bf16.msra.mxu1 %v6598_v57  ;;  %3169 = vmatprep.mubr.msk.bf16.mxu0 %vm569_vm1, %v3167_v51 }
 0x4e7   :  { %1539 = vmatmul.mubr.bf16.vlgmr.msra.gmra.mrb[12].mxu1 %v3279_v18 }
 0x4e8   :  { %3171 = vmatprep.mubr.msk.bf16.mxu1 %vm569_vm1, %v3167_v51 }
 0x4eb   :  { %1498 = vmatmul.mubr.bf16.gmra.mrb[4].mxu0 %v3166_v48 }
 0x4ef   :  { %1549 = vmatmul.mubr.bf16.gmra.mrb[4].mxu1 %v3166_v48 }
 0x5b6   :  { %v1489_v12 = vpop.f32.mrb[12].mxu0 }
 0x5b7   :  { %v1557_v9 = vmax.f32 %v1489_v12, 0.0  ;;  %v1491_v24 = vpop.f32.mrb[13].mxu0 }
 0x5b8   :  { %v1493_v22 = vpop.f32.mrb[14].mxu0  ;;  %v4990_v35 = vmax.f32 %v1491_v24, 0.0 }
 0x5b9   :  { %v1561_v46 = vmax.f32 %v1493_v22, 0.0  ;;  %1573 = vrot.lane.b32.xlu0 %v1557_v9, %s3442_s23  ;;  %v1495_v26 = vpop.f32.mrb[15].mxu0  ;;  %v4946_v19 = vmul.f32 %v1557_v9, %v6599_v6 }
 0x5ba   :  { %v1540_v16 = vpop.f32.mrb[12].mxu1  ;;  %v4993_v15 = vmax.f32 %v1495_v26, 0.0 }
 0x5bb   :  { %v1559_v28 = vmax.f32 %v1540_v16, 0.0  ;;  %v1542_v0 = vpop.f32.mrb[13].mxu1  ;;  %1575 = vrot.lane.b32.xlu1 %v1561_v46, %s3442_s23  ;;  %v4949_v61 = vmul.f32 %v1561_v46, %v6599_v6 }
 0x5bc   :  { %v1544_v30 = vpop.f32.mrb[14].mxu1  ;;  %v4997_v2 = vmax.f32 %v1542_v0, 0.0 }
 0x5bd   :  { %v1563_v36 = vmax.f32 %v1544_v30, 0.0  ;;  %v1546_v55 = vpop.f32.mrb[15].mxu1  ;;  %1581 = vrot.lane.b32.xlu0 %v1559_v28, %s3442_s23  ;;  %v4956_v41 = vmul.f32 %v1559_v28, %v6600_v1 }
 0x5be   :  { %v5001_v23 = vmax.f32 %v1546_v55, 0.0 }
 0x5bf   :  { %1583 = vrot.lane.b32.xlu1 %v1563_v36, %s3442_s23  ;;  %6601 = vst [vmem:[#allocation36_spill] sm:$0xff] %v4956_v41  ;;  %v4959_v21 = vmul.f32 %v1563_v36, %v6600_v1 }
 0x5c1   :  { %6602 = vst [vmem:[#allocation32_spill] sm:$0xff] %v4959_v21  ;;  %1597 = vrot.lane.b32.xlu0 %v1557_v9, %s3443_s3 }
 0x5c3   :  { %1599 = vrot.lane.b32.xlu1 %v1561_v46, %s3443_s3 }
 0x5c5   :  { %1605 = vrot.lane.b32.xlu0 %v1559_v28, %s3443_s3 }
 0x5c7   :  { %1607 = vrot.lane.b32.xlu1 %v1563_v36, %s3443_s3 }
 0x5c9   :  { %1621 = vrot.lane.b32.xlu0 %v1557_v9, %s3444_s25 }
 0x5cb   :  { %1623 = vrot.lane.b32.xlu1 %v1561_v46, %s3444_s25 }
 0x5cd   :  { %1629 = vrot.lane.b32.xlu0 %v1559_v28, %s3444_s25 }
 0x5cf   :  { %1631 = vrot.lane.b32.xlu1 %v1563_v36, %s3444_s25 }
 0x5d1   :  { %1645 = vrot.lane.b32.xlu0 %v1557_v9, %s3445_s26 }
 0x5d3   :  { %1647 = vrot.lane.b32.xlu1 %v1561_v46, %s3445_s26 }
 0x5d5   :  { %1653 = vrot.lane.b32.xlu0 %v1559_v28, %s3445_s26 }
 0x5d7   :  { %1655 = vrot.lane.b32.xlu1 %v1563_v36, %s3445_s26 }
 0x5d9   :  { %1669 = vrot.lane.b32.xlu0 %v1557_v9, %s3446_s27 }
 0x5db   :  { %1671 = vrot.lane.b32.xlu1 %v1561_v46, %s3446_s27 }
 0x5dd   :  { %1677 = vrot.lane.b32.xlu0 %v1559_v28, %s3446_s27 }
 0x5df   :  { %1679 = vrot.lane.b32.xlu1 %v1563_v36, %s3446_s27 }
 0x5e1   :  { %1693 = vrot.lane.b32.xlu0 %v1557_v9, %s3447_s28 }
 0x5e3   :  { %1695 = vrot.lane.b32.xlu1 %v1561_v46, %s3447_s28 }
 0x5e5   :  { %1701 = vrot.lane.b32.xlu0 %v1559_v28, %s3447_s28 }
 0x5e7   :  { %1703 = vrot.lane.b32.xlu1 %v1563_v36, %s3447_s28 }
 0x5e9   :  { %1717 = vrot.lane.b32.xlu0 %v1557_v9, %s3448_s29 }
 0x5eb   :  { %1719 = vrot.lane.b32.xlu1 %v1561_v46, %s3448_s29 }
 0x5ed   :  { %1725 = vrot.lane.b32.xlu0 %v1559_v28, %s3448_s29 }
 0x5ef   :  { %1727 = vrot.lane.b32.xlu1 %v1563_v36, %s3448_s29 }
 0x5f1   :  { %1741 = vrot.lane.b32.xlu0 %v1557_v9, %s3449_s30  ;;  %v3286_v9 = vld [vmem:[#allocation8 + $0x34] ss:$8 sps:$4 sm:$0xff]  }
 0x5f2   :  { %3176 = vmatprep.mubr.msk.bf16.mxu0 %vm569_vm1, %v3286_v9  ;;  %3178 = vmatprep.mubr.msk.bf16.mxu1 %vm569_vm1, %v3286_v9 }
 0x5f3   :  { %1743 = vrot.lane.b32.xlu1 %v1561_v46, %s3449_s30 }
 0x5f5   :  { %1749 = vrot.lane.b32.xlu0 %v1559_v28, %s3449_s30 }
 0x5f7   :  { %1751 = vrot.lane.b32.xlu1 %v1563_v36, %s3449_s30 }
 0x5f9   :  { %1577 = vrot.lane.b32.xlu0 %v4990_v35, %s3442_s23 }
 0x5fb   :  { %1579 = vrot.lane.b32.xlu1 %v4993_v15, %s3442_s23 }
 0x5fd   :  { %1585 = vrot.lane.b32.xlu0 %v4997_v2, %s3442_s23 }
 0x5ff   :  { %1587 = vrot.lane.b32.xlu1 %v5001_v23, %s3442_s23 }
 0x601   :  { %1601 = vrot.lane.b32.xlu0 %v4990_v35, %s3443_s3 }
 0x603   :  { %1603 = vrot.lane.b32.xlu1 %v4993_v15, %s3443_s3 }
 0x605   :  { %1609 = vrot.lane.b32.xlu0 %v4997_v2, %s3443_s3 }
 0x607   :  { %1611 = vrot.lane.b32.xlu1 %v5001_v23, %s3443_s3 }
 0x609   :  { %1625 = vrot.lane.b32.xlu0 %v4990_v35, %s3444_s25 }
 0x60b   :  { %1627 = vrot.lane.b32.xlu1 %v4993_v15, %s3444_s25 }
 0x60d   :  { %1633 = vrot.lane.b32.xlu0 %v4997_v2, %s3444_s25 }
 0x60f   :  { %1635 = vrot.lane.b32.xlu1 %v5001_v23, %s3444_s25 }
 0x611   :  { %1649 = vrot.lane.b32.xlu0 %v4990_v35, %s3445_s26 }
 0x613   :  { %1651 = vrot.lane.b32.xlu1 %v4993_v15, %s3445_s26 }
 0x615   :  { %1657 = vrot.lane.b32.xlu0 %v4997_v2, %s3445_s26 }
 0x617   :  { %1659 = vrot.lane.b32.xlu1 %v5001_v23, %s3445_s26 }
 0x619   :  { %1673 = vrot.lane.b32.xlu0 %v4990_v35, %s3446_s27 }
 0x61b   :  { %1675 = vrot.lane.b32.xlu1 %v4993_v15, %s3446_s27 }
 0x61d   :  { %1681 = vrot.lane.b32.xlu0 %v4997_v2, %s3446_s27 }
 0x61f   :  { %1683 = vrot.lane.b32.xlu1 %v5001_v23, %s3446_s27 }
 0x621   :  { %1697 = vrot.lane.b32.xlu0 %v4990_v35, %s3447_s28 }
 0x623   :  { %1699 = vrot.lane.b32.xlu1 %v4993_v15, %s3447_s28 }
 0x625   :  { %1705 = vrot.lane.b32.xlu0 %v4997_v2, %s3447_s28 }
 0x627   :  { %1707 = vrot.lane.b32.xlu1 %v5001_v23, %s3447_s28 }
 0x629   :  { %1721 = vrot.lane.b32.xlu0 %v4990_v35, %s3448_s29 }
 0x62b   :  { %v1574_v58 = vpop.permute.xlu0 %1573  ;;  %1723 = vrot.lane.b32.xlu1 %v4993_v15, %s3448_s29 }
 0x62d   :  { %1729 = vrot.lane.b32.xlu0 %v4997_v2, %s3448_s29  ;;  %v1576_v18 = vpop.permute.xlu1 %1575 }
 0x62f   :  { %v1582_v12 = vpop.permute.xlu0 %1581  ;;  %1731 = vrot.lane.b32.xlu1 %v5001_v23, %s3448_s29 }
 0x631   :  { %1745 = vrot.lane.b32.xlu0 %v4990_v35, %s3449_s30  ;;  %v1584_v24 = vpop.permute.xlu1 %1583 }
 0x633   :  { %v5061_v22 = vpop.permute.xlu0 %1597  ;;  %1747 = vrot.lane.b32.xlu1 %v4993_v15, %s3449_s30 }
 0x635   :  { %1753 = vrot.lane.b32.xlu0 %v4997_v2, %s3449_s30  ;;  %v5067_v46 = vpop.permute.xlu1 %1599 }
 0x637   :  { %v5069_v26 = vpop.permute.xlu0 %1605  ;;  %1755 = vrot.lane.b32.xlu1 %v5001_v23, %s3449_s30 }
 0x639   :  { %v5073_v16 = vpop.permute.xlu1 %1607 }
 0x63b   :  { %v5075_v28 = vpop.permute.xlu0 %1621 }
 0x63d   :  { %v5077_v0 = vpop.permute.xlu1 %1623 }
 0x63f   :  { %v5079_v30 = vpop.permute.xlu0 %1629 }
 0x641   :  { %v5081_v36 = vpop.permute.xlu1 %1631 }
 0x643   :  { %v5083_v55 = vpop.permute.xlu0 %1645 }
 0x645   :  { %v5085_v7 = vpop.permute.xlu1 %1647 }
 0x647   :  { %v5087_v51 = vpop.permute.xlu0 %1653 }
 0x649   :  { %v5089_v48 = vpop.permute.xlu1 %1655 }
 0x64b   :  { %v5091_v9 = vpop.permute.xlu0 %1669 }
 0x64d   :  { %v5093_v43 = vpop.permute.xlu1 %1671 }
 0x64f   :  { %v5095_v31 = vpop.permute.xlu0 %1677 }
 0x651   :  { %v5097_v1 = vpop.permute.xlu1 %1679 }
 0x653   :  { %v5099_v6 = vpop.permute.xlu0 %1693 }
 0x654   :  { %6603 = vst [vmem:[#allocation33_spill] sm:$0xff] %v5099_v6 }
 0x655   :  { %v5101_v57 = vpop.permute.xlu1 %1695 }
 0x656   :  { %6604 = vst [vmem:[#allocation35_spill] sm:$0xff] %v5101_v57 }
 0x657   :  { %v5103_v56 = vpop.permute.xlu0 %1701 }
 0x658   :  { %6605 = vst [vmem:[#allocation34_spill] sm:$0xff] %v5103_v56 }
 0x659   :  { %v5105_v34 = vpop.permute.xlu1 %1703 }
 0x65a   :  { %6606 = vst [vmem:[#allocation31_spill] sm:$0xff] %v5105_v34 }
 0x65b   :  { %v5107_v14 = vpop.permute.xlu0 %1717 }
 0x65c   :  { %6607 = vst [vmem:[#allocation40_spill] sm:$0xff] %v5107_v14  ;;  %v6615_v14 = vld [vmem:[#allocation15_spill] sm:$0xff] }
 0x65d   :  { %v5109_v8 = vpop.permute.xlu1 %1719 }
 0x65e   :  { %6608 = vst [vmem:[#allocation39_spill] sm:$0xff] %v5109_v8 }
 0x65f   :  { %v5111_v4 = vpop.permute.xlu0 %1725 }
 0x660   :  { %6609 = vst [vmem:[#allocation38_spill] sm:$0xff] %v5111_v4 }
 0x661   :  { %v5113_v5 = vpop.permute.xlu1 %1727 }
 0x662   :  { %6610 = vst [vmem:[#allocation37_spill] sm:$0xff] %v5113_v5 }
 0x663   :  { %v5115_v59 = vpop.permute.xlu0 %1741 }
 0x664   :  { %6611 = vst [vmem:[#allocation44_spill] sm:$0xff] %v5115_v59 }
 0x665   :  { %v5117_v40 = vpop.permute.xlu1 %1743 }
 0x666   :  { %6612 = vst [vmem:[#allocation43_spill] sm:$0xff] %v5117_v40 }
 0x667   :  { %v5119_v25 = vpop.permute.xlu0 %1749 }
 0x668   :  { %6613 = vst [vmem:[#allocation42_spill] sm:$0xff] %v5119_v25 }
 0x669   :  { %v5121_v20 = vpop.permute.xlu1 %1751 }
 0x66a   :  { %6614 = vst [vmem:[#allocation41_spill] sm:$0xff] %v5121_v20 }
 0x66b   :  { %v1578_v17 = vpop.permute.xlu0 %1577 }
 0x66c   :  { %v1593_v57 = vsel %vm261_vm0, %v1574_v58, %v1578_v17  ;;  %v1591_v3 = vsel %vm261_vm0, %v1578_v17, %v1582_v12 }
 0x66d   :  { %v1580_v34 = vpop.permute.xlu1 %1579  ;;  %v1766_v4 = vmul.f32 %v1593_v57, %v6615_v14  ;;  %v1767_v17 = vmul.f32 %v1591_v3, %v3716_v29 }
 0x66e   :  { %v1594_v8 = vsel %vm261_vm0, %v1576_v18, %v1580_v34  ;;  %v1592_v5 = vsel %vm261_vm0, %v1580_v34, %v1584_v24 }
 0x66f   :  { %v1770_v59 = vmul.f32 %v1594_v8, %v6615_v14  ;;  %v1586_v40 = vpop.permute.xlu0 %1585  ;;  %v1771_v6 = vmul.f32 %v1592_v5, %v3716_v29 }
 0x670   :  { %v1589_v25 = vsel %vm261_vm0, %v1582_v12, %v1586_v40  ;;  %v1595_v20 = vsel %vm261_vm0, %v1586_v40, %v1574_v58 }
 0x671   :  { %v1588_v41 = vpop.permute.xlu1 %1587  ;;  %v1838_v21 = vpack.c.bf16 %v1770_v59, %v1766_v4  ;;  %v1765_v34 = vmul.f32 %v1595_v20, %v3727_v32  ;;  %v1768_v14 = vmul.f32 %v1589_v25, %v3730_v33 }
 0x672   :  { %v1590_v57 = vsel %vm261_vm0, %v1584_v24, %v1588_v41  ;;  %v1596_v8 = vsel %vm261_vm0, %v1588_v41, %v1576_v18  ;;  %v1839_v41 = vpack.c.bf16 %v1771_v6, %v1767_v17 }
 0x673   :  { %v1769_v56 = vmul.f32 %v1596_v8, %v3727_v32  ;;  %v1772_v40 = vmul.f32 %v1590_v57, %v3730_v33  ;;  %v1602_v58 = vpop.permute.xlu0 %1601  ;;  %1894 = vmatprep.subr.bf16.mxu0 %v1838_v21 }
 0x674   :  { %v1617_v59 = vsel %vm286_vm2, %v5061_v22, %v1602_v58  ;;  %v1615_v6 = vsel %vm286_vm2, %v1602_v58, %v5069_v26 }
 0x675   :  { %v1837_v5 = vpack.c.bf16 %v1769_v56, %v1765_v34  ;;  %v1604_v4 = vpop.permute.xlu1 %1603  ;;  %v1840_v12 = vpack.c.bf16 %v1772_v40, %v1768_v14  ;;  %v1774_v25 = vmul.f32 %v1617_v59, %v3749_v52 }
 0x676   :  { %v1618_v20 = vsel %vm286_vm2, %v5067_v46, %v1604_v4  ;;  %v1616_v21 = vsel %vm286_vm2, %v1604_v4, %v5073_v16 }
 0x677   :  { %v1778_v3 = vmul.f32 %v1618_v20, %v3749_v52  ;;  %v1610_v18 = vpop.permute.xlu0 %1609  ;;  %1895 = vmatpush1.bf16.msra.mxu0 %v1837_v5  ;;  %1945 = vmatprep.subr.bf16.mxu1 %v1840_v12  ;;  %v1779_v8 = vmul.f32 %v1616_v21, %v3758_v60  ;;  %v1775_v5 = vmul.f32 %v1615_v6, %v3758_v60 }
 0x678   :  { %v1613_v14 = vsel %vm286_vm2, %v5069_v26, %v1610_v18  ;;  %v1619_v56 = vsel %vm286_vm2, %v1610_v18, %v5061_v22  ;;  %1946 = vmatpush1.bf16.msra.mxu1 %v1839_v41 }
 0x679   :  { %v1612_v24 = vpop.permute.xlu1 %1611  ;;  %v1842_v57 = vpack.c.bf16 %v1778_v3, %v1774_v25  ;;  %v1773_v17 = vmul.f32 %v1619_v56, %v3765_v11  ;;  %v1776_v22 = vmul.f32 %v1613_v14, %v3768_v13 }
 0x67a   :  { %v1614_v34 = vsel %vm286_vm2, %v5073_v16, %v1612_v24  ;;  %v1620_v40 = vsel %vm286_vm2, %v1612_v24, %v5067_v46  ;;  %v1843_v46 = vpack.c.bf16 %v1779_v8, %v1775_v5 }
 0x67b   :  { %v1777_v59 = vmul.f32 %v1620_v40, %v3765_v11  ;;  %v1780_v26 = vmul.f32 %v1614_v34, %v3768_v13  ;;  %v1626_v58 = vpop.permute.xlu0 %1625  ;;  %1896 = vmatprep.subr.bf16.mxu0 %v1842_v57 }
 0x67c   :  { %v1641_v16 = vsel %vm311_vm3, %v5075_v28, %v1626_v58  ;;  %v1639_v6 = vsel %vm311_vm3, %v1626_v58, %v5079_v30 }
 0x67d   :  { %v1841_v4 = vpack.c.bf16 %v1777_v59, %v1773_v17  ;;  %v1628_v12 = vpop.permute.xlu1 %1627  ;;  %v1844_v41 = vpack.c.bf16 %v1780_v26, %v1776_v22  ;;  %v1782_v25 = vmul.f32 %v1641_v16, %v3787_v39  ;;  %v1783_v26 = vmul.f32 %v1639_v6, %v3796_v47 }
 0x67e   :  { %v1642_v20 = vsel %vm311_vm3, %v5077_v0, %v1628_v12  ;;  %v1640_v21 = vsel %vm311_vm3, %v1628_v12, %v5081_v36  ;;  %v1802_v6 = vmul.f32 %v4993_v15, %v3835_v38 }
 0x67f   :  { %v1786_v3 = vmul.f32 %v1642_v20, %v3787_v39  ;;  %v1634_v18 = vpop.permute.xlu0 %1633  ;;  %1897 = vmatpush1.bf16.msra.mxu0 %v1841_v4  ;;  %1947 = vmatprep.subr.bf16.mxu1 %v1844_v41  ;;  %v1787_v8 = vmul.f32 %v1640_v21, %v3796_v47 }
 0x680   :  { %v1637_v14 = vsel %vm311_vm3, %v5079_v30, %v1634_v18  ;;  %v1643_v56 = vsel %vm311_vm3, %v1634_v18, %v5075_v28  ;;  %1948 = vmatpush1.bf16.msra.mxu1 %v1843_v46 }
 0x681   :  { %v1636_v24 = vpop.permute.xlu1 %1635  ;;  %v1846_v57 = vpack.c.bf16 %v1786_v3, %v1782_v25  ;;  %v1781_v17 = vmul.f32 %v1643_v56, %v3803_v53  ;;  %v1784_v28 = vmul.f32 %v1637_v14, %v3806_v54  ;;  %v1798_v56 = vmul.f32 %v4990_v35, %v3835_v38 }
 0x682   :  { %v1638_v34 = vsel %vm311_vm3, %v5081_v36, %v1636_v24  ;;  %v1644_v40 = vsel %vm311_vm3, %v1636_v24, %v5077_v0  ;;  %v1847_v0 = vpack.c.bf16 %v1787_v8, %v1783_v26 }
 0x683   :  { %v1785_v22 = vmul.f32 %v1644_v40, %v3803_v53  ;;  %v1788_v30 = vmul.f32 %v1638_v34, %v3806_v54  ;;  %v1650_v59 = vpop.permute.xlu0 %1649  ;;  %1898 = vmatprep.subr.bf16.mxu0 %v1846_v57 }
 0x684   :  { %v1665_v36 = vsel %vm336_vm4, %v5083_v55, %v1650_v59  ;;  %v1663_v3 = vsel %vm336_vm4, %v1650_v59, %v5087_v51 }
 0x685   :  { %v1845_v58 = vpack.c.bf16 %v1785_v22, %v1781_v17  ;;  %v1652_v5 = vpop.permute.xlu1 %1651  ;;  %v1848_v16 = vpack.c.bf16 %v1788_v30, %v1784_v28  ;;  %v1790_v12 = vmul.f32 %v1665_v36, %v3825_v27  ;;  %v1791_v17 = vmul.f32 %v1663_v3, %v3841_v42 }
 0x686   :  { %v1666_v4 = vsel %vm336_vm4, %v5085_v7, %v1652_v5  ;;  %v1664_v41 = vsel %vm336_vm4, %v1652_v5, %v5089_v48  ;;  %v1854_v30 = vpack.c.bf16 %v1802_v6, %v1798_v56  ;;  %v6616_v6 = vpack.c.bf16 %v4949_v61, %v4946_v19  ;;  %v6623_v61 = vld [vmem:[#allocation31_spill] sm:$0xff] }
 0x687   :  { %v1794_v46 = vmul.f32 %v1666_v4, %v3825_v27  ;;  %v1658_v20 = vpop.permute.xlu0 %1657  ;;  %1899 = vmatpush1.bf16.msra.mxu0 %v1845_v58  ;;  %1949 = vmatprep.subr.bf16.mxu1 %v1848_v16  ;;  %v1795_v24 = vmul.f32 %v1664_v41, %v3841_v42 }
 0x688   :  { %v1661_v25 = vsel %vm336_vm4, %v5087_v51, %v1658_v20  ;;  %v1667_v21 = vsel %vm336_vm4, %v1658_v20, %v5083_v55  ;;  %1950 = vmatpush1.bf16.msra.mxu1 %v1847_v0  ;;  %v1804_v51 = vmul.f32 %v5001_v23, %v3844_v45 }
 0x689   :  { %v1660_v18 = vpop.permute.xlu1 %1659  ;;  %v1850_v14 = vpack.c.bf16 %v1794_v46, %v1790_v12  ;;  %v1789_v8 = vmul.f32 %v1667_v21, %v3851_v49  ;;  %v1792_v35 = vmul.f32 %v1661_v25, %v3854_v50  ;;  %v1851_v59 = vpack.c.bf16 %v1795_v24, %v1791_v17  ;;  %v6617_v24 = vld [vmem:[#allocation34_spill] sm:$0xff] }
 0x68a   :  { %v1662_v57 = vsel %vm336_vm4, %v5089_v48, %v1660_v18  ;;  %v1668_v55 = vsel %vm336_vm4, %v1660_v18, %v5085_v7  ;;  %v1800_v7 = vmul.f32 %v4997_v2, %v3844_v45  ;;  %v6622_v17 = vld [vmem:[#allocation18_spill] sm:$0xff] }
 0x68b   :  { %v1793_v34 = vmul.f32 %v1668_v55, %v3851_v49  ;;  %v1796_v15 = vmul.f32 %v1662_v57, %v3854_v50  ;;  %v1674_v40 = vpop.permute.xlu0 %1673  ;;  %1900 = vmatprep.subr.bf16.mxu0 %v1850_v14  ;;  %v6618_v57 = vld [vmem:[#allocation33_spill] sm:$0xff]  ;;  %v6619_v55 = vld [vmem:[#allocation32_spill] sm:$0xff] }
 0x68c   :  { %v1687_v48 = vsel %vm361_vm5, %v1674_v40, %v5095_v31  ;;  %v1856_v58 = vpack.c.bf16 %v1804_v51, %v1800_v7  ;;  %v1689_v5 = vsel %vm361_vm5, %v5091_v9, %v1674_v40  ;;  %v6620_v51 = vld [vmem:[#allocation36_spill] sm:$0xff]  ;;  %v6624_v7 = vld [vmem:[#allocation35_spill] sm:$0xff] }
 0x68d   :  { %v1849_v23 = vpack.c.bf16 %v1793_v34, %v1789_v8  ;;  %v1676_v28 = vpop.permute.xlu1 %1675  ;;  %v1852_v22 = vpack.c.bf16 %v1796_v15, %v1792_v35  ;;  %v1806_v2 = vmul.f32 %v1687_v48, %v3899_v44  ;;  %v1805_v25 = vmul.f32 %v1689_v5, %v3892_v37 }
 0x68e   :  { %v1688_v26 = vsel %vm361_vm5, %v1676_v28, %v5097_v1  ;;  %v1690_v36 = vsel %vm361_vm5, %v5093_v43, %v1676_v28  ;;  %v6621_v8 = vpack.c.bf16 %v6619_v55, %v6620_v51  ;;  %v6625_v28 = vld [vmem:[#allocation19_spill] sm:$0xff]  ;;  %v6632_v51 = vld [vmem:[#allocation22_spill] sm:$0xff] }
 0x68f   :  { %v1810_v16 = vmul.f32 %v1688_v26, %v3899_v44  ;;  %v1682_v0 = vpop.permute.xlu0 %1681  ;;  %1901 = vmatpush1.bf16.msra.mxu0 %v1849_v23  ;;  %1951 = vmatprep.subr.bf16.mxu1 %v1852_v22  ;;  %v1809_v41 = vmul.f32 %v1690_v36, %v3892_v37 }
 0x690   :  { %v1685_v4 = vsel %vm361_vm5, %v5095_v31, %v1682_v0  ;;  %v1691_v12 = vsel %vm361_vm5, %v1682_v0, %v5091_v9  ;;  %1902 = vmatprep.subr.bf16.mxu0 %v1854_v30  ;;  %1952 = vmatpush1.bf16.msra.mxu1 %v1851_v59 }
 0x691   :  { %1953 = vmatprep.subr.bf16.mxu1 %v1856_v58  ;;  %v1684_v46 = vpop.permute.xlu1 %1683  ;;  %v1858_v20 = vpack.c.bf16 %v1810_v16, %v1806_v2  ;;  %v1807_v3 = vmul.f32 %v1685_v4, %v3910_v62  ;;  %v1808_v9 = vmul.f32 %v1691_v12, %v3913_v63  ;;  %v1857_v35 = vpack.c.bf16 %v1809_v41, %v1805_v25  ;;  %v6626_v12 = vld [vmem:[#allocation20_spill] sm:$0xff] }
 0x692   :  { %v1686_v21 = vsel %vm361_vm5, %v5097_v1, %v1684_v46  ;;  %v1692_v31 = vsel %vm361_vm5, %v1684_v46, %v5093_v43  ;;  %v6627_v46 = vld [vmem:[#allocation21_spill] sm:$0xff] }
 0x693   :  { %v1811_v18 = vmul.f32 %v1686_v21, %v3910_v62  ;;  %v1812_v14 = vmul.f32 %v1692_v31, %v3913_v63  ;;  %v1698_v56 = vpop.permute.xlu0 %1697  ;;  %1903 = vmatpush1.bf16.msra.mxu0 %v6616_v6 }
 0x694   :  { %v1711_v1 = vsel %vm386_vm6, %v1698_v56, %v6617_v24  ;;  %v1713_v43 = vsel %vm386_vm6, %v6618_v57, %v1698_v56  ;;  %1904 = vmatprep.subr.bf16.mxu0 %v1858_v20  ;;  %1954 = vmatpush1.bf16.msra.mxu1 %v6621_v8 }
 0x695   :  { %v1859_v34 = vpack.c.bf16 %v1811_v18, %v1807_v3  ;;  %v1700_v15 = vpop.permute.xlu1 %1699  ;;  %v1860_v40 = vpack.c.bf16 %v1812_v14, %v1808_v9  ;;  %v1813_v19 = vmul.f32 %v1713_v43, %v6622_v17  ;;  %v1814_v22 = vmul.f32 %v1711_v1, %v6625_v28  ;;  %v6628_v3 = vld [vmem:[#allocation38_spill] sm:$0xff]  ;;  %v6629_v18 = vld [vmem:[#allocation40_spill] sm:$0xff]  ;;  %v6630_v1 = vld [vmem:[#allocation37_spill] sm:$0xff] }
 0x696   :  { %v1712_v48 = vsel %vm386_vm6, %v1700_v15, %v6623_v61  ;;  %v1714_v23 = vsel %vm386_vm6, %v6624_v7, %v1700_v15  ;;  %v6631_v43 = vld [vmem:[#allocation39_spill] sm:$0xff] }
 0x697   :  { %v1817_v30 = vmul.f32 %v1714_v23, %v6622_v17  ;;  %v1818_v59 = vmul.f32 %v1712_v48, %v6625_v28  ;;  %v1706_v26 = vpop.permute.xlu0 %1705  ;;  %1905 = vmatpush1.bf16.msra.mxu0 %v1857_v35  ;;  %1955 = vmatprep.subr.bf16.mxu1 %v1860_v40  ;;  %v6633_v35 = vld [vmem:[#allocation23_spill] sm:$0xff] }
 0x698   :  { %v1709_v36 = vsel %vm386_vm6, %v6617_v24, %v1706_v26  ;;  %v1715_v58 = vsel %vm386_vm6, %v1706_v26, %v6618_v57  ;;  %1956 = vmatpush1.bf16.msra.mxu1 %v1859_v34  ;;  %v6634_v26 = vld [vmem:[#allocation24_spill] sm:$0xff] }
 0x699   :  { %v1861_v5 = vpack.c.bf16 %v1817_v30, %v1813_v19  ;;  %v1708_v2 = vpop.permute.xlu1 %1707  ;;  %v1862_v16 = vpack.c.bf16 %v1818_v59, %v1814_v22  ;;  %v1815_v41 = vmul.f32 %v1709_v36, %v6626_v12  ;;  %v1816_v20 = vmul.f32 %v1715_v58, %v6627_v46  ;;  %v6635_v58 = vld [vmem:[#allocation25_spill] sm:$0xff] }
 0x69a   :  { %v1710_v0 = vsel %vm386_vm6, %v6623_v61, %v1708_v2  ;;  %v1716_v4 = vsel %vm386_vm6, %v1708_v2, %v6624_v7 }
 0x69b   :  { %v1819_v25 = vmul.f32 %v1710_v0, %v6626_v12  ;;  %v1820_v21 = vmul.f32 %v1716_v4, %v6627_v46  ;;  %v1722_v31 = vpop.permute.xlu0 %1721  ;;  %1906 = vmatprep.subr.bf16.mxu0 %v1862_v16  ;;  %v6636_v4 = vld [vmem:[#allocation42_spill] sm:$0xff] }
 0x69c   :  { %v1735_v9 = vsel %vm411_vm7, %v1722_v31, %v6628_v3  ;;  %v1737_v14 = vsel %vm411_vm7, %v6629_v18, %v1722_v31  ;;  %1907 = vmatpush1.bf16.msra.mxu0 %v1861_v5 }
 0x69d   :  { %v1863_v56 = vpack.c.bf16 %v1819_v25, %v1815_v41  ;;  %v1724_v6 = vpop.permute.xlu1 %1723  ;;  %v1864_v24 = vpack.c.bf16 %v1820_v21, %v1816_v20  ;;  %v1821_v8 = vmul.f32 %v1737_v14, %v6632_v51  ;;  %v1822_v34 = vmul.f32 %v1735_v9, %v6633_v35  ;;  %v6637_v20 = vld [vmem:[#allocation44_spill] sm:$0xff]  ;;  %v6638_v9 = vld [vmem:[#allocation41_spill] sm:$0xff]  ;;  %v6639_v14 = vld [vmem:[#allocation43_spill] sm:$0xff] }
 0x69e   :  { %v1736_v57 = vsel %vm411_vm7, %v1724_v6, %v6630_v1  ;;  %v1738_v55 = vsel %vm411_vm7, %v6631_v43, %v1724_v6  ;;  %v6640_v6 = vld [vmem:[#allocation26_spill] sm:$0xff] }
 0x69f   :  { %v1825_v15 = vmul.f32 %v1738_v55, %v6632_v51  ;;  %v1826_v40 = vmul.f32 %v1736_v57, %v6633_v35  ;;  %v1730_v19 = vpop.permute.xlu0 %1729  ;;  %1957 = vmatprep.subr.bf16.mxu1 %v1864_v24 }
 0x6a0   :  { %v1733_v61 = vsel %vm411_vm7, %v6628_v3, %v1730_v19  ;;  %v1739_v48 = vsel %vm411_vm7, %v1730_v19, %v6629_v18  ;;  %1958 = vmatpush1.bf16.msra.mxu1 %v1863_v56 }
 0x6a1   :  { %v1865_v7 = vpack.c.bf16 %v1825_v15, %v1821_v8  ;;  %v1732_v23 = vpop.permute.xlu1 %1731  ;;  %v1866_v22 = vpack.c.bf16 %v1826_v40, %v1822_v34  ;;  %v1823_v36 = vmul.f32 %v1733_v61, %v6634_v26  ;;  %v1824_v5 = vmul.f32 %v1739_v48, %v6635_v58 }
 0x6a2   :  { %v1734_v30 = vsel %vm411_vm7, %v6630_v1, %v1732_v23  ;;  %v1740_v59 = vsel %vm411_vm7, %v1732_v23, %v6631_v43  ;;  %v6641_v1 = vld [vmem:[#allocation27_spill] sm:$0xff]  ;;  %v6642_v23 = vld [vmem:[#allocation28_spill] sm:$0xff] }
 0x6a3   :  { %v1827_v2 = vmul.f32 %v1734_v30, %v6634_v26  ;;  %v1828_v16 = vmul.f32 %v1740_v59, %v6635_v58  ;;  %v1746_v0 = vpop.permute.xlu0 %1745  ;;  %1908 = vmatprep.subr.bf16.mxu0 %v1866_v22  ;;  %v6643_v30 = vld [vmem:[#allocation29_spill] sm:$0xff] }
 0x6a4   :  { %v1759_v41 = vsel %vm436_vm8, %v1746_v0, %v6636_v4  ;;  %v1761_v25 = vsel %vm436_vm8, %v6637_v20, %v1746_v0  ;;  %1909 = vmatpush1.bf16.msra.mxu0 %v1865_v7 }
 0x6a5   :  { %v1867_v21 = vpack.c.bf16 %v1827_v2, %v1823_v36  ;;  %v1748_v31 = vpop.permute.xlu1 %1747  ;;  %v1868_v3 = vpack.c.bf16 %v1828_v16, %v1824_v5  ;;  %v1829_v24 = vmul.f32 %v6640_v6, %v1761_v25  ;;  %v1830_v57 = vmul.f32 %v6641_v1, %v1759_v41  ;;  %v6644_v16 = vld [vmem:[#allocation30_spill] sm:$0xff] }
 0x6a6   :  { %v1760_v18 = vsel %vm436_vm8, %v1748_v31, %v6638_v9  ;;  %v1762_v56 = vsel %vm436_vm8, %v6639_v14, %v1748_v31 }
 0x6a7   :  { %v1833_v43 = vmul.f32 %v6640_v6, %v1762_v56  ;;  %v1834_v55 = vmul.f32 %v6641_v1, %v1760_v18  ;;  %v1754_v8 = vpop.permute.xlu0 %1753  ;;  %1959 = vmatprep.subr.bf16.mxu1 %v1868_v3  ;;  %v6645_v56 = vld [vmem:[#allocation16_spill] sm:$0xff] }
 0x6a8   :  { %v1757_v34 = vsel %vm436_vm8, %v6636_v4, %v1754_v8  ;;  %v1763_v15 = vsel %vm436_vm8, %v1754_v8, %v6637_v20  ;;  %1960 = vmatpush1.bf16.msra.mxu1 %v1867_v21  ;;  %v3284_v4 = vld [vmem:[#allocation8 + $0x30] ss:$8 sps:$4 sm:$0xff]   ;;  %v6646_v8 = vld [vmem:[#allocation17_spill] sm:$0xff] }
 0x6a9   :  { %v1869_v40 = vpack.c.bf16 %v1833_v43, %v1829_v24  ;;  %v1756_v19 = vpop.permute.xlu1 %1755  ;;  %v1870_v61 = vpack.c.bf16 %v1834_v55, %v1830_v57  ;;  %v1831_v22 = vmul.f32 %v6642_v23, %v1757_v34  ;;  %v1832_v59 = vmul.f32 %v6643_v30, %v1763_v15 }
 0x6aa   :  { %v1758_v48 = vsel %vm436_vm8, %v6638_v9, %v1756_v19  ;;  %v1764_v7 = vsel %vm436_vm8, %v1756_v19, %v6639_v14 }
 0x6ab   :  { %v1835_v36 = vmul.f32 %v6642_v23, %v1758_v48  ;;  %v1836_v5 = vmul.f32 %v6643_v30, %v1764_v7  ;;  %1910 = vmatprep.subr.bf16.mxu0 %v1870_v61  ;;  %v1572_v23 = vld [vmem:[#allocation8 + $0x40] sm:$0xff] }
 0x6ac   :  { %1911 = vmatpush1.bf16.msra.mxu0 %v1869_v40  ;;  %v3174_v30 = vcombine.low %v1572_v23, %v1572_v23 }
 0x6ad   :  { %v1871_v2 = vpack.c.bf16 %v1835_v36, %v1831_v22  ;;  %1912 = vmatprep.subr.bf16.mxu0 %v6644_v16  ;;  %v1872_v0 = vpack.c.bf16 %v1836_v5, %v1832_v59  ;;  %v3175_v22 = vcombine.high %v1572_v23, %v1572_v23 }
 0x6af   :  { %1961 = vmatprep.subr.bf16.mxu1 %v1872_v0 }
 0x6b0   :  { %1913 = vmatpush1.bf16.msra.mxu0 %v6644_v16  ;;  %1962 = vmatpush1.bf16.msra.mxu1 %v1871_v2  ;;  %v3291_v2 = vld [vmem:[#allocation8 + $0x4c] ss:$8 sps:$4 sm:$0xff]  }
 0x6b1   :  { %1963 = vmatprep.subr.bf16.mxu1 %v6644_v16 }
 0x6b3   :  { %1927 = vmatmul.mubr.bf16.vlgmr.msra.gmra.mrb[16].mxu0 %v3284_v4 }
 0x6b4   :  { %1964 = vmatpush1.bf16.msra.mxu1 %v6644_v16  ;;  %3177 = vmatprep.mubr.msk.bf16.mxu0 %vm569_vm1, %v3175_v22 }
 0x6b7   :  { %1978 = vmatmul.mubr.bf16.vlgmr.msra.gmra.mrb[16].mxu1 %v3284_v4 }
 0x6b8   :  { %3179 = vmatprep.mubr.msk.bf16.mxu1 %vm569_vm1, %v3175_v22 }
 0x6bb   :  { %1937 = vmatmul.mubr.bf16.gmra.mrb[4].mxu0 %v3174_v30 }
 0x6bc   :  { %3184 = vmatprep.mubr.msk.bf16.mxu0 %vm569_vm1, %v3291_v2 }
 0x6bf   :  { %1988 = vmatmul.mubr.bf16.gmra.mrb[4].mxu1 %v3174_v30 }
 0x6c0   :  { %3186 = vmatprep.mubr.msk.bf16.mxu1 %vm569_vm1, %v3291_v2 }
 0x786   :  { %v1928_v41 = vpop.f32.mrb[16].mxu0 }
 0x787   :  { %v1996_v20 = vmax.f32 %v1928_v41, 0.0  ;;  %v1930_v25 = vpop.f32.mrb[17].mxu0 }
 0x788   :  { %v1932_v21 = vpop.f32.mrb[18].mxu0  ;;  %v5436_v19 = vmax.f32 %v1930_v25, 0.0 }
 0x789   :  { %v2000_v31 = vmax.f32 %v1932_v21, 0.0  ;;  %2012 = vrot.lane.b32.xlu0 %v1996_v20, %s3442_s23  ;;  %v1934_v3 = vpop.f32.mrb[19].mxu0  ;;  %v5392_v6 = vmul.f32 %v1996_v20, %v6645_v56 }
 0x78a   :  { %v1979_v9 = vpop.f32.mrb[16].mxu1  ;;  %v5439_v61 = vmax.f32 %v1934_v3, 0.0 }
 0x78b   :  { %v1998_v18 = vmax.f32 %v1979_v9, 0.0  ;;  %v1981_v14 = vpop.f32.mrb[17].mxu1  ;;  %2014 = vrot.lane.b32.xlu1 %v2000_v31, %s3442_s23  ;;  %v5395_v24 = vmul.f32 %v2000_v31, %v6645_v56 }
 0x78c   :  { %v1983_v1 = vpop.f32.mrb[18].mxu1  ;;  %v5443_v48 = vmax.f32 %v1981_v14, 0.0 }
 0x78d   :  { %v2002_v57 = vmax.f32 %v1983_v1, 0.0  ;;  %v1985_v43 = vpop.f32.mrb[19].mxu1  ;;  %2020 = vrot.lane.b32.xlu0 %v1998_v18, %s3442_s23  ;;  %v5402_v34 = vmul.f32 %v1998_v18, %v6646_v8 }
 0x78e   :  { %v5447_v7 = vmax.f32 %v1985_v43, 0.0 }
 0x78f   :  { %2022 = vrot.lane.b32.xlu1 %v2002_v57, %s3442_s23  ;;  %6647 = vst [vmem:[#allocation34_spill] sm:$0xff] %v5402_v34  ;;  %v5405_v15 = vmul.f32 %v2002_v57, %v6646_v8 }
 0x791   :  { %6648 = vst [vmem:[#allocation33_spill] sm:$0xff] %v5405_v15  ;;  %2036 = vrot.lane.b32.xlu0 %v1996_v20, %s3443_s3 }
 0x793   :  { %2038 = vrot.lane.b32.xlu1 %v2000_v31, %s3443_s3 }
 0x795   :  { %2044 = vrot.lane.b32.xlu0 %v1998_v18, %s3443_s3 }
 0x797   :  { %2046 = vrot.lane.b32.xlu1 %v2002_v57, %s3443_s3 }
 0x799   :  { %2060 = vrot.lane.b32.xlu0 %v1996_v20, %s3444_s25 }
 0x79b   :  { %2062 = vrot.lane.b32.xlu1 %v2000_v31, %s3444_s25 }
 0x79d   :  { %2068 = vrot.lane.b32.xlu0 %v1998_v18, %s3444_s25 }
 0x79f   :  { %2070 = vrot.lane.b32.xlu1 %v2002_v57, %s3444_s25 }
 0x7a1   :  { %2084 = vrot.lane.b32.xlu0 %v1996_v20, %s3445_s26 }
 0x7a3   :  { %2086 = vrot.lane.b32.xlu1 %v2000_v31, %s3445_s26 }
 0x7a5   :  { %2092 = vrot.lane.b32.xlu0 %v1998_v18, %s3445_s26 }
 0x7a7   :  { %2094 = vrot.lane.b32.xlu1 %v2002_v57, %s3445_s26 }
 0x7a9   :  { %2108 = vrot.lane.b32.xlu0 %v1996_v20, %s3446_s27 }
 0x7ab   :  { %2110 = vrot.lane.b32.xlu1 %v2000_v31, %s3446_s27 }
 0x7ad   :  { %2116 = vrot.lane.b32.xlu0 %v1998_v18, %s3446_s27 }
 0x7af   :  { %2118 = vrot.lane.b32.xlu1 %v2002_v57, %s3446_s27 }
 0x7b1   :  { %2132 = vrot.lane.b32.xlu0 %v1996_v20, %s3447_s28 }
 0x7b3   :  { %2134 = vrot.lane.b32.xlu1 %v2000_v31, %s3447_s28 }
 0x7b5   :  { %2140 = vrot.lane.b32.xlu0 %v1998_v18, %s3447_s28 }
 0x7b7   :  { %2142 = vrot.lane.b32.xlu1 %v2002_v57, %s3447_s28 }
 0x7b9   :  { %2156 = vrot.lane.b32.xlu0 %v1996_v20, %s3448_s29 }
 0x7bb   :  { %2158 = vrot.lane.b32.xlu1 %v2000_v31, %s3448_s29 }
 0x7bd   :  { %2164 = vrot.lane.b32.xlu0 %v1998_v18, %s3448_s29 }
 0x7bf   :  { %2166 = vrot.lane.b32.xlu1 %v2002_v57, %s3448_s29 }
 0x7c1   :  { %2180 = vrot.lane.b32.xlu0 %v1996_v20, %s3449_s30 }
 0x7c3   :  { %2182 = vrot.lane.b32.xlu1 %v2000_v31, %s3449_s30 }
 0x7c5   :  { %2188 = vrot.lane.b32.xlu0 %v1998_v18, %s3449_s30 }
 0x7c7   :  { %2190 = vrot.lane.b32.xlu1 %v2002_v57, %s3449_s30 }
 0x7c9   :  { %2016 = vrot.lane.b32.xlu0 %v5436_v19, %s3442_s23 }
 0x7cb   :  { %2018 = vrot.lane.b32.xlu1 %v5439_v61, %s3442_s23 }
 0x7cd   :  { %2024 = vrot.lane.b32.xlu0 %v5443_v48, %s3442_s23 }
 0x7cf   :  { %2026 = vrot.lane.b32.xlu1 %v5447_v7, %s3442_s23 }
 0x7d1   :  { %2040 = vrot.lane.b32.xlu0 %v5436_v19, %s3443_s3 }
 0x7d3   :  { %2042 = vrot.lane.b32.xlu1 %v5439_v61, %s3443_s3 }
 0x7d5   :  { %2048 = vrot.lane.b32.xlu0 %v5443_v48, %s3443_s3 }
 0x7d7   :  { %2050 = vrot.lane.b32.xlu1 %v5447_v7, %s3443_s3 }
 0x7d9   :  { %2064 = vrot.lane.b32.xlu0 %v5436_v19, %s3444_s25 }
 0x7db   :  { %2066 = vrot.lane.b32.xlu1 %v5439_v61, %s3444_s25 }
 0x7dd   :  { %2072 = vrot.lane.b32.xlu0 %v5443_v48, %s3444_s25 }
 0x7df   :  { %2074 = vrot.lane.b32.xlu1 %v5447_v7, %s3444_s25 }
 0x7e1   :  { %2088 = vrot.lane.b32.xlu0 %v5436_v19, %s3445_s26 }
 0x7e3   :  { %2090 = vrot.lane.b32.xlu1 %v5439_v61, %s3445_s26 }
 0x7e5   :  { %2096 = vrot.lane.b32.xlu0 %v5443_v48, %s3445_s26 }
 0x7e7   :  { %2098 = vrot.lane.b32.xlu1 %v5447_v7, %s3445_s26 }
 0x7e9   :  { %2112 = vrot.lane.b32.xlu0 %v5436_v19, %s3446_s27 }
 0x7eb   :  { %2114 = vrot.lane.b32.xlu1 %v5439_v61, %s3446_s27 }
 0x7ed   :  { %2120 = vrot.lane.b32.xlu0 %v5443_v48, %s3446_s27 }
 0x7ef   :  { %2122 = vrot.lane.b32.xlu1 %v5447_v7, %s3446_s27 }
 0x7f1   :  { %2136 = vrot.lane.b32.xlu0 %v5436_v19, %s3447_s28 }
 0x7f3   :  { %2138 = vrot.lane.b32.xlu1 %v5439_v61, %s3447_s28 }
 0x7f5   :  { %2144 = vrot.lane.b32.xlu0 %v5443_v48, %s3447_s28 }
 0x7f7   :  { %2146 = vrot.lane.b32.xlu1 %v5447_v7, %s3447_s28 }
 0x7f9   :  { %2160 = vrot.lane.b32.xlu0 %v5436_v19, %s3448_s29 }
 0x7fb   :  { %v2013_v59 = vpop.permute.xlu0 %2012  ;;  %2162 = vrot.lane.b32.xlu1 %v5439_v61, %s3448_s29 }
 0x7fd   :  { %2168 = vrot.lane.b32.xlu0 %v5443_v48, %s3448_s29  ;;  %v2015_v36 = vpop.permute.xlu1 %2014 }
 0x7ff   :  { %v2021_v5 = vpop.permute.xlu0 %2020  ;;  %2170 = vrot.lane.b32.xlu1 %v5447_v7, %s3448_s29 }
 0x801   :  { %2184 = vrot.lane.b32.xlu0 %v5436_v19, %s3449_s30  ;;  %v2023_v0 = vpop.permute.xlu1 %2022 }
 0x803   :  { %v5507_v4 = vpop.permute.xlu0 %2036  ;;  %2186 = vrot.lane.b32.xlu1 %v5439_v61, %s3449_s30 }
 0x805   :  { %2192 = vrot.lane.b32.xlu0 %v5443_v48, %s3449_s30  ;;  %v5513_v41 = vpop.permute.xlu1 %2038 }
 0x807   :  { %v5515_v20 = vpop.permute.xlu0 %2044  ;;  %2194 = vrot.lane.b32.xlu1 %v5447_v7, %s3449_s30 }
 0x809   :  { %v5519_v25 = vpop.permute.xlu1 %2046 }
 0x80b   :  { %v5521_v21 = vpop.permute.xlu0 %2060 }
 0x80d   :  { %v5523_v31 = vpop.permute.xlu1 %2062 }
 0x80f   :  { %v5525_v3 = vpop.permute.xlu0 %2068 }
 0x811   :  { %v5527_v9 = vpop.permute.xlu1 %2070 }
 0x813   :  { %v5529_v18 = vpop.permute.xlu0 %2084 }
 0x815   :  { %v5531_v14 = vpop.permute.xlu1 %2086 }
 0x817   :  { %v5533_v1 = vpop.permute.xlu0 %2092 }
 0x819   :  { %v5535_v57 = vpop.permute.xlu1 %2094 }
 0x81b   :  { %v5537_v43 = vpop.permute.xlu0 %2108 }
 0x81d   :  { %v5539_v23 = vpop.permute.xlu1 %2110 }
 0x81f   :  { %v5541_v22 = vpop.permute.xlu0 %2116 }
 0x821   :  { %v5543_v30 = vpop.permute.xlu1 %2118 }
 0x823   :  { %v5545_v2 = vpop.permute.xlu0 %2132 }
 0x824   :  { %6649 = vst [vmem:[#allocation32_spill] sm:$0xff] %v5545_v2 }
 0x825   :  { %v5547_v40 = vpop.permute.xlu1 %2134 }
 0x826   :  { %6650 = vst [vmem:[#allocation36_spill] sm:$0xff] %v5547_v40 }
 0x827   :  { %v5549_v55 = vpop.permute.xlu0 %2140 }
 0x828   :  { %6651 = vst [vmem:[#allocation31_spill] sm:$0xff] %v5549_v55 }
 0x829   :  { %v5551_v8 = vpop.permute.xlu1 %2142 }
 0x82a   :  { %6652 = vst [vmem:[#allocation35_spill] sm:$0xff] %v5551_v8 }
 0x82b   :  { %v5553_v56 = vpop.permute.xlu0 %2156 }
 0x82c   :  { %6653 = vst [vmem:[#allocation38_spill] sm:$0xff] %v5553_v56  ;;  %v6661_v56 = vld [vmem:[#allocation15_spill] sm:$0xff] }
 0x82d   :  { %v5555_v16 = vpop.permute.xlu1 %2158 }
 0x82e   :  { %6654 = vst [vmem:[#allocation40_spill] sm:$0xff] %v5555_v16 }
 0x82f   :  { %v5557_v58 = vpop.permute.xlu0 %2164 }
 0x830   :  { %6655 = vst [vmem:[#allocation37_spill] sm:$0xff] %v5557_v58 }
 0x831   :  { %v5559_v26 = vpop.permute.xlu1 %2166 }
 0x832   :  { %6656 = vst [vmem:[#allocation39_spill] sm:$0xff] %v5559_v26 }
 0x833   :  { %v5561_v35 = vpop.permute.xlu0 %2180 }
 0x834   :  { %6657 = vst [vmem:[#allocation42_spill] sm:$0xff] %v5561_v35 }
 0x835   :  { %v5563_v51 = vpop.permute.xlu1 %2182 }
 0x836   :  { %6658 = vst [vmem:[#allocation44_spill] sm:$0xff] %v5563_v51 }
 0x837   :  { %v5565_v46 = vpop.permute.xlu0 %2188 }
 0x838   :  { %6659 = vst [vmem:[#allocation41_spill] sm:$0xff] %v5565_v46 }
 0x839   :  { %v5567_v12 = vpop.permute.xlu1 %2190 }
 0x83a   :  { %6660 = vst [vmem:[#allocation43_spill] sm:$0xff] %v5567_v12 }
 0x83b   :  { %v2017_v28 = vpop.permute.xlu0 %2016 }
 0x83c   :  { %v2032_v40 = vsel %vm261_vm0, %v2013_v59, %v2017_v28  ;;  %v2030_v17 = vsel %vm261_vm0, %v2017_v28, %v2021_v5 }
 0x83d   :  { %v2019_v8 = vpop.permute.xlu1 %2018  ;;  %v2205_v58 = vmul.f32 %v2032_v40, %v6661_v56  ;;  %v2206_v28 = vmul.f32 %v2030_v17, %v3716_v29 }
 0x83e   :  { %v2033_v16 = vsel %vm261_vm0, %v2015_v36, %v2019_v8  ;;  %v2031_v26 = vsel %vm261_vm0, %v2019_v8, %v2023_v0 }
 0x83f   :  { %v2209_v35 = vmul.f32 %v2033_v16, %v6661_v56  ;;  %v2025_v51 = vpop.permute.xlu0 %2024  ;;  %v2210_v2 = vmul.f32 %v2031_v26, %v3716_v29 }
 0x840   :  { %v2028_v46 = vsel %vm261_vm0, %v2021_v5, %v2025_v51  ;;  %v2034_v12 = vsel %vm261_vm0, %v2025_v51, %v2013_v59 }
 0x841   :  { %v2027_v34 = vpop.permute.xlu1 %2026  ;;  %v2277_v15 = vpack.c.bf16 %v2209_v35, %v2205_v58  ;;  %v2204_v8 = vmul.f32 %v2034_v12, %v3727_v32  ;;  %v2207_v56 = vmul.f32 %v2028_v46, %v3730_v33 }
 0x842   :  { %v2029_v40 = vsel %vm261_vm0, %v2023_v0, %v2027_v34  ;;  %v2035_v16 = vsel %vm261_vm0, %v2027_v34, %v2015_v36  ;;  %v2278_v34 = vpack.c.bf16 %v2210_v2, %v2206_v28 }
 0x843   :  { %v2208_v55 = vmul.f32 %v2035_v16, %v3727_v32  ;;  %v2211_v51 = vmul.f32 %v2029_v40, %v3730_v33  ;;  %v2041_v59 = vpop.permute.xlu0 %2040  ;;  %2333 = vmatprep.subr.bf16.mxu0 %v2277_v15 }
 0x844   :  { %v2056_v35 = vsel %vm286_vm2, %v5507_v4, %v2041_v59  ;;  %v2054_v0 = vsel %vm286_vm2, %v2041_v59, %v5515_v20 }
 0x845   :  { %v2276_v26 = vpack.c.bf16 %v2208_v55, %v2204_v8  ;;  %v2043_v58 = vpop.permute.xlu1 %2042  ;;  %v2279_v5 = vpack.c.bf16 %v2211_v51, %v2207_v56  ;;  %v2213_v46 = vmul.f32 %v2056_v35, %v3749_v52 }
 0x846   :  { %v2057_v12 = vsel %vm286_vm2, %v5513_v41, %v2043_v58  ;;  %v2055_v15 = vsel %vm286_vm2, %v2043_v58, %v5519_v25 }
 0x847   :  { %v2217_v17 = vmul.f32 %v2057_v12, %v3749_v52  ;;  %v2049_v36 = vpop.permute.xlu0 %2048  ;;  %2334 = vmatpush1.bf16.msra.mxu0 %v2276_v26  ;;  %2384 = vmatprep.subr.bf16.mxu1 %v2279_v5  ;;  %v2218_v16 = vmul.f32 %v2055_v15, %v3758_v60  ;;  %v2214_v26 = vmul.f32 %v2054_v0, %v3758_v60 }
 0x848   :  { %v2052_v56 = vsel %vm286_vm2, %v5515_v20, %v2049_v36  ;;  %v2058_v55 = vsel %vm286_vm2, %v2049_v36, %v5507_v4  ;;  %2385 = vmatpush1.bf16.msra.mxu1 %v2278_v34 }
 0x849   :  { %v2051_v2 = vpop.permute.xlu1 %2050  ;;  %v2281_v40 = vpack.c.bf16 %v2217_v17, %v2213_v46  ;;  %v2212_v28 = vmul.f32 %v2058_v55, %v3765_v11  ;;  %v2215_v4 = vmul.f32 %v2052_v56, %v3768_v13 }
 0x84a   :  { %v2053_v8 = vsel %vm286_vm2, %v5519_v25, %v2051_v2  ;;  %v2059_v51 = vsel %vm286_vm2, %v2051_v2, %v5513_v41  ;;  %v2282_v41 = vpack.c.bf16 %v2218_v16, %v2214_v26 }
 0x84b   :  { %v2216_v35 = vmul.f32 %v2059_v51, %v3765_v11  ;;  %v2219_v20 = vmul.f32 %v2053_v8, %v3768_v13  ;;  %v2065_v59 = vpop.permute.xlu0 %2064  ;;  %2335 = vmatprep.subr.bf16.mxu0 %v2281_v40 }
 0x84c   :  { %v2080_v25 = vsel %vm311_vm3, %v5521_v21, %v2065_v59  ;;  %v2078_v0 = vsel %vm311_vm3, %v2065_v59, %v5525_v3 }
 0x84d   :  { %v2280_v58 = vpack.c.bf16 %v2216_v35, %v2212_v28  ;;  %v2067_v5 = vpop.permute.xlu1 %2066  ;;  %v2283_v34 = vpack.c.bf16 %v2219_v20, %v2215_v4  ;;  %v2221_v46 = vmul.f32 %v2080_v25, %v3787_v39  ;;  %v2222_v20 = vmul.f32 %v2078_v0, %v3796_v47 }
 0x84e   :  { %v2081_v12 = vsel %vm311_vm3, %v5523_v31, %v2067_v5  ;;  %v2079_v15 = vsel %vm311_vm3, %v2067_v5, %v5527_v9  ;;  %v2241_v0 = vmul.f32 %v5439_v61, %v3835_v38 }
 0x84f   :  { %v2225_v17 = vmul.f32 %v2081_v12, %v3787_v39  ;;  %v2073_v36 = vpop.permute.xlu0 %2072  ;;  %2336 = vmatpush1.bf16.msra.mxu0 %v2280_v58  ;;  %2386 = vmatprep.subr.bf16.mxu1 %v2283_v34  ;;  %v2226_v16 = vmul.f32 %v2079_v15, %v3796_v47 }
 0x850   :  { %v2076_v56 = vsel %vm311_vm3, %v5525_v3, %v2073_v36  ;;  %v2082_v55 = vsel %vm311_vm3, %v2073_v36, %v5521_v21  ;;  %2387 = vmatpush1.bf16.msra.mxu1 %v2282_v41 }
 0x851   :  { %v2075_v2 = vpop.permute.xlu1 %2074  ;;  %v2285_v40 = vpack.c.bf16 %v2225_v17, %v2221_v46  ;;  %v2220_v28 = vmul.f32 %v2082_v55, %v3803_v53  ;;  %v2223_v21 = vmul.f32 %v2076_v56, %v3806_v54  ;;  %v2237_v55 = vmul.f32 %v5436_v19, %v3835_v38 }
 0x852   :  { %v2077_v8 = vsel %vm311_vm3, %v5527_v9, %v2075_v2  ;;  %v2083_v51 = vsel %vm311_vm3, %v2075_v2, %v5523_v31  ;;  %v2286_v31 = vpack.c.bf16 %v2226_v16, %v2222_v20 }
 0x853   :  { %v2224_v4 = vmul.f32 %v2083_v51, %v3803_v53  ;;  %v2227_v3 = vmul.f32 %v2077_v8, %v3806_v54  ;;  %v2089_v35 = vpop.permute.xlu0 %2088  ;;  %2337 = vmatprep.subr.bf16.mxu0 %v2285_v40 }
 0x854   :  { %v2104_v9 = vsel %vm336_vm4, %v5529_v18, %v2089_v35  ;;  %v2102_v17 = vsel %vm336_vm4, %v2089_v35, %v5533_v1 }
 0x855   :  { %v2284_v59 = vpack.c.bf16 %v2224_v4, %v2220_v28  ;;  %v2091_v26 = vpop.permute.xlu1 %2090  ;;  %v2287_v25 = vpack.c.bf16 %v2227_v3, %v2223_v21  ;;  %v2229_v5 = vmul.f32 %v2104_v9, %v3825_v27  ;;  %v2230_v28 = vmul.f32 %v2102_v17, %v3841_v42 }
 0x856   :  { %v2105_v58 = vsel %vm336_vm4, %v5531_v14, %v2091_v26  ;;  %v2103_v34 = vsel %vm336_vm4, %v2091_v26, %v5535_v57  ;;  %v2293_v3 = vpack.c.bf16 %v2241_v0, %v2237_v55  ;;  %v6662_v0 = vpack.c.bf16 %v5395_v24, %v5392_v6  ;;  %v6669_v24 = vld [vmem:[#allocation35_spill] sm:$0xff] }
 0x857   :  { %v2233_v41 = vmul.f32 %v2105_v58, %v3825_v27  ;;  %v2097_v12 = vpop.permute.xlu0 %2096  ;;  %2338 = vmatpush1.bf16.msra.mxu0 %v2284_v59  ;;  %2388 = vmatprep.subr.bf16.mxu1 %v2287_v25  ;;  %v2234_v2 = vmul.f32 %v2103_v34, %v3841_v42 }
 0x858   :  { %v2100_v46 = vsel %vm336_vm4, %v5533_v1, %v2097_v12  ;;  %v2106_v15 = vsel %vm336_vm4, %v2097_v12, %v5529_v18  ;;  %2389 = vmatpush1.bf16.msra.mxu1 %v2286_v31  ;;  %v2243_v1 = vmul.f32 %v5447_v7, %v3844_v45 }
 0x859   :  { %v2099_v36 = vpop.permute.xlu1 %2098  ;;  %v2289_v56 = vpack.c.bf16 %v2233_v41, %v2229_v5  ;;  %v2228_v16 = vmul.f32 %v2106_v15, %v3851_v49  ;;  %v2231_v19 = vmul.f32 %v2100_v46, %v3854_v50  ;;  %v2290_v35 = vpack.c.bf16 %v2234_v2, %v2230_v28  ;;  %v6663_v2 = vld [vmem:[#allocation31_spill] sm:$0xff]  ;;  %v6668_v28 = vld [vmem:[#allocation18_spill] sm:$0xff] }
 0x85a   :  { %v2101_v40 = vsel %vm336_vm4, %v5535_v57, %v2099_v36  ;;  %v2107_v18 = vsel %vm336_vm4, %v2099_v36, %v5531_v14  ;;  %v2239_v14 = vmul.f32 %v5443_v48, %v3844_v45 }
 0x85b   :  { %v2232_v8 = vmul.f32 %v2107_v18, %v3851_v49  ;;  %v2235_v61 = vmul.f32 %v2101_v40, %v3854_v50  ;;  %v2113_v51 = vpop.permute.xlu0 %2112  ;;  %2339 = vmatprep.subr.bf16.mxu0 %v2289_v56  ;;  %v6664_v40 = vld [vmem:[#allocation32_spill] sm:$0xff]  ;;  %v6665_v18 = vld [vmem:[#allocation33_spill] sm:$0xff] }
 0x85c   :  { %v2126_v57 = vsel %vm361_vm5, %v2113_v51, %v5541_v22  ;;  %v2295_v59 = vpack.c.bf16 %v2243_v1, %v2239_v14  ;;  %v2128_v26 = vsel %vm361_vm5, %v5537_v43, %v2113_v51  ;;  %v6666_v1 = vld [vmem:[#allocation34_spill] sm:$0xff]  ;;  %v6670_v14 = vld [vmem:[#allocation36_spill] sm:$0xff] }
 0x85d   :  { %v2288_v7 = vpack.c.bf16 %v2232_v8, %v2228_v16  ;;  %v2115_v21 = vpop.permute.xlu1 %2114  ;;  %v2291_v4 = vpack.c.bf16 %v2235_v61, %v2231_v19  ;;  %v2245_v48 = vmul.f32 %v2126_v57, %v3899_v44  ;;  %v2244_v46 = vmul.f32 %v2128_v26, %v3892_v37 }
 0x85e   :  { %v2127_v20 = vsel %vm361_vm5, %v2115_v21, %v5543_v30  ;;  %v2129_v9 = vsel %vm361_vm5, %v5539_v23, %v2115_v21  ;;  %v6667_v16 = vpack.c.bf16 %v6665_v18, %v6666_v1  ;;  %v6671_v21 = vld [vmem:[#allocation19_spill] sm:$0xff]  ;;  %v6678_v1 = vld [vmem:[#allocation22_spill] sm:$0xff] }
 0x85f   :  { %v2249_v25 = vmul.f32 %v2127_v20, %v3899_v44  ;;  %v2121_v31 = vpop.permute.xlu0 %2120  ;;  %2340 = vmatpush1.bf16.msra.mxu0 %v2288_v7  ;;  %2390 = vmatprep.subr.bf16.mxu1 %v2291_v4  ;;  %v2248_v34 = vmul.f32 %v2129_v9, %v3892_v37 }
 0x860   :  { %v2124_v58 = vsel %vm361_vm5, %v5541_v22, %v2121_v31  ;;  %v2130_v5 = vsel %vm361_vm5, %v2121_v31, %v5537_v43  ;;  %2341 = vmatprep.subr.bf16.mxu0 %v2293_v3  ;;  %2391 = vmatpush1.bf16.msra.mxu1 %v2290_v35 }
 0x861   :  { %2392 = vmatprep.subr.bf16.mxu1 %v2295_v59  ;;  %v2123_v41 = vpop.permute.xlu1 %2122  ;;  %v2297_v12 = vpack.c.bf16 %v2249_v25, %v2245_v48  ;;  %v2246_v17 = vmul.f32 %v2124_v58, %v3910_v62  ;;  %v2247_v43 = vmul.f32 %v2130_v5, %v3913_v63  ;;  %v2296_v19 = vpack.c.bf16 %v2248_v34, %v2244_v46  ;;  %v6672_v5 = vld [vmem:[#allocation20_spill] sm:$0xff] }
 0x862   :  { %v2125_v15 = vsel %vm361_vm5, %v5543_v30, %v2123_v41  ;;  %v2131_v22 = vsel %vm361_vm5, %v2123_v41, %v5539_v23  ;;  %v6673_v41 = vld [vmem:[#allocation21_spill] sm:$0xff] }
 0x863   :  { %v2250_v36 = vmul.f32 %v2125_v15, %v3910_v62  ;;  %v2251_v56 = vmul.f32 %v2131_v22, %v3913_v63  ;;  %v2137_v55 = vpop.permute.xlu0 %2136  ;;  %2342 = vmatpush1.bf16.msra.mxu0 %v6662_v0 }
 0x864   :  { %v2150_v30 = vsel %vm386_vm6, %v2137_v55, %v6663_v2  ;;  %v2152_v23 = vsel %vm386_vm6, %v6664_v40, %v2137_v55  ;;  %2343 = vmatprep.subr.bf16.mxu0 %v2297_v12  ;;  %2393 = vmatpush1.bf16.msra.mxu1 %v6667_v16 }
 0x865   :  { %v2298_v8 = vpack.c.bf16 %v2250_v36, %v2246_v17  ;;  %v2139_v61 = vpop.permute.xlu1 %2138  ;;  %v2299_v51 = vpack.c.bf16 %v2251_v56, %v2247_v43  ;;  %v2252_v6 = vmul.f32 %v2152_v23, %v6668_v28  ;;  %v2253_v4 = vmul.f32 %v2150_v30, %v6671_v21  ;;  %v6674_v17 = vld [vmem:[#allocation37_spill] sm:$0xff]  ;;  %v6675_v36 = vld [vmem:[#allocation38_spill] sm:$0xff]  ;;  %v6676_v30 = vld [vmem:[#allocation39_spill] sm:$0xff] }
 0x866   :  { %v2151_v57 = vsel %vm386_vm6, %v2139_v61, %v6669_v24  ;;  %v2153_v7 = vsel %vm386_vm6, %v6670_v14, %v2139_v61  ;;  %v6677_v23 = vld [vmem:[#allocation40_spill] sm:$0xff] }
 0x867   :  { %v2256_v3 = vmul.f32 %v2153_v7, %v6668_v28  ;;  %v2257_v35 = vmul.f32 %v2151_v57, %v6671_v21  ;;  %v2145_v20 = vpop.permute.xlu0 %2144  ;;  %2344 = vmatpush1.bf16.msra.mxu0 %v2296_v19  ;;  %2394 = vmatprep.subr.bf16.mxu1 %v2299_v51  ;;  %v6679_v19 = vld [vmem:[#allocation23_spill] sm:$0xff] }
 0x868   :  { %v2148_v9 = vsel %vm386_vm6, %v6663_v2, %v2145_v20  ;;  %v2154_v59 = vsel %vm386_vm6, %v2145_v20, %v6664_v40  ;;  %2395 = vmatpush1.bf16.msra.mxu1 %v2298_v8  ;;  %v6680_v20 = vld [vmem:[#allocation24_spill] sm:$0xff] }
 0x869   :  { %v2300_v26 = vpack.c.bf16 %v2256_v3, %v2252_v6  ;;  %v2147_v48 = vpop.permute.xlu1 %2146  ;;  %v2301_v25 = vpack.c.bf16 %v2257_v35, %v2253_v4  ;;  %v2254_v34 = vmul.f32 %v2148_v9, %v6672_v5  ;;  %v2255_v12 = vmul.f32 %v2154_v59, %v6673_v41  ;;  %v6681_v59 = vld [vmem:[#allocation25_spill] sm:$0xff] }
 0x86a   :  { %v2149_v31 = vsel %vm386_vm6, %v6669_v24, %v2147_v48  ;;  %v2155_v58 = vsel %vm386_vm6, %v2147_v48, %v6670_v14 }
 0x86b   :  { %v2258_v46 = vmul.f32 %v2149_v31, %v6672_v5  ;;  %v2259_v15 = vmul.f32 %v2155_v58, %v6673_v41  ;;  %v2161_v22 = vpop.permute.xlu0 %2160  ;;  %2345 = vmatprep.subr.bf16.mxu0 %v2301_v25  ;;  %v6682_v58 = vld [vmem:[#allocation41_spill] sm:$0xff] }
 0x86c   :  { %v2174_v43 = vsel %vm411_vm7, %v2161_v22, %v6674_v17  ;;  %v2176_v56 = vsel %vm411_vm7, %v6675_v36, %v2161_v22  ;;  %2346 = vmatpush1.bf16.msra.mxu0 %v2300_v26 }
 0x86d   :  { %v2302_v55 = vpack.c.bf16 %v2258_v46, %v2254_v34  ;;  %v2163_v0 = vpop.permute.xlu1 %2162  ;;  %v2303_v2 = vpack.c.bf16 %v2259_v15, %v2255_v12  ;;  %v2260_v16 = vmul.f32 %v2176_v56, %v6678_v1  ;;  %v2261_v8 = vmul.f32 %v2174_v43, %v6679_v19  ;;  %v6683_v12 = vld [vmem:[#allocation42_spill] sm:$0xff]  ;;  %v6684_v43 = vld [vmem:[#allocation43_spill] sm:$0xff]  ;;  %v6685_v56 = vld [vmem:[#allocation44_spill] sm:$0xff] }
 0x86e   :  { %v2175_v40 = vsel %vm411_vm7, %v2163_v0, %v6676_v30  ;;  %v2177_v18 = vsel %vm411_vm7, %v6677_v23, %v2163_v0  ;;  %v5811_v0 = vld [vmem:[#allocation5 + $0x20] ss:$0 sm:$0xff] }
 0x86f   :  { %v2264_v61 = vmul.f32 %v2177_v18, %v6678_v1  ;;  %v2265_v51 = vmul.f32 %v2175_v40, %v6679_v19  ;;  %v2169_v6 = vpop.permute.xlu0 %2168  ;;  %2396 = vmatprep.subr.bf16.mxu1 %v2303_v2  ;;  %6686 = vst [vmem:[#allocation26_spill] sm:$0xff] %v5811_v0 }
 0x870   :  { %v2172_v24 = vsel %vm411_vm7, %v6674_v17, %v2169_v6  ;;  %v2178_v57 = vsel %vm411_vm7, %v2169_v6, %v6675_v36  ;;  %2397 = vmatpush1.bf16.msra.mxu1 %v2302_v55 }
 0x871   :  { %v2304_v14 = vpack.c.bf16 %v2264_v61, %v2260_v16  ;;  %v2171_v7 = vpop.permute.xlu1 %2170  ;;  %v2305_v4 = vpack.c.bf16 %v2265_v51, %v2261_v8  ;;  %v2262_v9 = vmul.f32 %v2172_v24, %v6680_v20  ;;  %v2263_v26 = vmul.f32 %v2178_v57, %v6681_v59 }
 0x872   :  { %v2173_v3 = vsel %vm411_vm7, %v6676_v30, %v2171_v7  ;;  %v2179_v35 = vsel %vm411_vm7, %v2171_v7, %v6677_v23  ;;  %v5814_v30 = vld [vmem:[#allocation5 + $0x28] ss:$0 sm:$0xff]  ;;  %v5831_v7 = vld [vmem:[#allocation5 + $0x30] ss:$0 sm:$0xff] }
 0x873   :  { %v2266_v48 = vmul.f32 %v2173_v3, %v6680_v20  ;;  %v2267_v25 = vmul.f32 %v2179_v35, %v6681_v59  ;;  %v2185_v31 = vpop.permute.xlu0 %2184  ;;  %2347 = vmatprep.subr.bf16.mxu0 %v2305_v4  ;;  %6687 = vst [vmem:[#allocation27_spill] sm:$0xff] %v5814_v30  ;;  %6688 = vst [vmem:[#allocation28_spill] sm:$0xff] %v5831_v7  ;;  %v5834_v3 = vld [vmem:[#allocation5 + $0x38] ss:$0 sm:$0xff] }
 0x874   :  { %v2198_v34 = vsel %vm436_vm8, %v2185_v31, %v6682_v58  ;;  %v2200_v46 = vsel %vm436_vm8, %v6683_v12, %v2185_v31  ;;  %2348 = vmatpush1.bf16.msra.mxu0 %v2304_v14  ;;  %6689 = vst [vmem:[#allocation29_spill] sm:$0xff] %v5834_v3 }
 0x875   :  { %v2306_v15 = vpack.c.bf16 %v2266_v48, %v2262_v9  ;;  %v2187_v22 = vpop.permute.xlu1 %2186  ;;  %v2307_v17 = vpack.c.bf16 %v2267_v25, %v2263_v26  ;;  %v2268_v2 = vmul.f32 %v5811_v0, %v2200_v46  ;;  %v2269_v40 = vmul.f32 %v5814_v30, %v2198_v34  ;;  %v6690_v25 = vld [vmem:[#allocation30_spill] sm:$0xff] }
 0x876   :  { %v2199_v36 = vsel %vm436_vm8, %v2187_v22, %v6684_v43  ;;  %v2201_v55 = vsel %vm436_vm8, %v6685_v56, %v2187_v22 }
 0x877   :  { %v2272_v23 = vmul.f32 %v5811_v0, %v2201_v55  ;;  %v2273_v18 = vmul.f32 %v5814_v30, %v2199_v36  ;;  %v2193_v16 = vpop.permute.xlu0 %2192  ;;  %2398 = vmatprep.subr.bf16.mxu1 %v2307_v17  ;;  %v6691_v55 = vld [vmem:[#allocation16_spill] sm:$0xff] }
 0x878   :  { %v2196_v8 = vsel %vm436_vm8, %v6682_v58, %v2193_v16  ;;  %v2202_v61 = vsel %vm436_vm8, %v2193_v16, %v6683_v12  ;;  %2399 = vmatpush1.bf16.msra.mxu1 %v2306_v15  ;;  %v3289_v58 = vld [vmem:[#allocation8 + $0x48] ss:$8 sps:$4 sm:$0xff]  }
 0x879   :  { %v2308_v51 = vpack.c.bf16 %v2272_v23, %v2268_v2  ;;  %v2195_v6 = vpop.permute.xlu1 %2194  ;;  %v2309_v24 = vpack.c.bf16 %v2273_v18, %v2269_v40  ;;  %v2270_v4 = vmul.f32 %v5831_v7, %v2196_v8  ;;  %v2271_v35 = vmul.f32 %v5834_v3, %v2202_v61  ;;  %v6692_v61 = vld [vmem:[#allocation17_spill] sm:$0xff] }
 0x87a   :  { %v2197_v57 = vsel %vm436_vm8, %v6684_v43, %v2195_v6  ;;  %v2203_v14 = vsel %vm436_vm8, %v2195_v6, %v6685_v56 }
 0x87b   :  { %v2274_v9 = vmul.f32 %v5831_v7, %v2197_v57  ;;  %v2275_v26 = vmul.f32 %v5834_v3, %v2203_v14  ;;  %2349 = vmatprep.subr.bf16.mxu0 %v2309_v24 }
 0x87c   :  { %2350 = vmatpush1.bf16.msra.mxu0 %v2308_v51 }
 0x87d   :  { %v2310_v48 = vpack.c.bf16 %v2274_v9, %v2270_v4  ;;  %2351 = vmatprep.subr.bf16.mxu0 %v6690_v25  ;;  %v2311_v31 = vpack.c.bf16 %v2275_v26, %v2271_v35  ;;  %v2011_v9 = vld [vmem:[#allocation8 + $0x58] sm:$0xff] }
 0x87e   :  { %v3183_v26 = vcombine.high %v2011_v9, %v2011_v9 }
 0x87f   :  { %2400 = vmatprep.subr.bf16.mxu1 %v2311_v31 }
 0x880   :  { %2352 = vmatpush1.bf16.msra.mxu0 %v6690_v25  ;;  %2401 = vmatpush1.bf16.msra.mxu1 %v2310_v48  ;;  %v3182_v48 = vcombine.low %v2011_v9, %v2011_v9 }
 0x881   :  { %2402 = vmatprep.subr.bf16.mxu1 %v6690_v25 }
 0x883   :  { %2366 = vmatmul.mubr.bf16.vlgmr.msra.gmra.mrb[20].mxu0 %v3289_v58 }
 0x884   :  { %2403 = vmatpush1.bf16.msra.mxu1 %v6690_v25  ;;  %3185 = vmatprep.mubr.msk.bf16.mxu0 %vm569_vm1, %v3183_v26 }
 0x887   :  { %2417 = vmatmul.mubr.bf16.vlgmr.msra.gmra.mrb[20].mxu1 %v3289_v58 }
 0x888   :  { %3187 = vmatprep.mubr.msk.bf16.mxu1 %vm569_vm1, %v3183_v26 }
 0x88b   :  { %2376 = vmatmul.mubr.bf16.gmra.mrb[4].mxu0 %v3182_v48 }
 0x88f   :  { %2427 = vmatmul.mubr.bf16.gmra.mrb[4].mxu1 %v3182_v48 }
 0x956   :  { %v2367_v34 = vpop.f32.mrb[20].mxu0 }
 0x957   :  { %v2435_v12 = vmax.f32 %v2367_v34, 0.0  ;;  %v2369_v46 = vpop.f32.mrb[21].mxu0 }
 0x958   :  { %v2371_v15 = vpop.f32.mrb[22].mxu0  ;;  %v5890_v57 = vmax.f32 %v2369_v46, 0.0 }
 0x959   :  { %v2439_v22 = vmax.f32 %v2371_v15, 0.0  ;;  %2451 = vrot.lane.b32.xlu0 %v2435_v12, %s3442_s23  ;;  %v2373_v17 = vpop.f32.mrb[23].mxu0  ;;  %v5846_v2 = vmul.f32 %v2435_v12, %v6691_v55 }
 0x95a   :  { %v2418_v43 = vpop.f32.mrb[20].mxu1  ;;  %v5893_v14 = vmax.f32 %v2373_v17, 0.0 }
 0x95b   :  { %v2437_v36 = vmax.f32 %v2418_v43, 0.0  ;;  %v2420_v56 = vpop.f32.mrb[21].mxu1  ;;  %2453 = vrot.lane.b32.xlu1 %v2439_v22, %s3442_s23  ;;  %v5849_v40 = vmul.f32 %v2439_v22, %v6691_v55 }
 0x95c   :  { %v2422_v23 = vpop.f32.mrb[22].mxu1  ;;  %v5897_v4 = vmax.f32 %v2420_v56, 0.0 }
 0x95d   :  { %v2441_v18 = vmax.f32 %v2422_v23, 0.0  ;;  %v2424_v16 = vpop.f32.mrb[23].mxu1  ;;  %2459 = vrot.lane.b32.xlu0 %v2437_v36, %s3442_s23  ;;  %v5856_v51 = vmul.f32 %v2437_v36, %v6692_v61 }
 0x95e   :  { %v5901_v35 = vmax.f32 %v2424_v16, 0.0 }
 0x95f   :  { %2461 = vrot.lane.b32.xlu1 %v2441_v18, %s3442_s23  ;;  %6693 = vst [vmem:[#allocation31_spill] sm:$0xff] %v5856_v51  ;;  %v5859_v6 = vmul.f32 %v2441_v18, %v6692_v61 }
 0x961   :  { %6694 = vst [vmem:[#allocation32_spill] sm:$0xff] %v5859_v6  ;;  %2475 = vrot.lane.b32.xlu0 %v2435_v12, %s3443_s3 }
 0x963   :  { %2477 = vrot.lane.b32.xlu1 %v2439_v22, %s3443_s3 }
 0x965   :  { %2483 = vrot.lane.b32.xlu0 %v2437_v36, %s3443_s3 }
 0x967   :  { %2485 = vrot.lane.b32.xlu1 %v2441_v18, %s3443_s3 }
 0x969   :  { %2499 = vrot.lane.b32.xlu0 %v2435_v12, %s3444_s25 }
 0x96b   :  { %2501 = vrot.lane.b32.xlu1 %v2439_v22, %s3444_s25 }
 0x96d   :  { %2507 = vrot.lane.b32.xlu0 %v2437_v36, %s3444_s25 }
 0x96f   :  { %2509 = vrot.lane.b32.xlu1 %v2441_v18, %s3444_s25 }
 0x971   :  { %2523 = vrot.lane.b32.xlu0 %v2435_v12, %s3445_s26 }
 0x973   :  { %2525 = vrot.lane.b32.xlu1 %v2439_v22, %s3445_s26 }
 0x975   :  { %2531 = vrot.lane.b32.xlu0 %v2437_v36, %s3445_s26 }
 0x977   :  { %2533 = vrot.lane.b32.xlu1 %v2441_v18, %s3445_s26 }
 0x979   :  { %2547 = vrot.lane.b32.xlu0 %v2435_v12, %s3446_s27 }
 0x97b   :  { %2549 = vrot.lane.b32.xlu1 %v2439_v22, %s3446_s27 }
 0x97d   :  { %2555 = vrot.lane.b32.xlu0 %v2437_v36, %s3446_s27 }
 0x97f   :  { %2557 = vrot.lane.b32.xlu1 %v2441_v18, %s3446_s27 }
 0x981   :  { %2571 = vrot.lane.b32.xlu0 %v2435_v12, %s3447_s28 }
 0x983   :  { %2573 = vrot.lane.b32.xlu1 %v2439_v22, %s3447_s28 }
 0x985   :  { %2579 = vrot.lane.b32.xlu0 %v2437_v36, %s3447_s28 }
 0x987   :  { %2581 = vrot.lane.b32.xlu1 %v2441_v18, %s3447_s28 }
 0x989   :  { %2595 = vrot.lane.b32.xlu0 %v2435_v12, %s3448_s29 }
 0x98b   :  { %2597 = vrot.lane.b32.xlu1 %v2439_v22, %s3448_s29 }
 0x98d   :  { %2603 = vrot.lane.b32.xlu0 %v2437_v36, %s3448_s29 }
 0x98f   :  { %2605 = vrot.lane.b32.xlu1 %v2441_v18, %s3448_s29 }
 0x991   :  { %2619 = vrot.lane.b32.xlu0 %v2435_v12, %s3449_s30  ;;  %v3296_v12 = vld [vmem:[#allocation8 + $0x64] ss:$8 sps:$4 sm:$0xff]  }
 0x992   :  { %3192 = vmatprep.mubr.msk.bf16.mxu0 %vm569_vm1, %v3296_v12  ;;  %3194 = vmatprep.mubr.msk.bf16.mxu1 %vm569_vm1, %v3296_v12 }
 0x993   :  { %2621 = vrot.lane.b32.xlu1 %v2439_v22, %s3449_s30 }
 0x995   :  { %2627 = vrot.lane.b32.xlu0 %v2437_v36, %s3449_s30 }
 0x997   :  { %2629 = vrot.lane.b32.xlu1 %v2441_v18, %s3449_s30 }
 0x999   :  { %2455 = vrot.lane.b32.xlu0 %v5890_v57, %s3442_s23 }
 0x99b   :  { %2457 = vrot.lane.b32.xlu1 %v5893_v14, %s3442_s23 }
 0x99d   :  { %2463 = vrot.lane.b32.xlu0 %v5897_v4, %s3442_s23 }
 0x99f   :  { %2465 = vrot.lane.b32.xlu1 %v5901_v35, %s3442_s23 }
 0x9a1   :  { %2479 = vrot.lane.b32.xlu0 %v5890_v57, %s3443_s3 }
 0x9a3   :  { %2481 = vrot.lane.b32.xlu1 %v5893_v14, %s3443_s3 }
 0x9a5   :  { %2487 = vrot.lane.b32.xlu0 %v5897_v4, %s3443_s3 }
 0x9a7   :  { %2489 = vrot.lane.b32.xlu1 %v5901_v35, %s3443_s3 }
 0x9a9   :  { %2503 = vrot.lane.b32.xlu0 %v5890_v57, %s3444_s25 }
 0x9ab   :  { %2505 = vrot.lane.b32.xlu1 %v5893_v14, %s3444_s25 }
 0x9ad   :  { %2511 = vrot.lane.b32.xlu0 %v5897_v4, %s3444_s25 }
 0x9af   :  { %2513 = vrot.lane.b32.xlu1 %v5901_v35, %s3444_s25 }
 0x9b1   :  { %2527 = vrot.lane.b32.xlu0 %v5890_v57, %s3445_s26 }
 0x9b3   :  { %2529 = vrot.lane.b32.xlu1 %v5893_v14, %s3445_s26 }
 0x9b5   :  { %2535 = vrot.lane.b32.xlu0 %v5897_v4, %s3445_s26 }
 0x9b7   :  { %2537 = vrot.lane.b32.xlu1 %v5901_v35, %s3445_s26 }
 0x9b9   :  { %2551 = vrot.lane.b32.xlu0 %v5890_v57, %s3446_s27 }
 0x9bb   :  { %2553 = vrot.lane.b32.xlu1 %v5893_v14, %s3446_s27 }
 0x9bd   :  { %2559 = vrot.lane.b32.xlu0 %v5897_v4, %s3446_s27 }
 0x9bf   :  { %2561 = vrot.lane.b32.xlu1 %v5901_v35, %s3446_s27 }
 0x9c1   :  { %2575 = vrot.lane.b32.xlu0 %v5890_v57, %s3447_s28 }
 0x9c3   :  { %2577 = vrot.lane.b32.xlu1 %v5893_v14, %s3447_s28 }
 0x9c5   :  { %2583 = vrot.lane.b32.xlu0 %v5897_v4, %s3447_s28 }
 0x9c7   :  { %2585 = vrot.lane.b32.xlu1 %v5901_v35, %s3447_s28 }
 0x9c9   :  { %2599 = vrot.lane.b32.xlu0 %v5890_v57, %s3448_s29 }
 0x9cb   :  { %v2452_v31 = vpop.permute.xlu0 %2451  ;;  %2601 = vrot.lane.b32.xlu1 %v5893_v14, %s3448_s29 }
 0x9cd   :  { %2607 = vrot.lane.b32.xlu0 %v5897_v4, %s3448_s29  ;;  %v2454_v58 = vpop.permute.xlu1 %2453 }
 0x9cf   :  { %v2460_v34 = vpop.permute.xlu0 %2459  ;;  %2609 = vrot.lane.b32.xlu1 %v5901_v35, %s3448_s29 }
 0x9d1   :  { %2623 = vrot.lane.b32.xlu0 %v5890_v57, %s3449_s30  ;;  %v2462_v46 = vpop.permute.xlu1 %2461 }
 0x9d3   :  { %v5961_v15 = vpop.permute.xlu0 %2475  ;;  %2625 = vrot.lane.b32.xlu1 %v5893_v14, %s3449_s30 }
 0x9d5   :  { %2631 = vrot.lane.b32.xlu0 %v5897_v4, %s3449_s30  ;;  %v5967_v22 = vpop.permute.xlu1 %2477 }
 0x9d7   :  { %v5969_v17 = vpop.permute.xlu0 %2483  ;;  %2633 = vrot.lane.b32.xlu1 %v5901_v35, %s3449_s30 }
 0x9d9   :  { %v5973_v43 = vpop.permute.xlu1 %2485 }
 0x9db   :  { %v5975_v36 = vpop.permute.xlu0 %2499 }
 0x9dd   :  { %v5977_v56 = vpop.permute.xlu1 %2501 }
 0x9df   :  { %v5979_v55 = vpop.permute.xlu0 %2507 }
 0x9e1   :  { %v5981_v23 = vpop.permute.xlu1 %2509 }
 0x9e3   :  { %v5983_v18 = vpop.permute.xlu0 %2523 }
 0x9e5   :  { %v5985_v16 = vpop.permute.xlu1 %2525 }
 0x9e7   :  { %v5987_v61 = vpop.permute.xlu0 %2531 }
 0x9e9   :  { %v5989_v9 = vpop.permute.xlu1 %2533 }
 0x9eb   :  { %v5991_v26 = vpop.permute.xlu0 %2547 }
 0x9ed   :  { %v5993_v48 = vpop.permute.xlu1 %2549 }
 0x9ef   :  { %v5995_v12 = vpop.permute.xlu0 %2555 }
 0x9f1   :  { %v5997_v24 = vpop.permute.xlu1 %2557 }
 0x9f3   :  { %v5999_v8 = vpop.permute.xlu0 %2571 }
 0x9f4   :  { %6695 = vst [vmem:[#allocation33_spill] sm:$0xff] %v5999_v8 }
 0x9f5   :  { %v6001_v25 = vpop.permute.xlu1 %2573 }
 0x9f6   :  { %6696 = vst [vmem:[#allocation34_spill] sm:$0xff] %v6001_v25 }
 0x9f7   :  { %v6003_v3 = vpop.permute.xlu0 %2579 }
 0x9f8   :  { %6697 = vst [vmem:[#allocation35_spill] sm:$0xff] %v6003_v3 }
 0x9f9   :  { %v6005_v7 = vpop.permute.xlu1 %2581 }
 0x9fa   :  { %6698 = vst [vmem:[#allocation36_spill] sm:$0xff] %v6005_v7 }
 0x9fb   :  { %v6007_v30 = vpop.permute.xlu0 %2595 }
 0x9fc   :  { %6699 = vst [vmem:[#allocation37_spill] sm:$0xff] %v6007_v30 }
 0x9fd   :  { %v6009_v0 = vpop.permute.xlu1 %2597 }
 0x9fe   :  { %6700 = vst [vmem:[#allocation38_spill] sm:$0xff] %v6009_v0 }
 0x9ff   :  { %v6011_v59 = vpop.permute.xlu0 %2603 }
 0xa00   :  { %6701 = vst [vmem:[#allocation39_spill] sm:$0xff] %v6011_v59 }
 0xa01   :  { %v6013_v20 = vpop.permute.xlu1 %2605 }
 0xa02   :  { %6702 = vst [vmem:[#allocation40_spill] sm:$0xff] %v6013_v20  ;;  %v6707_v20 = vld [vmem:[#allocation15_spill] sm:$0xff] }
 0xa03   :  { %v6015_v19 = vpop.permute.xlu0 %2619 }
 0xa04   :  { %6703 = vst [vmem:[#allocation41_spill] sm:$0xff] %v6015_v19 }
 0xa05   :  { %v6017_v1 = vpop.permute.xlu1 %2621 }
 0xa06   :  { %6704 = vst [vmem:[#allocation42_spill] sm:$0xff] %v6017_v1 }
 0xa07   :  { %v6019_v41 = vpop.permute.xlu0 %2627 }
 0xa08   :  { %6705 = vst [vmem:[#allocation43_spill] sm:$0xff] %v6019_v41 }
 0xa09   :  { %v6021_v5 = vpop.permute.xlu1 %2629 }
 0xa0a   :  { %6706 = vst [vmem:[#allocation44_spill] sm:$0xff] %v6021_v5 }
 0xa0b   :  { %v2456_v21 = vpop.permute.xlu0 %2455 }
 0xa0c   :  { %v2469_v25 = vsel %vm261_vm0, %v2456_v21, %v2460_v34  ;;  %v2471_v30 = vsel %vm261_vm0, %v2452_v31, %v2456_v21 }
 0xa0d   :  { %v2458_v0 = vpop.permute.xlu1 %2457  ;;  %v2644_v1 = vmul.f32 %v2471_v30, %v6707_v20  ;;  %v2645_v41 = vmul.f32 %v2469_v25, %v3716_v29 }
 0xa0e   :  { %v2470_v59 = vsel %vm261_vm0, %v2458_v0, %v2462_v46  ;;  %v2472_v19 = vsel %vm261_vm0, %v2454_v58, %v2458_v0 }
 0xa0f   :  { %v2648_v5 = vmul.f32 %v2472_v19, %v6707_v20  ;;  %v2649_v7 = vmul.f32 %v2470_v59, %v3716_v29  ;;  %v2464_v28 = vpop.permute.xlu0 %2463 }
 0xa10   :  { %v2467_v51 = vsel %vm261_vm0, %v2460_v34, %v2464_v28  ;;  %v2473_v21 = vsel %vm261_vm0, %v2464_v28, %v2452_v31 }
 0xa11   :  { %v2717_v6 = vpack.c.bf16 %v2649_v7, %v2645_v41  ;;  %v2466_v8 = vpop.permute.xlu1 %2465  ;;  %v2716_v3 = vpack.c.bf16 %v2648_v5, %v2644_v1  ;;  %v2643_v19 = vmul.f32 %v2473_v21, %v3727_v32  ;;  %v2646_v29 = vmul.f32 %v2467_v51, %v3730_v33 }
 0xa12   :  { %v2468_v0 = vsel %vm261_vm0, %v2462_v46, %v2466_v8  ;;  %v2474_v30 = vsel %vm261_vm0, %v2466_v8, %v2454_v58 }
 0xa13   :  { %v2647_v20 = vmul.f32 %v2474_v30, %v3727_v32  ;;  %v2650_v59 = vmul.f32 %v2468_v0, %v3730_v33  ;;  %v2480_v25 = vpop.permute.xlu0 %2479  ;;  %2772 = vmatprep.subr.bf16.mxu0 %v2716_v3 }
 0xa14   :  { %v2493_v28 = vsel %vm286_vm2, %v2480_v25, %v5969_v17  ;;  %v2495_v5 = vsel %vm286_vm2, %v5961_v15, %v2480_v25 }
 0xa15   :  { %v2715_v41 = vpack.c.bf16 %v2647_v20, %v2643_v19  ;;  %v2482_v1 = vpop.permute.xlu1 %2481  ;;  %v2718_v7 = vpack.c.bf16 %v2650_v59, %v2646_v29  ;;  %v2652_v8 = vmul.f32 %v2495_v5, %v3749_v52  ;;  %v2653_v3 = vmul.f32 %v2493_v28, %v3758_v60 }
 0xa16   :  { %v2494_v32 = vsel %vm286_vm2, %v2482_v1, %v5973_v43  ;;  %v2496_v33 = vsel %vm286_vm2, %v5967_v22, %v2482_v1 }
 0xa17   :  { %v2656_v51 = vmul.f32 %v2496_v33, %v3749_v52  ;;  %v2657_v31 = vmul.f32 %v2494_v32, %v3758_v60  ;;  %v2488_v58 = vpop.permute.xlu0 %2487  ;;  %2773 = vmatpush1.bf16.msra.mxu0 %v2715_v41  ;;  %2823 = vmatprep.subr.bf16.mxu1 %v2718_v7 }
 0xa18   :  { %v2491_v34 = vsel %vm286_vm2, %v5969_v17, %v2488_v58  ;;  %v2497_v46 = vsel %vm286_vm2, %v2488_v58, %v5961_v15  ;;  %2824 = vmatpush1.bf16.msra.mxu1 %v2717_v6 }
 0xa19   :  { %v2721_v21 = vpack.c.bf16 %v2657_v31, %v2653_v3  ;;  %v2490_v0 = vpop.permute.xlu1 %2489  ;;  %v2720_v30 = vpack.c.bf16 %v2656_v51, %v2652_v8  ;;  %v2651_v19 = vmul.f32 %v2497_v46, %v3765_v11  ;;  %v2654_v17 = vmul.f32 %v2491_v34, %v3768_v13 }
 0xa1a   :  { %v2492_v52 = vsel %vm286_vm2, %v5973_v43, %v2490_v0  ;;  %v2498_v60 = vsel %vm286_vm2, %v2490_v0, %v5967_v22 }
 0xa1b   :  { %v2655_v29 = vmul.f32 %v2498_v60, %v3765_v11  ;;  %v2658_v15 = vmul.f32 %v2492_v52, %v3768_v13  ;;  %v2504_v6 = vpop.permute.xlu0 %2503  ;;  %2774 = vmatprep.subr.bf16.mxu0 %v2720_v30 }
 0xa1c   :  { %v2517_v20 = vsel %vm311_vm3, %v2504_v6, %v5979_v55  ;;  %v2519_v43 = vsel %vm311_vm3, %v5975_v36, %v2504_v6 }
 0xa1d   :  { %v2719_v59 = vpack.c.bf16 %v2655_v29, %v2651_v19  ;;  %v2506_v22 = vpop.permute.xlu1 %2505  ;;  %v2722_v25 = vpack.c.bf16 %v2658_v15, %v2654_v17  ;;  %v2660_v28 = vmul.f32 %v2519_v43, %v3787_v39  ;;  %v2661_v5 = vmul.f32 %v2517_v20, %v3796_v47 }
 0xa1e   :  { %v2518_v11 = vsel %vm311_vm3, %v2506_v22, %v5981_v23  ;;  %v2520_v13 = vsel %vm311_vm3, %v5977_v56, %v2506_v22 }
 0xa1f   :  { %v2664_v41 = vmul.f32 %v2520_v13, %v3787_v39  ;;  %v2665_v1 = vmul.f32 %v2518_v11, %v3796_v47  ;;  %v2512_v7 = vpop.permute.xlu0 %2511  ;;  %2775 = vmatpush1.bf16.msra.mxu0 %v2719_v59  ;;  %2825 = vmatprep.subr.bf16.mxu1 %v2722_v25  ;;  %v2680_v59 = vmul.f32 %v5893_v14, %v3835_v38 }
 0xa20   :  { %v2515_v8 = vsel %vm311_vm3, %v5979_v55, %v2512_v7  ;;  %v2521_v32 = vsel %vm311_vm3, %v2512_v7, %v5975_v36  ;;  %2826 = vmatpush1.bf16.msra.mxu1 %v2721_v21  ;;  %v2676_v14 = vmul.f32 %v5890_v57, %v3835_v38 }
 0xa21   :  { %v2725_v33 = vpack.c.bf16 %v2665_v1, %v2661_v5  ;;  %v2514_v3 = vpop.permute.xlu1 %2513  ;;  %v2724_v51 = vpack.c.bf16 %v2664_v41, %v2660_v28  ;;  %v2659_v31 = vmul.f32 %v2521_v32, %v3803_v53  ;;  %v2662_v55 = vmul.f32 %v2515_v8, %v3806_v54 }
 0xa22   :  { %v2516_v39 = vsel %vm311_vm3, %v5981_v23, %v2514_v3  ;;  %v2522_v47 = vsel %vm311_vm3, %v2514_v3, %v5977_v56  ;;  %v2732_v41 = vpack.c.bf16 %v2680_v59, %v2676_v14  ;;  %v6720_v14 = vld [vmem:[#allocation39_spill] sm:$0xff] }
 0xa23   :  { %v2663_v58 = vmul.f32 %v2522_v47, %v3803_v53  ;;  %v2666_v36 = vmul.f32 %v2516_v39, %v3806_v54  ;;  %v2528_v34 = vpop.permute.xlu0 %2527  ;;  %2776 = vmatprep.subr.bf16.mxu0 %v2724_v51 }
 0xa24   :  { %v2541_v46 = vsel %vm336_vm4, %v2528_v34, %v5987_v61  ;;  %v2543_v23 = vsel %vm336_vm4, %v5983_v18, %v2528_v34  ;;  %v6711_v34 = vld [vmem:[#allocation32_spill] sm:$0xff] }
 0xa25   :  { %v2723_v21 = vpack.c.bf16 %v2663_v58, %v2659_v31  ;;  %v2530_v56 = vpop.permute.xlu1 %2529  ;;  %v2726_v0 = vpack.c.bf16 %v2666_v36, %v2662_v55  ;;  %v2668_v30 = vmul.f32 %v2543_v23, %v3825_v27  ;;  %v2669_v52 = vmul.f32 %v2541_v46, %v3841_v42  ;;  %v6709_v58 = vld [vmem:[#allocation35_spill] sm:$0xff]  ;;  %v6710_v36 = vld [vmem:[#allocation33_spill] sm:$0xff] }
 0xa26   :  { %v2542_v53 = vsel %vm336_vm4, %v2530_v56, %v5989_v9  ;;  %v2544_v54 = vsel %vm336_vm4, %v5985_v16, %v2530_v56  ;;  %v6712_v46 = vld [vmem:[#allocation31_spill] sm:$0xff] }
 0xa27   :  { %v2672_v60 = vmul.f32 %v2544_v54, %v3825_v27  ;;  %v2673_v19 = vmul.f32 %v2542_v53, %v3841_v42  ;;  %v2536_v17 = vpop.permute.xlu0 %2535  ;;  %2777 = vmatpush1.bf16.msra.mxu0 %v2723_v21  ;;  %2827 = vmatprep.subr.bf16.mxu1 %v2726_v0  ;;  %v6713_v23 = vpack.c.bf16 %v6711_v34, %v6712_v46  ;;  %v6714_v0 = vld [vmem:[#allocation18_spill] sm:$0xff]  ;;  %v6728_v46 = vld [vmem:[#allocation43_spill] sm:$0xff] }
 0xa28   :  { %v2539_v29 = vsel %vm336_vm4, %v5987_v61, %v2536_v17  ;;  %v2545_v15 = vsel %vm336_vm4, %v2536_v17, %v5983_v18  ;;  %2828 = vmatpush1.bf16.msra.mxu1 %v2725_v33  ;;  %v2682_v61 = vmul.f32 %v5901_v35, %v3844_v45  ;;  %v2678_v35 = vmul.f32 %v5897_v4, %v3844_v45  ;;  %v6716_v53 = vld [vmem:[#allocation34_spill] sm:$0xff] }
 0xa29   :  { %v2729_v6 = vpack.c.bf16 %v2673_v19, %v2669_v52  ;;  %v2538_v20 = vpop.permute.xlu1 %2537  ;;  %v2728_v43 = vpack.c.bf16 %v2672_v60, %v2668_v30  ;;  %v2667_v18 = vmul.f32 %v2545_v15, %v3851_v49  ;;  %v2670_v22 = vmul.f32 %v2539_v29, %v3854_v50  ;;  %v6717_v52 = vld [vmem:[#allocation19_spill] sm:$0xff] }
 0xa2a   :  { %v2540_v27 = vsel %vm336_vm4, %v5989_v9, %v2538_v20  ;;  %v2546_v42 = vsel %vm336_vm4, %v2538_v20, %v5985_v16  ;;  %v2734_v1 = vpack.c.bf16 %v2682_v61, %v2678_v35  ;;  %v6718_v61 = vld [vmem:[#allocation20_spill] sm:$0xff] }
 0xa2b   :  { %v2671_v25 = vmul.f32 %v2546_v42, %v3851_v49  ;;  %v2674_v28 = vmul.f32 %v2540_v27, %v3854_v50  ;;  %v2552_v11 = vpop.permute.xlu0 %2551  ;;  %2778 = vmatprep.subr.bf16.mxu0 %v2728_v43 }
 0xa2c   :  { %v2565_v16 = vsel %vm361_vm5, %v2552_v11, %v5995_v12  ;;  %v2567_v38 = vsel %vm361_vm5, %v5991_v26, %v2552_v11 }
 0xa2d   :  { %v2727_v9 = vpack.c.bf16 %v2671_v25, %v2667_v18  ;;  %v2554_v13 = vpop.permute.xlu1 %2553  ;;  %v2730_v5 = vpack.c.bf16 %v2674_v28, %v2670_v22  ;;  %v2684_v57 = vmul.f32 %v2565_v16, %v3899_v44  ;;  %v6719_v22 = vld [vmem:[#allocation21_spill] sm:$0xff] }
 0xa2e   :  { %v2566_v49 = vsel %vm361_vm5, %v2554_v13, %v5997_v24  ;;  %v2568_v50 = vsel %vm361_vm5, %v5993_v48, %v2554_v13 }
 0xa2f   :  { %v2688_v45 = vmul.f32 %v2566_v49, %v3899_v44  ;;  %v2560_v4 = vpop.permute.xlu0 %2559  ;;  %2779 = vmatpush1.bf16.msra.mxu0 %v2727_v9  ;;  %2829 = vmatprep.subr.bf16.mxu1 %v2730_v5  ;;  %v2687_v32 = vmul.f32 %v2568_v50, %v3892_v37  ;;  %v2683_v44 = vmul.f32 %v2567_v38, %v3892_v37  ;;  %v6721_v9 = vld [vmem:[#allocation37_spill] sm:$0xff]  ;;  %v6723_v38 = vld [vmem:[#allocation38_spill] sm:$0xff] }
 0xa30   :  { %v2563_v7 = vsel %vm361_vm5, %v5995_v12, %v2560_v4  ;;  %v2569_v8 = vsel %vm361_vm5, %v2560_v4, %v5991_v26  ;;  %2780 = vmatprep.subr.bf16.mxu0 %v2732_v41  ;;  %2830 = vmatpush1.bf16.msra.mxu1 %v2729_v6  ;;  %v6708_v37 = vpack.c.bf16 %v5849_v40, %v5846_v2  ;;  %v6715_v40 = vld [vmem:[#allocation36_spill] sm:$0xff] }
 0xa31   :  { %2831 = vmatprep.subr.bf16.mxu1 %v2734_v1  ;;  %v2562_v33 = vpop.permute.xlu1 %2561  ;;  %v2736_v3 = vpack.c.bf16 %v2688_v45, %v2684_v57  ;;  %v2685_v39 = vmul.f32 %v2563_v7, %v3910_v62  ;;  %v2686_v26 = vmul.f32 %v2569_v8, %v3913_v63  ;;  %v6722_v41 = vld [vmem:[#allocation40_spill] sm:$0xff]  ;;  %v6724_v45 = vld [vmem:[#allocation22_spill] sm:$0xff]  ;;  %v6725_v7 = vld [vmem:[#allocation23_spill] sm:$0xff] }
 0xa32   :  { %v2564_v51 = vsel %vm361_vm5, %v5997_v24, %v2562_v33  ;;  %v2570_v12 = vsel %vm361_vm5, %v2562_v33, %v5993_v48 }
 0xa33   :  { %v2689_v47 = vmul.f32 %v2564_v51, %v3910_v62  ;;  %v2690_v31 = vmul.f32 %v2570_v12, %v3913_v63  ;;  %v2576_v55 = vpop.permute.xlu0 %2575  ;;  %2781 = vmatpush1.bf16.msra.mxu0 %v6708_v37  ;;  %v2735_v62 = vpack.c.bf16 %v2687_v32, %v2683_v44 }
 0xa34   :  { %v2589_v24 = vsel %vm386_vm6, %v2576_v55, %v6709_v58  ;;  %v2591_v48 = vsel %vm386_vm6, %v6710_v36, %v2576_v55  ;;  %2782 = vmatprep.subr.bf16.mxu0 %v2736_v3  ;;  %2832 = vmatpush1.bf16.msra.mxu1 %v6713_v23  ;;  %v6726_v55 = vld [vmem:[#allocation24_spill] sm:$0xff] }
 0xa35   :  { %v2737_v63 = vpack.c.bf16 %v2689_v47, %v2685_v39  ;;  %v2578_v21 = vpop.permute.xlu1 %2577  ;;  %v2738_v56 = vpack.c.bf16 %v2690_v31, %v2686_v26  ;;  %v2691_v2 = vmul.f32 %v2591_v48, %v6714_v0  ;;  %v2692_v60 = vmul.f32 %v2589_v24, %v6717_v52 }
 0xa36   :  { %v2590_v30 = vsel %vm386_vm6, %v2578_v21, %v6715_v40  ;;  %v2592_v54 = vsel %vm386_vm6, %v6716_v53, %v2578_v21 }
 0xa37   :  { %v2695_v19 = vmul.f32 %v2592_v54, %v6714_v0  ;;  %v2696_v17 = vmul.f32 %v2590_v30, %v6717_v52  ;;  %v2584_v29 = vpop.permute.xlu0 %2583  ;;  %2783 = vmatpush1.bf16.msra.mxu0 %v2735_v62  ;;  %2833 = vmatprep.subr.bf16.mxu1 %v2738_v56  ;;  %v6729_v62 = vld [vmem:[#allocation41_spill] sm:$0xff]  ;;  %v6731_v30 = vld [vmem:[#allocation42_spill] sm:$0xff] }
 0xa38   :  { %v2587_v15 = vsel %vm386_vm6, %v6709_v58, %v2584_v29  ;;  %v2593_v6 = vsel %vm386_vm6, %v2584_v29, %v6710_v36  ;;  %2834 = vmatpush1.bf16.msra.mxu1 %v2737_v63  ;;  %v6727_v58 = vld [vmem:[#allocation25_spill] sm:$0xff]  ;;  %v6732_v54 = vld [vmem:[#allocation26_spill] sm:$0xff] }
 0xa39   :  { %v2739_v20 = vpack.c.bf16 %v2695_v19, %v2691_v2  ;;  %v2586_v43 = vpop.permute.xlu1 %2585  ;;  %v2740_v27 = vpack.c.bf16 %v2696_v17, %v2692_v60  ;;  %v2693_v18 = vmul.f32 %v2587_v15, %v6718_v61  ;;  %v2694_v25 = vmul.f32 %v2593_v6, %v6719_v22  ;;  %v6730_v2 = vld [vmem:[#allocation44_spill] sm:$0xff]  ;;  %v6733_v60 = vld [vmem:[#allocation27_spill] sm:$0xff] }
 0xa3a   :  { %v2588_v42 = vsel %vm386_vm6, %v6715_v40, %v2586_v43  ;;  %v2594_v59 = vsel %vm386_vm6, %v2586_v43, %v6716_v53 }
 0xa3b   :  { %v2697_v28 = vmul.f32 %v2588_v42, %v6718_v61  ;;  %v2698_v11 = vmul.f32 %v2594_v59, %v6719_v22  ;;  %v2600_v16 = vpop.permute.xlu0 %2599  ;;  %2784 = vmatprep.subr.bf16.mxu0 %v2740_v27 }
 0xa3c   :  { %v2613_v35 = vsel %vm411_vm7, %v2600_v16, %v6720_v14  ;;  %v2615_v13 = vsel %vm411_vm7, %v6721_v9, %v2600_v16  ;;  %2785 = vmatpush1.bf16.msra.mxu0 %v2739_v20 }
 0xa3d   :  { %v2741_v5 = vpack.c.bf16 %v2697_v28, %v2693_v18  ;;  %v2602_v49 = vpop.permute.xlu1 %2601  ;;  %v2742_v50 = vpack.c.bf16 %v2698_v11, %v2694_v25  ;;  %v2699_v4 = vmul.f32 %v2615_v13, %v6724_v45  ;;  %v2700_v8 = vmul.f32 %v2613_v35, %v6725_v7  ;;  %v6734_v18 = vld [vmem:[#allocation28_spill] sm:$0xff]  ;;  %v6735_v25 = vld [vmem:[#allocation29_spill] sm:$0xff]  ;;  %v6736_v35 = vld [vmem:[#allocation30_spill] sm:$0xff] }
 0xa3e   :  { %v2614_v1 = vsel %vm411_vm7, %v2602_v49, %v6722_v41  ;;  %v2616_v57 = vsel %vm411_vm7, %v6723_v38, %v2602_v49  ;;  %v3294_v13 = vld [vmem:[#allocation8 + $0x60] ss:$8 sps:$4 sm:$0xff]   ;;  %v3190_v49 = vcombine.low %v2450_v10, %v2450_v10 }
 0xa3f   :  { %v2703_v32 = vmul.f32 %v2616_v57, %v6724_v45  ;;  %v2704_v33 = vmul.f32 %v2614_v1, %v6725_v7  ;;  %v2608_v3 = vpop.permute.xlu0 %2607  ;;  %2835 = vmatprep.subr.bf16.mxu1 %v2742_v50  ;;  %v6737_v50 = vmov 0  }
 0xa40   :  { %v2611_v44 = vsel %vm411_vm7, %v6720_v14, %v2608_v3  ;;  %v2617_v51 = vsel %vm411_vm7, %v2608_v3, %v6721_v9  ;;  %2836 = vmatpush1.bf16.msra.mxu1 %v2741_v5  ;;  %v3191_v5 = vcombine.high %v2450_v10, %v2450_v10 }
 0xa41   :  { %v2743_v12 = vpack.c.bf16 %v2703_v32, %v2699_v4  ;;  %v2610_v39 = vpop.permute.xlu1 %2609  ;;  %v2744_v26 = vpack.c.bf16 %v2704_v33, %v2700_v8  ;;  %v2701_v37 = vmul.f32 %v2611_v44, %v6726_v55  ;;  %v2702_v24 = vmul.f32 %v2617_v51, %v6727_v58 }
 0xa42   :  { %v2612_v47 = vsel %vm411_vm7, %v6722_v41, %v2610_v39  ;;  %v2618_v31 = vsel %vm411_vm7, %v2610_v39, %v6723_v38 }
 0xa43   :  { %v2705_v36 = vmul.f32 %v2612_v47, %v6726_v55  ;;  %v2706_v48 = vmul.f32 %v2618_v31, %v6727_v58  ;;  %v2624_v34 = vpop.permute.xlu0 %2623  ;;  %2786 = vmatprep.subr.bf16.mxu0 %v2744_v26  ;;  %v2890_v58 = vld [vmem:[%s6326_s4] sm:$0xf] }
 0xa44   :  { %v2637_v23 = vsel %vm436_vm8, %v2624_v34, %v6728_v46  ;;  %v2639_v63 = vsel %vm436_vm8, %v6729_v62, %v2624_v34  ;;  %2787 = vmatpush1.bf16.msra.mxu0 %v2743_v12 }
 0xa45   :  { %v2745_v21 = vpack.c.bf16 %v2705_v36, %v2701_v37  ;;  %v2626_v56 = vpop.permute.xlu1 %2625  ;;  %v2746_v0 = vpack.c.bf16 %v2706_v48, %v2702_v24  ;;  %v2707_v52 = vmul.f32 %v6732_v54, %v2639_v63  ;;  %v2708_v19 = vmul.f32 %v6733_v60, %v2637_v23 }
 0xa46   :  { %v2638_v40 = vsel %vm436_vm8, %v2626_v56, %v6730_v2  ;;  %v2640_v53 = vsel %vm436_vm8, %v6731_v30, %v2626_v56  ;;  %v3451_v36 = vmov 65535   ;;  %v3452_v63 = vmov 1.0  }
 0xa47   :  { %v2711_v17 = vmul.f32 %v6732_v54, %v2640_v53  ;;  %v2712_v29 = vmul.f32 %v6733_v60, %v2638_v40  ;;  %v2632_v15 = vpop.permute.xlu0 %2631  ;;  %2837 = vmatprep.subr.bf16.mxu1 %v2746_v0  ;;  %v3001_v48 = vsel %vm2999_vm10, 4294967295, %v3451_v36 }
 0xa48   :  { %v2635_v6 = vsel %vm436_vm8, %v6728_v46, %v2632_v15  ;;  %v2641_v20 = vsel %vm436_vm8, %v2632_v15, %v6729_v62  ;;  %2838 = vmatpush1.bf16.msra.mxu1 %v2745_v21  ;;  %v3002_v56 = vsel %vm3000_vm11, %v3001_v48, 0 }
 0xa49   :  { %v2747_v43 = vpack.c.bf16 %v2711_v17, %v2707_v52  ;;  %v2634_v27 = vpop.permute.xlu1 %2633  ;;  %v2748_v42 = vpack.c.bf16 %v2712_v29, %v2708_v19  ;;  %v2709_v22 = vmul.f32 %v6734_v18, %v2635_v6  ;;  %v2710_v28 = vmul.f32 %v6735_v25, %v2641_v20  ;;  %v3299_v6 = vld [vmem:[%s6327_s5] sm:$0xff]   ;;  %s3453_s5 = smov [#allocation10]  }
 0xa4a   :  { %v2636_v59 = vsel %vm436_vm8, %v6730_v2, %v2634_v27  ;;  %v2642_v61 = vsel %vm436_vm8, %v2634_v27, %v6731_v30  ;;  %s3130_s24 = sshll.u32 %s3453_s5, 4  ;;  %s3131_s24 = int_to_ptr.vmem [resolvable:$true] %s3130_s24 }
 0xa4b   :  { %v2713_v11 = vmul.f32 %v6734_v18, %v2636_v59  ;;  %v2714_v16 = vmul.f32 %v6735_v25, %v2642_v61  ;;  %2788 = vmatprep.subr.bf16.mxu0 %v2748_v42  ;;  %s3404_s11 = scalar_lea.vmem %s3131_s24, 1024  ;;  %p3409_p5 = scmp.lt.s32.totalorder %s3131_s24, %s3131_s24 }
 0xa4c   :  { %2789 = vmatpush1.bf16.msra.mxu0 %v2747_v43  ;;  %p3405_p4 = scmp.ne.s32.totalorder %s3131_s24, %s3404_s11  ;;  %p3410_p6 = scmp.lt.s32.totalorder %s3404_s11, %s3404_s11 }
 0xa4d   :  { %v2749_v14 = vpack.c.bf16 %v2713_v11, %v2709_v22  ;;  %2790 = vmatprep.subr.bf16.mxu0 %v6736_v35  ;;  %v2750_v9 = vpack.c.bf16 %v2714_v16, %v2710_v28  ;;  %v3308_v22 = vld [vmem:[#allocation2] sm:$0xff] }
 0xa4e   :  { %p3411_p7 = por %p3410_p6, %p3409_p5 }
 0xa4f   :  { %2839 = vmatprep.subr.bf16.mxu1 %v2750_v9 }
 0xa50   :  { %2791 = vmatpush1.bf16.msra.mxu0 %v6736_v35  ;;  %2840 = vmatpush1.bf16.msra.mxu1 %v2749_v14  ;;  %v3309_v14 = vld [vmem:[#allocation2 + $0x8] sm:$0xff]  ;;  %p3412_p8 = pnand %p3411_p7, %p3405_p4 }
 0xa51   :  { %2841 = vmatprep.subr.bf16.mxu1 %v6736_v35 }
 0xa53   :  { %2805 = vmatmul.mubr.bf16.vlgmr.msra.gmra.mrb[24].mxu0 %v3294_v13 }
 0xa54   :  { %2842 = vmatpush1.bf16.msra.mxu1 %v6736_v35  ;;  %3193 = vmatprep.mubr.msk.bf16.mxu0 %vm569_vm1, %v3191_v5 }
 0xa57   :  { %2856 = vmatmul.mubr.bf16.vlgmr.msra.gmra.mrb[24].mxu1 %v3294_v13 }
 0xa58   :  { %3195 = vmatprep.mubr.msk.bf16.mxu1 %vm569_vm1, %v3191_v5  ;;  %v3310_v5 = vld [vmem:[#allocation2 + $0x20] sm:$0xff] }
 0xa5b   :  { %2815 = vmatmul.mubr.bf16.gmra.mrb[4].mxu0 %v3190_v49 }
 0xa5c   :  { %2926 = vmatprep.mubr.bf16.mxu0 %v6737_v50 }
 0xa5f   :  { %2866 = vmatmul.mubr.bf16.gmra.mrb[4].mxu1 %v3190_v49 }
 0xa60   :  { %2967 = vmatprep.mubr.bf16.mxu1 %v6737_v50 }
 0xb26   :  { %v2806_v41 = vpop.f32.mrb[24].mxu0 }
 0xb27   :  { %v2874_v1 = vmax.f32 %v2806_v41, 0.0  ;;  %v2808_v38 = vpop.f32.mrb[25].mxu0 }
 0xb28   :  { %v2875_v57 = vmax.f32 %v2808_v38, 0.0  ;;  %v2810_v45 = vpop.f32.mrb[26].mxu0 }
 0xb29   :  { %v2878_v4 = vmax.f32 %v2810_v45, 0.0  ;;  %v2812_v7 = vpop.f32.mrb[27].mxu0 }
 0xb2a   :  { %v2879_v8 = vmax.f32 %v2812_v7, 0.0  ;;  %v2857_v32 = vpop.f32.mrb[24].mxu1 }
 0xb2b   :  { %v2886_v33 = vpack.c.bf16 %v2878_v4, %v2874_v1  ;;  %v2859_v3 = vpop.f32.mrb[25].mxu1  ;;  %v2876_v12 = vmax.f32 %v2857_v32, 0.0  ;;  %v3311_v1 = vld [vmem:[#allocation2 + $0x28] sm:$0xff] }
 0xb2c   :  { %v2887_v44 = vpack.c.bf16 %v2879_v8, %v2875_v57  ;;  %v2861_v51 = vpop.f32.mrb[26].mxu1  ;;  %v2877_v47 = vmax.f32 %v2859_v3, 0.0  ;;  %v3312_v57 = vld [vmem:[#allocation2 + $0x10] sm:$0xff]  ;;  %v3313_v8 = vld [vmem:[#allocation2 + $0x18] sm:$0xff] }
 0xb2d   :  { %v2880_v39 = vmax.f32 %v2861_v51, 0.0  ;;  %v2863_v26 = vpop.f32.mrb[27].mxu1  ;;  %v3314_v3 = vld [vmem:[#allocation2 + $0x30] sm:$0xff]  ;;  %v3315_v51 = vld [vmem:[#allocation2 + $0x38] sm:$0xff] }
 0xb2e   :  { %v2881_v31 = vmax.f32 %v2863_v26, 0.0  ;;  %2894 = vmatprep.subr.bf16.mxu0 %v2887_v44 }
 0xb2f   :  { %v2888_v55 = vpack.c.bf16 %v2880_v39, %v2876_v12  ;;  %2895 = vmatpush1.bf16.msra.mxu0 %v2886_v33 }
 0xb30   :  { %v2889_v37 = vpack.c.bf16 %v2881_v31, %v2877_v47  ;;  %2896 = vmatprep.subr.bf16.mxu0 %v6736_v35 }
 0xb32   :  { %2935 = vmatprep.subr.bf16.mxu1 %v2889_v37 }
 0xb33   :  { %2897 = vmatpush1.bf16.msra.mxu0 %v6736_v35  ;;  %2936 = vmatpush1.bf16.msra.mxu1 %v2888_v55 }
 0xb34   :  { %2937 = vmatprep.subr.bf16.mxu1 %v6736_v35 }
 0xb36   :  { %3196 = vmatmul.mubr.msk.bf16.vlgmr.msra.gmra.mrb[4].mxu0 %vm569_vm1, %v2890_v58 }
 0xb37   :  { %2938 = vmatpush1.bf16.msra.mxu1 %v6736_v35  ;;  %3047 = vmatprep.mubr.bf16.mxu0 %v6737_v50 }
 0xb3a   :  { %3197 = vmatmul.mubr.msk.bf16.vlgmr.msra.gmra.mrb[4].mxu1 %vm569_vm1, %v2890_v58 }
 0xb3b   :  { %3090 = vmatprep.mubr.bf16.mxu1 %v6737_v50 }
 0xc09   :  { %v2928_v24 = vpop.f32.mrb[4].mxu0 }
 0xc0a   :  { %v2980_v34 = vmax.f32 %v2928_v24, 0.0  ;;  %v2930_v46 = vpop.f32.mrb[5].mxu0 }
 0xc0b   :  { %v2981_v23 = vmax.f32 %v2930_v46, 0.0  ;;  %v2932_v62 = vpop.f32.mrb[6].mxu0 }
 0xc0c   :  { %v2984_v21 = vpack.c.bf16 %v3452_v63, %v2980_v34  ;;  %v2933_v0 = vpop.f32.mrb[7].mxu0 }
 0xc0d   :  { %v2985_v2 = vpack.c.bf16 %v3452_v63, %v2981_v23  ;;  %v2969_v40 = vpop.f32.mrb[4].mxu1 }
 0xc0e   :  { %v2982_v30 = vmax.f32 %v2969_v40, 0.0  ;;  %v2971_v53 = vpop.f32.mrb[5].mxu1  ;;  %v3004_v19 = vand.u32 %v3002_v56, %v2984_v21 }
 0xc0f   :  { %v2983_v54 = vmax.f32 %v2971_v53, 0.0  ;;  %v2973_v52 = vpop.f32.mrb[6].mxu1  ;;  %v3007_v60 = vand.u32 %v3002_v56, %v2985_v2 }
 0xc10   :  { %v2986_v17 = vpack.c.bf16 %v3452_v63, %v2982_v30  ;;  %v2974_v29 = vpop.f32.mrb[7].mxu1 }
 0xc11   :  { %v2987_v15 = vpack.c.bf16 %v3452_v63, %v2983_v54  ;;  %3015 = vmatprep.subr.bf16.mxu0 %v3007_v60 }
 0xc12   :  { %3016 = vmatpush1.bf16.msra.mxu0 %v3004_v19  ;;  %v3010_v43 = vand.u32 %v3002_v56, %v2986_v17 }
 0xc13   :  { %v3013_v20 = vand.u32 %v3002_v56, %v2987_v15 }
 0xc15   :  { %3058 = vmatprep.subr.bf16.mxu1 %v3013_v20  ;;  %3199 = vmatmul.mubr.msk.bf16.vlgmr.msra.gmra.mrb[28].mxu0 %vm2995_vm12, %v3299_v6 }
 0xc16   :  { %3059 = vmatpush1.bf16.msra.mxu1 %v3010_v43 }
 0xc19   :  { %3200 = vmatmul.mubr.msk.bf16.vlgmr.msra.gmra.mrb[28].mxu1 %vm2995_vm12, %v3299_v6 }
 0xce8   :  { %v3049_v27 = vpop.f32.mrb[28].mxu0 }
 0xce9   :  { %v3101_v42 = vmax.f32 %v3049_v27, 0.0  ;;  %v3051_v59 = vpop.f32.mrb[29].mxu0 }
 0xcea   :  { %v3102_v61 = vmax.f32 %v3051_v59, 0.0  ;;  %v3053_v18 = vpop.f32.mrb[30].mxu0 }
 0xceb   :  { %v3109_v25 = vadd.f32 %v3308_v22, %v3101_v42  ;;  %v3105_v28 = vmax.f32 %v3053_v18, 0.0  ;;  %v3055_v11 = vpop.f32.mrb[31].mxu0 }
 0xcec   :  { %v3092_v16 = vpop.f32.mrb[28].mxu1  ;;  %v3110_v35 = vadd.f32 %v3309_v14, %v3102_v61  ;;  %v3106_v9 = vmax.f32 %v3055_v11, 0.0 }
 0xced   :  { %3117 = vst [vmem:[#allocation10] sm:$0xff] %v3109_v25  ;;  %v3103_v13 = vmax.f32 %v3092_v16, 0.0  ;;  %v3094_v10 = vpop.f32.mrb[29].mxu1  ;;  %v3113_v49 = vadd.f32 %v3310_v5, %v3105_v28 }
 0xcee   :  { %3118 = vst [vmem:[#allocation10 + $0x8] sm:$0xff] %v3110_v35  ;;  %v3104_v50 = vmax.f32 %v3094_v10, 0.0  ;;  %v3096_v41 = vpop.f32.mrb[30].mxu1  ;;  %v3114_v38 = vadd.f32 %v3311_v1, %v3106_v9 }
 0xcef   :  { %v3111_v45 = vadd.f32 %v3312_v57, %v3103_v13  ;;  %3121 = vst [vmem:[#allocation10 + $0x20] sm:$0xff] %v3113_v49  ;;  %v3107_v4 = vmax.f32 %v3096_v41, 0.0  ;;  %v3098_v7 = vpop.f32.mrb[31].mxu1 }
 0xcf0   :  { %v3112_v32 = vadd.f32 %v3313_v8, %v3104_v50  ;;  %3122 = vst [vmem:[#allocation10 + $0x28] sm:$0xff] %v3114_v38  ;;  %v3108_v33 = vmax.f32 %v3098_v7, 0.0 }
 0xcf1   :  { %3119 = vst [vmem:[#allocation10 + $0x10] sm:$0xff] %v3111_v45  ;;  %v3115_v44 = vadd.f32 %v3314_v3, %v3107_v4 }
 0xcf2   :  { %3120 = vst [vmem:[#allocation10 + $0x18] sm:$0xff] %v3112_v32  ;;  %v3116_v12 = vadd.f32 %v3315_v51, %v3108_v33 }
 0xcf3   :  { %3123 = vst [vmem:[#allocation10 + $0x30] sm:$0xff] %v3115_v44 }
 0xcf4   :  { %3124 = vst [vmem:[#allocation10 + $0x38] sm:$0xff] %v3116_v12 }
 0xcf5   :  { %3415 = shalt.err (!%p3412_p8)
}
 0xcf6   :  { %s3416_s14 = scalar_lea.hbm %s6328_s6, 1024 }
 0xcf7   :  { %p3417_p9 = scmp.ne.s32.totalorder %s6328_s6, %s3416_s14  ;;  %p3420_p10 = scmp.lt.u32.totalorder %s3416_s14, %s6328_s6 }
 0xcf9   :  { %p3422_p11 = pnand %p3420_p10, %p3417_p9 }
 0xcfb   :  { %3425 = shalt.err (!%p3422_p11)
}
 0xcfc   :  { %3136 = dma.vmem_to_hbm [thread:$0]  %s3131_s24, 1024, %s6328_s6, [#allocation4], %s3436_s9, %s3436_s9, %s3437_s10  }
 0xcfd   :  { %3432 = dma.done.wait [#allocation4], 1024  }
 0xcfe   :  { %3433 = vsyncadd [#allocation4], 4294966272 }
 0xcff   :  { %3140 = vsyncpa [#allocation3], 1 }
 0xd00   :  { %3141 = vsyncpa [#allocation6], 1 }
 0xd01   :  { %3142 = vsyncpa [#allocation9], 1 }
 0xd02   :  { %3143 = vsyncpa [#allocation4], 1 }

</bundles_post_ra>
